<compile_context>
chip_gen: v5e
topology: v5e:2x2
jax: 0.10.0
libtpu: 0.0.40
codegen_flags: <defaults>
</compile_context>

<pallas_src>
import functools
import math

import jax
import jax.numpy as jnp
from jax import lax
from jax.experimental import pallas as pl
from jax.experimental.pallas import tpu as pltpu


# ----------------------------------------------------------------------------- kernel
def _dencoder_kernel(x_full_ref, x_q_ref, maskb_ref,
                     g1_ref, b1_ref, g2_ref, b2_ref,
                     wq_ref, bq_ref, wk_ref, bk_ref, wv_ref, bv_ref,
                     wo_ref, bo_ref,
                     w1_ref, c1_ref, w2_ref, c2_ref,
                     out_ref,
                     k_sc, v_sc,
                     *, num_heads, depth, tile_s, seq_len, exp_dtype):
    H, Dh, S, T = num_heads, depth, seq_len, tile_s
    D = H * Dh
    bf16 = jnp.bfloat16
    f32 = jnp.float32

    def layer_norm(v, gamma, beta):
        mu = jnp.mean(v, axis=-1, keepdims=True)
        var = jnp.mean(jnp.square(v - mu), axis=-1, keepdims=True)
        return (v - mu) * lax.rsqrt(var + 1e-6) * gamma + beta

    # ---- once per batch element (qt == 0): K / V over the full sequence -------------
    @pl.when(pl.program_id(1) == 0)
    def _():
        xf = x_full_ref[0].astype(f32)                                   # (S, D)
        nf = layer_norm(xf, g1_ref[...], b1_ref[...]).astype(bf16)
        k = jnp.dot(nf, wk_ref[...], preferred_element_type=f32) + bk_ref[...]
        v = jnp.dot(nf, wv_ref[...], preferred_element_type=f32) + bv_ref[...]
        # K stored head-split & transposed (H, Dh, S): lane-dense in S (no lane padding
        # for depth < 128) and the natural NN RHS for the per-tile QK^T batched matmul.
        # 2-D transpose + leading-dim split happens once per batch element.
        k_sc[...] = k.T.astype(bf16).reshape(H, Dh, S)
        # V stored (H, S, Dh): natural NN RHS for the PV batched matmul.
        v_sc[...] = v.reshape(S, H, Dh).transpose(1, 0, 2).astype(bf16)

    # ---- per query tile --------------------------------------------------------------
    x_q = x_q_ref[0].astype(f32)                                         # (T, D)
    n_q = layer_norm(x_q, g1_ref[...], b1_ref[...])

    scale = 1.0 / math.sqrt(Dh)
    q = (jnp.dot(n_q.astype(bf16), wq_ref[...],
                 preferred_element_type=f32) + bq_ref[...]) * scale      # scale folded in
    qh = q.reshape(T, H, Dh).transpose(1, 0, 2).astype(bf16)             # (H, T, Dh)

    # Batched-head attention: canonical NN batched matmuls on the MXU.
    logits = jnp.einsum("hqd,hdk->hqk", qh, k_sc[...],
                        preferred_element_type=f32)                      # (H, T, S)
    # Additive bias (mask * -1e9) precomputed host-side, broadcast over heads.
    logits = logits + maskb_ref[...].astype(f32)[None]

    m = jnp.max(logits, axis=-1, keepdims=True)
    # exp in bf16 on v6e/v7x (bf16 EUP), f32 on v5e; denominator accumulated then kept f32.
    p = jnp.exp((logits - m).astype(exp_dtype))                          # (H, T, S)
    denom = jnp.sum(p, axis=-1, keepdims=True).astype(f32)               # (H, T, 1)
    inv = pl.reciprocal(denom, approx=True)

    # Deferred softmax normalization: unnormalized P feeds the PV matmul (bf16), then ctx
    # is rescaled (H*T*Dh multiplies instead of H*T*S).
    ctx = jnp.einsum("hqk,hkd->hqd", p.astype(bf16), v_sc[...],
                     preferred_element_type=f32)                         # (H, T, Dh)
    ctx = ctx * inv

    attn = ctx.transpose(1, 0, 2).reshape(T, D).astype(bf16)             # (T, D)
    attn_out = jnp.dot(attn, wo_ref[...],
                       preferred_element_type=f32) + bo_ref[...]

    # dropout1: identity (eval mode)
    out1 = x_q + attn_out                                                # f32 residual

    # ---- LayerNorm 2 + FFN (intermediate bounded to (T, dff)) -------------------------
    n2 = layer_norm(out1, g2_ref[...], b2_ref[...]).astype(bf16)
    h1 = jnp.maximum(
        jnp.dot(n2, w1_ref[...], preferred_element_type=f32) + c1_ref[...], 0.0)
    ffn = jnp.dot(h1.astype(bf16), w2_ref[...],
                  preferred_element_type=f32) + c2_ref[...]

    # dropout2: identity (eval mode)
    out_ref[0] = (out1 + ffn).astype(out_ref.dtype)


# ----------------------------------------------------------------------------- helpers
def _vmem_capacity_bytes():
    try:
        return int(pltpu.get_tpu_info().vmem_capacity_bytes)
    except Exception:
        return 64 * 1024 * 1024      # conservative: never exceeds any generation's VMEM


def _default_exp_dtype():
    # v6e / v7x EUP has a bf16 path (~2x, halves live P); v5e and older do not.
    try:
        kind = jax.devices()[0].device_kind.lower()
    except Exception:
        return jnp.float32
    if any(v in kind for v in ("v2", "v3", "v4", "v5")):
        return jnp.float32
    return jnp.bfloat16


def _rup(x, m):
    return ((x + m - 1) // m) * m


def _pick_tile_s(S, H, D, dff, depth, vmem_cap):
    """Largest query tile whose live per-tile intermediates fit ~1/4 of physical VMEM."""
    budget = vmem_cap // 4
    candidates = [t for t in (512, 256, 128, 64, 32, 16, 8) if t <= S and S % t == 0]
    if not candidates:
        return S                      # tiny / odd S: single tile (block == full dims)
    if S <= 512 and S % 8 == 0 and S not in candidates:
        candidates.insert(0, S)
    for t in candidates:
        live = (H * t * S * (4 + 2)   # f32 logits + bf16 P
                + H * t * depth * 4   # ctx
                + t * dff * 4         # FFN hidden
                + 8 * t * D * 4)      # LN / residual / projections
        if live <= budget:
            return t
    return candidates[-1]


def _vmem_limit_bytes(S, D, dff, H, depth, tile_s, cap):
    # Weight blocks assumed double-buffered (worst case if Buffered(1) is unsupported).
    wbytes = 2 * (4 * D * D + 2 * D * dff) * 2
    xfull = 2 * S * D * 4
    xq = 2 * tile_s * D * 4
    mbytes = 2 * tile_s * S * 2
    obytes = 2 * tile_s * D * 4
    kv = (H * _rup(depth, 8) * _rup(S, 128) + H * _rup(S, 8) * _rup(depth, 128)) * 2
    live = (H * tile_s * S * (4 + 2) + H * tile_s * depth * 4
            + tile_s * dff * 4 + 10 * tile_s * D * 4)
    est = int(1.4 * (wbytes + xfull + xq + mbytes + obytes + kv + live))
    # Generation-aware cap: ~7/8 of physical VMEM (>= 56 MiB headroom rule on v7x,
    # up to ~112 MiB on v5e/v6e), floor at 32 MiB.
    return int(min(max(est, 32 * 1024 * 1024), cap * 7 // 8))


# ----------------------------------------------------------------------------- wrapper
def prepare_params(params):
    """One-time host-side prep: cast MXU weight matrices to bf16. Call once, reuse."""
    bf16 = jnp.bfloat16
    out = dict(params)
    for name in ("wq", "wk", "wv", "wo", "w1", "w2"):
        out[name] = params[name].astype(bf16)
    return out


def _pallas_forward(x, mask_bias, params, *, num_heads, depth, tile_s, dff,
                    vmem_limit, exp_dtype, single_buffer_weights):
    B, S, D = x.shape
    n_qt = S // tile_s
    bf16 = jnp.bfloat16

    pipeline_mode = pl.Buffered(1) if single_buffer_weights else None

    def rep(shape):
        # Grid-invariant operand (weights / biases / LN params): single-buffer if possible.
        idx = lambda b, qt, _shape=shape: (0,) * len(_shape)
        if pipeline_mode is not None:
            return pl.BlockSpec(shape, idx, pipeline_mode=pipeline_mode)
        return pl.BlockSpec(shape, idx)

    in_specs = [
        pl.BlockSpec((1, S, D), lambda b, qt: (b, 0, 0)),        # x, full seq (qt==0 K/V path)
        pl.BlockSpec((1, tile_s, D), lambda b, qt: (b, qt, 0)),  # x, query-tile rows
        pl.BlockSpec((tile_s, S), lambda b, qt: (qt, 0)),        # additive mask bias (bf16)
        rep((1, D)), rep((1, D)),                                # gamma1, beta1
        rep((1, D)), rep((1, D)),                                # gamma2, beta2
        rep((D, D)), rep((1, D)),                                # Wq, bq
        rep((D, D)), rep((1, D)),                                # Wk, bk
        rep((D, D)), rep((1, D)),                                # Wv, bv
        rep((D, D)), rep((1, D)),                                # Wo, bo
        rep((D, dff)), rep((1, dff)),                            # W1, c1
        rep((dff, D)), rep((1, D)),                              # W2, c2
    ]
    out_specs = pl.BlockSpec((1, tile_s, D), lambda b, qt: (b, qt, 0))

    kernel = functools.partial(_dencoder_kernel, num_heads=num_heads, depth=depth,
                               tile_s=tile_s, seq_len=S, exp_dtype=exp_dtype)

    return pl.pallas_call(
        kernel,
        out_shape=jax.ShapeDtypeStruct((B, S, D), x.dtype),
        grid_spec=pltpu.PrefetchScalarGridSpec(
            num_scalar_prefetch=0,
            grid=(B, n_qt),
            in_specs=in_specs,
            out_specs=out_specs,
            scratch_shapes=[
                pltpu.VMEM((num_heads, depth, S), bf16),   # K^T, head-split (lane-dense in S)
                pltpu.VMEM((num_heads, S, depth), bf16),   # V,   head-split
            ],
        ),
        compiler_params=pltpu.CompilerParams(
            dimension_semantics=("parallel", "arbitrary"),
            vmem_limit_bytes=vmem_limit,
        ),
    )(x, x, mask_bias,
      params["g1"], params["b1"], params["g2"], params["b2"],
      params["wq"], params["bq"], params["wk"], params["bk"],
      params["wv"], params["bv"], params["wo"], params["bo"],
      params["w1"], params["c1"], params["w2"], params["c2"])


def dencoder_layer(x, mask, params, num_heads, tile_s=None):
    """Fused DencoderLayer forward. `params` should come from prepare_params()."""
    B, S, D = x.shape
    dff = params["w1"].shape[1]
    depth = D // num_heads
    assert depth * num_heads == D

    cap = _vmem_capacity_bytes()
    if tile_s is None:
        tile_s = _pick_tile_s(S, num_heads, D, dff, depth, cap)
    assert S % tile_s == 0

    # Additive attention bias precomputed host-side (bf16): halves mask DMA and removes
    # the per-tile (-1e9) multiply.
    mask_bias = (mask.astype(jnp.float32) * (-1e9)).astype(jnp.bfloat16)

    exp_dtype = _default_exp_dtype()
    vmem_limit = _vmem_limit_bytes(S, D, dff, num_heads, depth, tile_s, cap)

    kwargs = dict(num_heads=num_heads, depth=depth, tile_s=tile_s, dff=dff,
                  vmem_limit=vmem_limit, exp_dtype=exp_dtype)
    try:
        return _pallas_forward(x, mask_bias, params, single_buffer_weights=True, **kwargs)
    except Exception:
        # pipeline_mode=pl.Buffered(1) not supported by this jax/pallas version:
        # fall back to default (double-buffered) invariant weight blocks.
        return _pallas_forward(x, mask_bias, params, single_buffer_weights=False, **kwargs)


# ----------------------------------------------------------------------------- reference
def dencoder_layer_ref(x, mask, params, num_heads):
    """Pure-JAX f32 reference mirroring the PyTorch forward (eval mode)."""
    B, S, D = x.shape
    depth = D // num_heads

    def ln(v, g, b):
        mu = jnp.mean(v, axis=-1, keepdims=True)
        var = jnp.mean((v - mu) ** 2, axis=-1, keepdims=True)
        return (v - mu) / jnp.sqrt(var + 1e-6) * g[0] + b[0]

    normed = ln(x, params["g1"], params["b1"])
    q = normed @ params["wq"] + params["bq"][0]
    k = normed @ params["wk"] + params["bk"][0]
    v = normed @ params["wv"] + params["bv"][0]

    def split(t):
        return t.reshape(B, S, num_heads, depth).transpose(0, 2, 1, 3)

    q, k, v = split(q), split(k), split(v)
    logits = jnp.einsum("bhqd,bhkd->bhqk", q, k) / math.sqrt(depth)
    logits = logits + mask[None, None] * (-1e9)
    w = jax.nn.softmax(logits, axis=-1)
    attn = jnp.einsum("bhqk,bhkd->bhqd", w, v).transpose(0, 2, 1, 3).reshape(B, S, D)
    attn_out = attn @ params["wo"] + params["bo"][0]
    out1 = x + attn_out
    out2n = ln(out1, params["g2"], params["b2"])
    h1 = jnp.maximum(out2n @ params["w1"] + params["c1"][0], 0.0)
    ffn = h1 @ params["w2"] + params["c2"][0]
    return out1 + ffn


# ----------------------------------------------------------------------------- main
if __name__ == "__main__":
    B, S, D, H, DFF = 2, 8, 32, 4, 64

    key = jax.random.PRNGKey(0)
    keys = jax.random.split(key, 16)

    def w(k, shape, scale=0.1):
        return (scale * jax.random.normal(k, shape)).astype(jnp.float32)

    params = {
        "g1": jnp.ones((1, D), jnp.float32), "b1": jnp.zeros((1, D), jnp.float32),
        "g2": jnp.ones((1, D), jnp.float32), "b2": jnp.zeros((1, D), jnp.float32),
        # Linear weights stored pre-transposed: y = x @ W + b
        "wq": w(keys[0], (D, D)), "bq": w(keys[1], (1, D)),
        "wk": w(keys[2], (D, D)), "bk": w(keys[3], (1, D)),
        "wv": w(keys[4], (D, D)), "bv": w(keys[5], (1, D)),
        "wo": w(keys[6], (D, D)), "bo": w(keys[7], (1, D)),
        "w1": w(keys[8], (D, DFF)), "c1": w(keys[9], (1, DFF)),
        "w2": w(keys[10], (DFF, D)), "c2": w(keys[11], (1, D)),
    }

    x = jax.random.normal(keys[12], (B, S, D), jnp.float32)
    # causal-style mask (1 = masked), broadcast over batch/heads like PyTorch
    mask = (1.0 - jnp.tril(jnp.ones((S, S), jnp.float32)))

    prepared = prepare_params(params)         # one-time bf16 weight casts (cached/reused)

    out = dencoder_layer(x, mask, prepared, num_heads=H)
    out = jax.block_until_ready(out)

    ref = dencoder_layer_ref(x, mask, params, num_heads=H)
    assert out.shape == (B, S, D)
    # bf16 MXU inputs / bf16 exp (f32 accumulation) -> looser tolerance than all-f32.
    assert jnp.allclose(out, ref, atol=3e-2, rtol=3e-2), "mismatch vs JAX reference"

    print("KERNEL_OK")
</pallas_src>

<mosaic_0001>
module attributes {stable_mosaic.version = 11 : i64} {
  func.func @_dencoder_kernel(%arg0: i32, %arg1: i32, %arg2: memref<1x8x32xf32, #tpu.memory_space<vmem>>, %arg3: memref<1x8x32xf32, #tpu.memory_space<vmem>>, %arg4: memref<8x8xbf16, #tpu.memory_space<vmem>>, %arg5: memref<1x32xf32, #tpu.memory_space<vmem>>, %arg6: memref<1x32xf32, #tpu.memory_space<vmem>>, %arg7: memref<1x32xf32, #tpu.memory_space<vmem>>, %arg8: memref<1x32xf32, #tpu.memory_space<vmem>>, %arg9: memref<32x32xbf16, #tpu.memory_space<vmem>>, %arg10: memref<1x32xf32, #tpu.memory_space<vmem>>, %arg11: memref<32x32xbf16, #tpu.memory_space<vmem>>, %arg12: memref<1x32xf32, #tpu.memory_space<vmem>>, %arg13: memref<32x32xbf16, #tpu.memory_space<vmem>>, %arg14: memref<1x32xf32, #tpu.memory_space<vmem>>, %arg15: memref<32x32xbf16, #tpu.memory_space<vmem>>, %arg16: memref<1x32xf32, #tpu.memory_space<vmem>>, %arg17: memref<32x64xbf16, #tpu.memory_space<vmem>>, %arg18: memref<1x64xf32, #tpu.memory_space<vmem>>, %arg19: memref<64x32xbf16, #tpu.memory_space<vmem>>, %arg20: memref<1x32xf32, #tpu.memory_space<vmem>>, %arg21: memref<1x8x32xf32, #tpu.memory_space<vmem>>, %arg22: memref<4x8x8xbf16, #tpu.memory_space<vmem>>, %arg23: memref<4x8x8xbf16, #tpu.memory_space<vmem>>) attributes {dimension_semantics = [#tpu.dimension_semantics<parallel>, #tpu.dimension_semantics<arbitrary>], iteration_bounds = array<i64: 2, 1>, scalar_prefetch = 0 : i64, scratch_operands = 2 : i64, tpu.core_type = #tpu.core_type<tc>, window_params = [{transform_indices = @transform_0, window_bounds = array<i64: 1, 8, 32>}, {transform_indices = @transform_1, window_bounds = array<i64: 1, 8, 32>}, {transform_indices = @transform_2, window_bounds = array<i64: 8, 8>}, {pipeline_mode = #tpu.pipeline_mode<synchronous>, transform_indices = @transform_3, window_bounds = array<i64: 1, 32>}, {pipeline_mode = #tpu.pipeline_mode<synchronous>, transform_indices = @transform_4, window_bounds = array<i64: 1, 32>}, {pipeline_mode = #tpu.pipeline_mode<synchronous>, transform_indices = @transform_5, window_bounds = array<i64: 1, 32>}, {pipeline_mode = #tpu.pipeline_mode<synchronous>, transform_indices = @transform_6, window_bounds = array<i64: 1, 32>}, {pipeline_mode = #tpu.pipeline_mode<synchronous>, transform_indices = @transform_7, window_bounds = array<i64: 32, 32>}, {pipeline_mode = #tpu.pipeline_mode<synchronous>, transform_indices = @transform_8, window_bounds = array<i64: 1, 32>}, {pipeline_mode = #tpu.pipeline_mode<synchronous>, transform_indices = @transform_9, window_bounds = array<i64: 32, 32>}, {pipeline_mode = #tpu.pipeline_mode<synchronous>, transform_indices = @transform_10, window_bounds = array<i64: 1, 32>}, {pipeline_mode = #tpu.pipeline_mode<synchronous>, transform_indices = @transform_11, window_bounds = array<i64: 32, 32>}, {pipeline_mode = #tpu.pipeline_mode<synchronous>, transform_indices = @transform_12, window_bounds = array<i64: 1, 32>}, {pipeline_mode = #tpu.pipeline_mode<synchronous>, transform_indices = @transform_13, window_bounds = array<i64: 32, 32>}, {pipeline_mode = #tpu.pipeline_mode<synchronous>, transform_indices = @transform_14, window_bounds = array<i64: 1, 32>}, {pipeline_mode = #tpu.pipeline_mode<synchronous>, transform_indices = @transform_15, window_bounds = array<i64: 32, 64>}, {pipeline_mode = #tpu.pipeline_mode<synchronous>, transform_indices = @transform_16, window_bounds = array<i64: 1, 64>}, {pipeline_mode = #tpu.pipeline_mode<synchronous>, transform_indices = @transform_17, window_bounds = array<i64: 64, 32>}, {pipeline_mode = #tpu.pipeline_mode<synchronous>, transform_indices = @transform_18, window_bounds = array<i64: 1, 32>}, {transform_indices = @transform_19, window_bounds = array<i64: 1, 8, 32>}]} {
    %c0_i32 = arith.constant 0 : i32
    %0 = arith.cmpi eq, %arg1, %c0_i32 : i32
    %1 = arith.extui %0 : i1 to i32
    %c0_i32_0 = arith.constant 0 : i32
    %2 = arith.cmpi ne, %1, %c0_i32_0 : i32
    scf.if %2 {
      %c0_57 = arith.constant 0 : index
      %c0_58 = arith.constant 0 : index
      %c0_59 = arith.constant 0 : index
      %114 = vector.load %arg2[%c0_57, %c0_58, %c0_59] : memref<1x8x32xf32, #tpu.memory_space<vmem>>, vector<1x8x32xf32>
      %115 = vector.shape_cast %114 : vector<1x8x32xf32> to vector<8x32xf32>
      %c0_60 = arith.constant 0 : index
      %c0_61 = arith.constant 0 : index
      %116 = vector.load %arg5[%c0_60, %c0_61] : memref<1x32xf32, #tpu.memory_space<vmem>>, vector<1x32xf32>
      %c0_62 = arith.constant 0 : index
      %c0_63 = arith.constant 0 : index
      %117 = vector.load %arg6[%c0_62, %c0_63] : memref<1x32xf32, #tpu.memory_space<vmem>>, vector<1x32xf32>
      %cst_64 = arith.constant dense<0.000000e+00> : vector<8xf32>
      %118 = vector.multi_reduction <add>, %115, %cst_64 [1] : vector<8x32xf32> to vector<8xf32>
      %119 = vector.shape_cast %118 : vector<8xf32> to vector<8x1xf32>
      %cst_65 = arith.constant 3.200000e+01 : f32
      %120 = vector.broadcast %cst_65 : f32 to vector<8x1xf32>
      %121 = arith.divf %119, %120 : vector<8x1xf32>
      %122 = vector.broadcast %121 : vector<8x1xf32> to vector<8x32xf32>
      %123 = arith.subf %115, %122 : vector<8x32xf32>
      %124 = arith.mulf %123, %123 : vector<8x32xf32>
      %cst_66 = arith.constant dense<0.000000e+00> : vector<8xf32>
      %125 = vector.multi_reduction <add>, %124, %cst_66 [1] : vector<8x32xf32> to vector<8xf32>
      %126 = vector.shape_cast %125 : vector<8xf32> to vector<8x1xf32>
      %cst_67 = arith.constant 3.200000e+01 : f32
      %127 = vector.broadcast %cst_67 : f32 to vector<8x1xf32>
      %128 = arith.divf %126, %127 : vector<8x1xf32>
      %129 = vector.broadcast %121 : vector<8x1xf32> to vector<8x32xf32>
      %130 = arith.subf %115, %129 : vector<8x32xf32>
      %cst_68 = arith.constant 9.99999997E-7 : f32
      %131 = vector.broadcast %cst_68 : f32 to vector<8x1xf32>
      %132 = arith.addf %128, %131 : vector<8x1xf32>
      %133 = math.rsqrt %132 : vector<8x1xf32>
      %134 = vector.broadcast %133 : vector<8x1xf32> to vector<8x32xf32>
      %135 = arith.mulf %130, %134 : vector<8x32xf32>
      %136 = vector.broadcast %116 : vector<1x32xf32> to vector<8x32xf32>
      %137 = arith.mulf %135, %136 : vector<8x32xf32>
      %138 = vector.broadcast %117 : vector<1x32xf32> to vector<8x32xf32>
      %139 = arith.addf %137, %138 : vector<8x32xf32>
      %140 = arith.truncf %139 : vector<8x32xf32> to vector<8x32xbf16>
      %c0_69 = arith.constant 0 : index
      %c0_70 = arith.constant 0 : index
      %141 = vector.load %arg11[%c0_69, %c0_70] : memref<32x32xbf16, #tpu.memory_space<vmem>>, vector<32x32xbf16>
      %cst_71 = arith.constant dense<0.000000e+00> : vector<8x32xf32>
      %142 = tpu.matmul %140, %141, %cst_71 {dimension_numbers = #tpu.dot_dimension_numbers<[1], [0], [0], [1], [0, 0, 1, 1], [], []>} : vector<8x32xbf16>, vector<32x32xbf16>, vector<8x32xf32> -> vector<8x32xf32>
      %c0_72 = arith.constant 0 : index
      %c0_73 = arith.constant 0 : index
      %143 = vector.load %arg12[%c0_72, %c0_73] : memref<1x32xf32, #tpu.memory_space<vmem>>, vector<1x32xf32>
      %144 = vector.broadcast %143 : vector<1x32xf32> to vector<8x32xf32>
      %145 = arith.addf %142, %144 : vector<8x32xf32>
      %c0_74 = arith.constant 0 : index
      %c0_75 = arith.constant 0 : index
      %146 = vector.load %arg13[%c0_74, %c0_75] : memref<32x32xbf16, #tpu.memory_space<vmem>>, vector<32x32xbf16>
      %cst_76 = arith.constant dense<0.000000e+00> : vector<8x32xf32>
      %147 = tpu.matmul %140, %146, %cst_76 {dimension_numbers = #tpu.dot_dimension_numbers<[1], [0], [0], [1], [0, 0, 1, 1], [], []>} : vector<8x32xbf16>, vector<32x32xbf16>, vector<8x32xf32> -> vector<8x32xf32>
      %c0_77 = arith.constant 0 : index
      %c0_78 = arith.constant 0 : index
      %148 = vector.load %arg14[%c0_77, %c0_78] : memref<1x32xf32, #tpu.memory_space<vmem>>, vector<1x32xf32>
      %149 = vector.broadcast %148 : vector<1x32xf32> to vector<8x32xf32>
      %150 = arith.addf %147, %149 : vector<8x32xf32>
      %151 = tpu.transpose %145, [1, 0] : vector<8x32xf32> -> vector<32x8xf32>
      %152 = arith.truncf %151 : vector<32x8xf32> to vector<32x8xbf16>
      %153 = vector.shape_cast %152 : vector<32x8xbf16> to vector<4x8x8xbf16>
      %c0_79 = arith.constant 0 : index
      %c0_80 = arith.constant 0 : index
      %c0_81 = arith.constant 0 : index
      %154 = vector.load %arg22[%c0_79, %c0_80, %c0_81] : memref<4x8x8xbf16, #tpu.memory_space<vmem>>, vector<4x8x8xbf16>
      tpu.vector_store %arg22[%c0_79, %c0_80, %c0_81], %153 {strides = array<i32>} : memref<4x8x8xbf16, #tpu.memory_space<vmem>>, vector<4x8x8xbf16>,
      %155 = vector.shape_cast %150 : vector<8x32xf32> to vector<8x4x8xf32>
      %156 = tpu.transpose %155, [1, 0, 2] : vector<8x4x8xf32> -> vector<4x8x8xf32>
      %157 = arith.truncf %156 : vector<4x8x8xf32> to vector<4x8x8xbf16>
      %c0_82 = arith.constant 0 : index
      %c0_83 = arith.constant 0 : index
      %c0_84 = arith.constant 0 : index
      %158 = vector.load %arg23[%c0_82, %c0_83, %c0_84] : memref<4x8x8xbf16, #tpu.memory_space<vmem>>, vector<4x8x8xbf16>
      tpu.vector_store %arg23[%c0_82, %c0_83, %c0_84], %157 {strides = array<i32>} : memref<4x8x8xbf16, #tpu.memory_space<vmem>>, vector<4x8x8xbf16>,
    } else {
    }
    %c0 = arith.constant 0 : index
    %c0_1 = arith.constant 0 : index
    %c0_2 = arith.constant 0 : index
    %3 = vector.load %arg3[%c0, %c0_1, %c0_2] : memref<1x8x32xf32, #tpu.memory_space<vmem>>, vector<1x8x32xf32>
    %4 = vector.shape_cast %3 : vector<1x8x32xf32> to vector<8x32xf32>
    %c0_3 = arith.constant 0 : index
    %c0_4 = arith.constant 0 : index
    %5 = vector.load %arg5[%c0_3, %c0_4] : memref<1x32xf32, #tpu.memory_space<vmem>>, vector<1x32xf32>
    %c0_5 = arith.constant 0 : index
    %c0_6 = arith.constant 0 : index
    %6 = vector.load %arg6[%c0_5, %c0_6] : memref<1x32xf32, #tpu.memory_space<vmem>>, vector<1x32xf32>
    %cst = arith.constant dense<0.000000e+00> : vector<8xf32>
    %7 = vector.multi_reduction <add>, %4, %cst [1] : vector<8x32xf32> to vector<8xf32>
    %8 = vector.shape_cast %7 : vector<8xf32> to vector<8x1xf32>
    %cst_7 = arith.constant 3.200000e+01 : f32
    %9 = vector.broadcast %cst_7 : f32 to vector<8x1xf32>
    %10 = arith.divf %8, %9 : vector<8x1xf32>
    %11 = vector.broadcast %10 : vector<8x1xf32> to vector<8x32xf32>
    %12 = arith.subf %4, %11 : vector<8x32xf32>
    %13 = arith.mulf %12, %12 : vector<8x32xf32>
    %cst_8 = arith.constant dense<0.000000e+00> : vector<8xf32>
    %14 = vector.multi_reduction <add>, %13, %cst_8 [1] : vector<8x32xf32> to vector<8xf32>
    %15 = vector.shape_cast %14 : vector<8xf32> to vector<8x1xf32>
    %cst_9 = arith.constant 3.200000e+01 : f32
    %16 = vector.broadcast %cst_9 : f32 to vector<8x1xf32>
    %17 = arith.divf %15, %16 : vector<8x1xf32>
    %18 = vector.broadcast %10 : vector<8x1xf32> to vector<8x32xf32>
    %19 = arith.subf %4, %18 : vector<8x32xf32>
    %cst_10 = arith.constant 9.99999997E-7 : f32
    %20 = vector.broadcast %cst_10 : f32 to vector<8x1xf32>
    %21 = arith.addf %17, %20 : vector<8x1xf32>
    %22 = math.rsqrt %21 : vector<8x1xf32>
    %23 = vector.broadcast %22 : vector<8x1xf32> to vector<8x32xf32>
    %24 = arith.mulf %19, %23 : vector<8x32xf32>
    %25 = vector.broadcast %5 : vector<1x32xf32> to vector<8x32xf32>
    %26 = arith.mulf %24, %25 : vector<8x32xf32>
    %27 = vector.broadcast %6 : vector<1x32xf32> to vector<8x32xf32>
    %28 = arith.addf %26, %27 : vector<8x32xf32>
    %29 = arith.truncf %28 : vector<8x32xf32> to vector<8x32xbf16>
    %c0_11 = arith.constant 0 : index
    %c0_12 = arith.constant 0 : index
    %30 = vector.load %arg9[%c0_11, %c0_12] : memref<32x32xbf16, #tpu.memory_space<vmem>>, vector<32x32xbf16>
    %cst_13 = arith.constant dense<0.000000e+00> : vector<8x32xf32>
    %31 = tpu.matmul %29, %30, %cst_13 {dimension_numbers = #tpu.dot_dimension_numbers<[1], [0], [0], [1], [0, 0, 1, 1], [], []>} : vector<8x32xbf16>, vector<32x32xbf16>, vector<8x32xf32> -> vector<8x32xf32>
    %c0_14 = arith.constant 0 : index
    %c0_15 = arith.constant 0 : index
    %32 = vector.load %arg10[%c0_14, %c0_15] : memref<1x32xf32, #tpu.memory_space<vmem>>, vector<1x32xf32>
    %33 = vector.broadcast %32 : vector<1x32xf32> to vector<8x32xf32>
    %34 = arith.addf %31, %33 : vector<8x32xf32>
    %cst_16 = arith.constant 0.353553385 : f32
    %35 = vector.broadcast %cst_16 : f32 to vector<8x32xf32>
    %36 = arith.mulf %34, %35 : vector<8x32xf32>
    %37 = vector.shape_cast %36 : vector<8x32xf32> to vector<8x4x8xf32>
    %38 = tpu.transpose %37, [1, 0, 2] : vector<8x4x8xf32> -> vector<4x8x8xf32>
    %39 = arith.truncf %38 : vector<4x8x8xf32> to vector<4x8x8xbf16>
    %c0_17 = arith.constant 0 : index
    %c0_18 = arith.constant 0 : index
    %c0_19 = arith.constant 0 : index
    %40 = vector.load %arg22[%c0_17, %c0_18, %c0_19] : memref<4x8x8xbf16, #tpu.memory_space<vmem>>, vector<4x8x8xbf16>
    "tpu.trace_start"() <{level = 10 : i32, message = "hqd,hdk->hqk"}> : () -> ()
    %cst_20 = arith.constant dense<0.000000e+00> : vector<4x8x8xf32>
    %41 = tpu.matmul %39, %40, %cst_20 {dimension_numbers = #tpu.dot_dimension_numbers<[2], [1], [1], [2], [0, 0, 0, 1, 1, 2], [0], [0]>} : vector<4x8x8xbf16>, vector<4x8x8xbf16>, vector<4x8x8xf32> -> vector<4x8x8xf32>
    "tpu.trace_stop"() : () -> ()
    %c0_21 = arith.constant 0 : index
    %c0_22 = arith.constant 0 : index
    %42 = vector.load %arg4[%c0_21, %c0_22] : memref<8x8xbf16, #tpu.memory_space<vmem>>, vector<8x8xbf16>
    %43 = arith.extf %42 : vector<8x8xbf16> to vector<8x8xf32>
    %44 = vector.shape_cast %43 : vector<8x8xf32> to vector<1x8x8xf32>
    %45 = vector.broadcast %44 : vector<1x8x8xf32> to vector<4x8x8xf32>
    %46 = arith.addf %41, %45 : vector<4x8x8xf32>
    %cst_23 = arith.constant dense<0xFF800000> : vector<4x8xf32>
    %47 = vector.multi_reduction <maximumf>, %46, %cst_23 [2] : vector<4x8x8xf32> to vector<4x8xf32>
    %48 = vector.shape_cast %47 : vector<4x8xf32> to vector<4x8x1xf32>
    %49 = vector.broadcast %48 : vector<4x8x1xf32> to vector<4x8x8xf32>
    %50 = arith.subf %46, %49 : vector<4x8x8xf32>
    %51 = arith.truncf %50 : vector<4x8x8xf32> to vector<4x8x8xbf16>
    %52 = math.exp %51 : vector<4x8x8xbf16>
    %53 = arith.extf %52 : vector<4x8x8xbf16> to vector<4x8x8xf32>
    %cst_24 = arith.constant dense<0.000000e+00> : vector<4x8xf32>
    %54 = vector.multi_reduction <add>, %53, %cst_24 [2] : vector<4x8x8xf32> to vector<4x8xf32>
    %55 = vector.shape_cast %54 : vector<4x8xf32> to vector<4x8x1xf32>
    %56 = arith.truncf %55 : vector<4x8x1xf32> to vector<4x8x1xbf16>
    %57 = arith.extf %56 : vector<4x8x1xbf16> to vector<4x8x1xf32>
    %58 = tpu.reciprocal %57 {approx = true} : vector<4x8x1xf32> -> vector<4x8x1xf32>
    %c0_25 = arith.constant 0 : index
    %c0_26 = arith.constant 0 : index
    %c0_27 = arith.constant 0 : index
    %59 = vector.load %arg23[%c0_25, %c0_26, %c0_27] : memref<4x8x8xbf16, #tpu.memory_space<vmem>>, vector<4x8x8xbf16>
    "tpu.trace_start"() <{level = 10 : i32, message = "hqk,hkd->hqd"}> : () -> ()
    %cst_28 = arith.constant dense<0.000000e+00> : vector<4x8x8xf32>
    %60 = tpu.matmul %52, %59, %cst_28 {dimension_numbers = #tpu.dot_dimension_numbers<[2], [1], [1], [2], [0, 0, 0, 1, 1, 2], [0], [0]>} : vector<4x8x8xbf16>, vector<4x8x8xbf16>, vector<4x8x8xf32> -> vector<4x8x8xf32>
    "tpu.trace_stop"() : () -> ()
    %61 = vector.broadcast %58 : vector<4x8x1xf32> to vector<4x8x8xf32>
    %62 = arith.mulf %60, %61 : vector<4x8x8xf32>
    %63 = tpu.transpose %62, [1, 0, 2] : vector<4x8x8xf32> -> vector<8x4x8xf32>
    %64 = vector.shape_cast %63 : vector<8x4x8xf32> to vector<8x32xf32>
    %65 = arith.truncf %64 : vector<8x32xf32> to vector<8x32xbf16>
    %c0_29 = arith.constant 0 : index
    %c0_30 = arith.constant 0 : index
    %66 = vector.load %arg15[%c0_29, %c0_30] : memref<32x32xbf16, #tpu.memory_space<vmem>>, vector<32x32xbf16>
    %cst_31 = arith.constant dense<0.000000e+00> : vector<8x32xf32>
    %67 = tpu.matmul %65, %66, %cst_31 {dimension_numbers = #tpu.dot_dimension_numbers<[1], [0], [0], [1], [0, 0, 1, 1], [], []>} : vector<8x32xbf16>, vector<32x32xbf16>, vector<8x32xf32> -> vector<8x32xf32>
    %c0_32 = arith.constant 0 : index
    %c0_33 = arith.constant 0 : index
    %68 = vector.load %arg16[%c0_32, %c0_33] : memref<1x32xf32, #tpu.memory_space<vmem>>, vector<1x32xf32>
    %69 = vector.broadcast %68 : vector<1x32xf32> to vector<8x32xf32>
    %70 = arith.addf %67, %69 : vector<8x32xf32>
    %71 = arith.addf %4, %70 : vector<8x32xf32>
    %c0_34 = arith.constant 0 : index
    %c0_35 = arith.constant 0 : index
    %72 = vector.load %arg7[%c0_34, %c0_35] : memref<1x32xf32, #tpu.memory_space<vmem>>, vector<1x32xf32>
    %c0_36 = arith.constant 0 : index
    %c0_37 = arith.constant 0 : index
    %73 = vector.load %arg8[%c0_36, %c0_37] : memref<1x32xf32, #tpu.memory_space<vmem>>, vector<1x32xf32>
    %cst_38 = arith.constant dense<0.000000e+00> : vector<8xf32>
    %74 = vector.multi_reduction <add>, %71, %cst_38 [1] : vector<8x32xf32> to vector<8xf32>
    %75 = vector.shape_cast %74 : vector<8xf32> to vector<8x1xf32>
    %cst_39 = arith.constant 3.200000e+01 : f32
    %76 = vector.broadcast %cst_39 : f32 to vector<8x1xf32>
    %77 = arith.divf %75, %76 : vector<8x1xf32>
    %78 = vector.broadcast %77 : vector<8x1xf32> to vector<8x32xf32>
    %79 = arith.subf %71, %78 : vector<8x32xf32>
    %80 = arith.mulf %79, %79 : vector<8x32xf32>
    %cst_40 = arith.constant dense<0.000000e+00> : vector<8xf32>
    %81 = vector.multi_reduction <add>, %80, %cst_40 [1] : vector<8x32xf32> to vector<8xf32>
    %82 = vector.shape_cast %81 : vector<8xf32> to vector<8x1xf32>
    %cst_41 = arith.constant 3.200000e+01 : f32
    %83 = vector.broadcast %cst_41 : f32 to vector<8x1xf32>
    %84 = arith.divf %82, %83 : vector<8x1xf32>
    %85 = vector.broadcast %77 : vector<8x1xf32> to vector<8x32xf32>
    %86 = arith.subf %71, %85 : vector<8x32xf32>
    %cst_42 = arith.constant 9.99999997E-7 : f32
    %87 = vector.broadcast %cst_42 : f32 to vector<8x1xf32>
    %88 = arith.addf %84, %87 : vector<8x1xf32>
    %89 = math.rsqrt %88 : vector<8x1xf32>
    %90 = vector.broadcast %89 : vector<8x1xf32> to vector<8x32xf32>
    %91 = arith.mulf %86, %90 : vector<8x32xf32>
    %92 = vector.broadcast %72 : vector<1x32xf32> to vector<8x32xf32>
    %93 = arith.mulf %91, %92 : vector<8x32xf32>
    %94 = vector.broadcast %73 : vector<1x32xf32> to vector<8x32xf32>
    %95 = arith.addf %93, %94 : vector<8x32xf32>
    %96 = arith.truncf %95 : vector<8x32xf32> to vector<8x32xbf16>
    %c0_43 = arith.constant 0 : index
    %c0_44 = arith.constant 0 : index
    %97 = vector.load %arg17[%c0_43, %c0_44] : memref<32x64xbf16, #tpu.memory_space<vmem>>, vector<32x64xbf16>
    %cst_45 = arith.constant dense<0.000000e+00> : vector<8x64xf32>
    %98 = tpu.matmul %96, %97, %cst_45 {dimension_numbers = #tpu.dot_dimension_numbers<[1], [0], [0], [1], [0, 0, 1, 1], [], []>} : vector<8x32xbf16>, vector<32x64xbf16>, vector<8x64xf32> -> vector<8x64xf32>
    %c0_46 = arith.constant 0 : index
    %c0_47 = arith.constant 0 : index
    %99 = vector.load %arg18[%c0_46, %c0_47] : memref<1x64xf32, #tpu.memory_space<vmem>>, vector<1x64xf32>
    %100 = vector.broadcast %99 : vector<1x64xf32> to vector<8x64xf32>
    %101 = arith.addf %98, %100 : vector<8x64xf32>
    %cst_48 = arith.constant 0.000000e+00 : f32
    %102 = vector.broadcast %cst_48 : f32 to vector<8x64xf32>
    %103 = arith.maximumf %101, %102 : vector<8x64xf32>
    %104 = arith.truncf %103 : vector<8x64xf32> to vector<8x64xbf16>
    %c0_49 = arith.constant 0 : index
    %c0_50 = arith.constant 0 : index
    %105 = vector.load %arg19[%c0_49, %c0_50] : memref<64x32xbf16, #tpu.memory_space<vmem>>, vector<64x32xbf16>
    %cst_51 = arith.constant dense<0.000000e+00> : vector<8x32xf32>
    %106 = tpu.matmul %104, %105, %cst_51 {dimension_numbers = #tpu.dot_dimension_numbers<[1], [0], [0], [1], [0, 0, 1, 1], [], []>} : vector<8x64xbf16>, vector<64x32xbf16>, vector<8x32xf32> -> vector<8x32xf32>
    %c0_52 = arith.constant 0 : index
    %c0_53 = arith.constant 0 : index
    %107 = vector.load %arg20[%c0_52, %c0_53] : memref<1x32xf32, #tpu.memory_space<vmem>>, vector<1x32xf32>
    %108 = vector.broadcast %107 : vector<1x32xf32> to vector<8x32xf32>
    %109 = arith.addf %106, %108 : vector<8x32xf32>
    %110 = arith.addf %71, %109 : vector<8x32xf32>
    %c0_54 = arith.constant 0 : index
    %c0_55 = arith.constant 0 : index
    %c0_56 = arith.constant 0 : index
    %111 = vector.load %arg21[%c0_54, %c0_55, %c0_56] : memref<1x8x32xf32, #tpu.memory_space<vmem>>, vector<1x8x32xf32>
    %112 = vector.shape_cast %111 : vector<1x8x32xf32> to vector<8x32xf32>
    %113 = vector.shape_cast %110 : vector<8x32xf32> to vector<1x8x32xf32>
    tpu.vector_store %arg21[%c0_54, %c0_55, %c0_56], %113 {strides = array<i32>} : memref<1x8x32xf32, #tpu.memory_space<vmem>>, vector<1x8x32xf32>,
    return
  }
  func.func @transform_0(%arg0: i32, %arg1: i32) -> (i32, i32, i32) {
    %c0_i32 = arith.constant 0 : i32
    %c0_i32_0 = arith.constant 0 : i32
    %c0_i32_1 = arith.constant 0 : i32
    return %arg0, %c0_i32, %c0_i32_0 : i32, i32, i32
  }
  func.func @transform_1(%arg0: i32, %arg1: i32) -> (i32, i32, i32) {
    %c0_i32 = arith.constant 0 : i32
    %c0_i32_0 = arith.constant 0 : i32
    return %arg0, %arg1, %c0_i32 : i32, i32, i32
  }
  func.func @transform_2(%arg0: i32, %arg1: i32) -> (i32, i32) {
    %c0_i32 = arith.constant 0 : i32
    %c0_i32_0 = arith.constant 0 : i32
    return %arg1, %c0_i32 : i32, i32
  }
  func.func @transform_3(%arg0: i32, %arg1: i32) -> (i32, i32) {
    %c0_i32 = arith.constant 0 : i32
    %c0_i32_0 = arith.constant 0 : i32
    %c0_i32_1 = arith.constant 0 : i32
    return %c0_i32, %c0_i32_0 : i32, i32
  }
  func.func @transform_4(%arg0: i32, %arg1: i32) -> (i32, i32) {
    %c0_i32 = arith.constant 0 : i32
    %c0_i32_0 = arith.constant 0 : i32
    %c0_i32_1 = arith.constant 0 : i32
    return %c0_i32, %c0_i32_0 : i32, i32
  }
  func.func @transform_5(%arg0: i32, %arg1: i32) -> (i32, i32) {
    %c0_i32 = arith.constant 0 : i32
    %c0_i32_0 = arith.constant 0 : i32
    %c0_i32_1 = arith.constant 0 : i32
    return %c0_i32, %c0_i32_0 : i32, i32
  }
  func.func @transform_6(%arg0: i32, %arg1: i32) -> (i32, i32) {
    %c0_i32 = arith.constant 0 : i32
    %c0_i32_0 = arith.constant 0 : i32
    %c0_i32_1 = arith.constant 0 : i32
    return %c0_i32, %c0_i32_0 : i32, i32
  }
  func.func @transform_7(%arg0: i32, %arg1: i32) -> (i32, i32) {
    %c0_i32 = arith.constant 0 : i32
    %c0_i32_0 = arith.constant 0 : i32
    %c0_i32_1 = arith.constant 0 : i32
    return %c0_i32, %c0_i32_0 : i32, i32
  }
  func.func @transform_8(%arg0: i32, %arg1: i32) -> (i32, i32) {
    %c0_i32 = arith.constant 0 : i32
    %c0_i32_0 = arith.constant 0 : i32
    %c0_i32_1 = arith.constant 0 : i32
    return %c0_i32, %c0_i32_0 : i32, i32
  }
  func.func @transform_9(%arg0: i32, %arg1: i32) -> (i32, i32) {
    %c0_i32 = arith.constant 0 : i32
    %c0_i32_0 = arith.constant 0 : i32
    %c0_i32_1 = arith.constant 0 : i32
    return %c0_i32, %c0_i32_0 : i32, i32
  }
  func.func @transform_10(%arg0: i32, %arg1: i32) -> (i32, i32) {
    %c0_i32 = arith.constant 0 : i32
    %c0_i32_0 = arith.constant 0 : i32
    %c0_i32_1 = arith.constant 0 : i32
    return %c0_i32, %c0_i32_0 : i32, i32
  }
  func.func @transform_11(%arg0: i32, %arg1: i32) -> (i32, i32) {
    %c0_i32 = arith.constant 0 : i32
    %c0_i32_0 = arith.constant 0 : i32
    %c0_i32_1 = arith.constant 0 : i32
    return %c0_i32, %c0_i32_0 : i32, i32
  }
  func.func @transform_12(%arg0: i32, %arg1: i32) -> (i32, i32) {
    %c0_i32 = arith.constant 0 : i32
    %c0_i32_0 = arith.constant 0 : i32
    %c0_i32_1 = arith.constant 0 : i32
    return %c0_i32, %c0_i32_0 : i32, i32
  }
  func.func @transform_13(%arg0: i32, %arg1: i32) -> (i32, i32) {
    %c0_i32 = arith.constant 0 : i32
    %c0_i32_0 = arith.constant 0 : i32
    %c0_i32_1 = arith.constant 0 : i32
    return %c0_i32, %c0_i32_0 : i32, i32
  }
  func.func @transform_14(%arg0: i32, %arg1: i32) -> (i32, i32) {
    %c0_i32 = arith.constant 0 : i32
    %c0_i32_0 = arith.constant 0 : i32
    %c0_i32_1 = arith.constant 0 : i32
    return %c0_i32, %c0_i32_0 : i32, i32
  }
  func.func @transform_15(%arg0: i32, %arg1: i32) -> (i32, i32) {
    %c0_i32 = arith.constant 0 : i32
    %c0_i32_0 = arith.constant 0 : i32
    %c0_i32_1 = arith.constant 0 : i32
    return %c0_i32, %c0_i32_0 : i32, i32
  }
  func.func @transform_16(%arg0: i32, %arg1: i32) -> (i32, i32) {
    %c0_i32 = arith.constant 0 : i32
    %c0_i32_0 = arith.constant 0 : i32
    %c0_i32_1 = arith.constant 0 : i32
    return %c0_i32, %c0_i32_0 : i32, i32
  }
  func.func @transform_17(%arg0: i32, %arg1: i32) -> (i32, i32) {
    %c0_i32 = arith.constant 0 : i32
    %c0_i32_0 = arith.constant 0 : i32
    %c0_i32_1 = arith.constant 0 : i32
    return %c0_i32, %c0_i32_0 : i32, i32
  }
  func.func @transform_18(%arg0: i32, %arg1: i32) -> (i32, i32) {
    %c0_i32 = arith.constant 0 : i32
    %c0_i32_0 = arith.constant 0 : i32
    %c0_i32_1 = arith.constant 0 : i32
    return %c0_i32, %c0_i32_0 : i32, i32
  }
  func.func @transform_19(%arg0: i32, %arg1: i32) -> (i32, i32, i32) {
    %c0_i32 = arith.constant 0 : i32
    %c0_i32_0 = arith.constant 0 : i32
    return %arg0, %arg1, %c0_i32 : i32, i32, i32
  }
}

module attributes {stable_mosaic.version = 11 : i64} {
  func.func @_dencoder_kernel(%arg0: i32, %arg1: i32, %arg2: memref<1x8x32xf32, #tpu.memory_space<vmem>>, %arg3: memref<1x8x32xf32, #tpu.memory_space<vmem>>, %arg4: memref<8x8xbf16, #tpu.memory_space<vmem>>, %arg5: memref<1x32xf32, #tpu.memory_space<vmem>>, %arg6: memref<1x32xf32, #tpu.memory_space<vmem>>, %arg7: memref<1x32xf32, #tpu.memory_space<vmem>>, %arg8: memref<1x32xf32, #tpu.memory_space<vmem>>, %arg9: memref<32x32xbf16, #tpu.memory_space<vmem>>, %arg10: memref<1x32xf32, #tpu.memory_space<vmem>>, %arg11: memref<32x32xbf16, #tpu.memory_space<vmem>>, %arg12: memref<1x32xf32, #tpu.memory_space<vmem>>, %arg13: memref<32x32xbf16, #tpu.memory_space<vmem>>, %arg14: memref<1x32xf32, #tpu.memory_space<vmem>>, %arg15: memref<32x32xbf16, #tpu.memory_space<vmem>>, %arg16: memref<1x32xf32, #tpu.memory_space<vmem>>, %arg17: memref<32x64xbf16, #tpu.memory_space<vmem>>, %arg18: memref<1x64xf32, #tpu.memory_space<vmem>>, %arg19: memref<64x32xbf16, #tpu.memory_space<vmem>>, %arg20: memref<1x32xf32, #tpu.memory_space<vmem>>, %arg21: memref<1x8x32xf32, #tpu.memory_space<vmem>>, %arg22: memref<4x8x8xbf16, #tpu.memory_space<vmem>>, %arg23: memref<4x8x8xbf16, #tpu.memory_space<vmem>>) attributes {dimension_semantics = [#tpu.dimension_semantics<parallel>, #tpu.dimension_semantics<arbitrary>], iteration_bounds = array<i64: 2, 1>, scalar_prefetch = 0 : i64, scratch_operands = 2 : i64, tpu.core_type = #tpu.core_type<tc>, window_params = [{transform_indices = @transform_0, window_bounds = array<i64: 1, 8, 32>}, {transform_indices = @transform_1, window_bounds = array<i64: 1, 8, 32>}, {transform_indices = @transform_2, window_bounds = array<i64: 8, 8>}, {pipeline_mode = #tpu.pipeline_mode<synchronous>, transform_indices = @transform_3, window_bounds = array<i64: 1, 32>}, {pipeline_mode = #tpu.pipeline_mode<synchronous>, transform_indices = @transform_4, window_bounds = array<i64: 1, 32>}, {pipeline_mode = #tpu.pipeline_mode<synchronous>, transform_indices = @transform_5, window_bounds = array<i64: 1, 32>}, {pipeline_mode = #tpu.pipeline_mode<synchronous>, transform_indices = @transform_6, window_bounds = array<i64: 1, 32>}, {pipeline_mode = #tpu.pipeline_mode<synchronous>, transform_indices = @transform_7, window_bounds = array<i64: 32, 32>}, {pipeline_mode = #tpu.pipeline_mode<synchronous>, transform_indices = @transform_8, window_bounds = array<i64: 1, 32>}, {pipeline_mode = #tpu.pipeline_mode<synchronous>, transform_indices = @transform_9, window_bounds = array<i64: 32, 32>}, {pipeline_mode = #tpu.pipeline_mode<synchronous>, transform_indices = @transform_10, window_bounds = array<i64: 1, 32>}, {pipeline_mode = #tpu.pipeline_mode<synchronous>, transform_indices = @transform_11, window_bounds = array<i64: 32, 32>}, {pipeline_mode = #tpu.pipeline_mode<synchronous>, transform_indices = @transform_12, window_bounds = array<i64: 1, 32>}, {pipeline_mode = #tpu.pipeline_mode<synchronous>, transform_indices = @transform_13, window_bounds = array<i64: 32, 32>}, {pipeline_mode = #tpu.pipeline_mode<synchronous>, transform_indices = @transform_14, window_bounds = array<i64: 1, 32>}, {pipeline_mode = #tpu.pipeline_mode<synchronous>, transform_indices = @transform_15, window_bounds = array<i64: 32, 64>}, {pipeline_mode = #tpu.pipeline_mode<synchronous>, transform_indices = @transform_16, window_bounds = array<i64: 1, 64>}, {pipeline_mode = #tpu.pipeline_mode<synchronous>, transform_indices = @transform_17, window_bounds = array<i64: 64, 32>}, {pipeline_mode = #tpu.pipeline_mode<synchronous>, transform_indices = @transform_18, window_bounds = array<i64: 1, 32>}, {transform_indices = @transform_19, window_bounds = array<i64: 1, 8, 32>}]} {
    %c0_i32 = arith.constant 0 : i32
    %0 = arith.cmpi eq, %arg1, %c0_i32 : i32
    %1 = arith.extui %0 : i1 to i32
    %c0_i32_0 = arith.constant 0 : i32
    %2 = arith.cmpi ne, %1, %c0_i32_0 : i32
    scf.if %2 {
      %c0_57 = arith.constant 0 : index
      %c0_58 = arith.constant 0 : index
      %c0_59 = arith.constant 0 : index
      %114 = vector.load %arg2[%c0_57, %c0_58, %c0_59] : memref<1x8x32xf32, #tpu.memory_space<vmem>>, vector<1x8x32xf32>
      %115 = vector.shape_cast %114 : vector<1x8x32xf32> to vector<8x32xf32>
      %c0_60 = arith.constant 0 : index
      %c0_61 = arith.constant 0 : index
      %116 = vector.load %arg5[%c0_60, %c0_61] : memref<1x32xf32, #tpu.memory_space<vmem>>, vector<1x32xf32>
      %c0_62 = arith.constant 0 : index
      %c0_63 = arith.constant 0 : index
      %117 = vector.load %arg6[%c0_62, %c0_63] : memref<1x32xf32, #tpu.memory_space<vmem>>, vector<1x32xf32>
      %cst_64 = arith.constant dense<0.000000e+00> : vector<8xf32>
      %118 = vector.multi_reduction <add>, %115, %cst_64 [1] : vector<8x32xf32> to vector<8xf32>
      %119 = vector.shape_cast %118 : vector<8xf32> to vector<8x1xf32>
      %cst_65 = arith.constant 3.200000e+01 : f32
      %120 = vector.broadcast %cst_65 : f32 to vector<8x1xf32>
      %121 = arith.divf %119, %120 : vector<8x1xf32>
      %122 = vector.broadcast %121 : vector<8x1xf32> to vector<8x32xf32>
      %123 = arith.subf %115, %122 : vector<8x32xf32>
      %124 = arith.mulf %123, %123 : vector<8x32xf32>
      %cst_66 = arith.constant dense<0.000000e+00> : vector<8xf32>
      %125 = vector.multi_reduction <add>, %124, %cst_66 [1] : vector<8x32xf32> to vector<8xf32>
      %126 = vector.shape_cast %125 : vector<8xf32> to vector<8x1xf32>
      %cst_67 = arith.constant 3.200000e+01 : f32
      %127 = vector.broadcast %cst_67 : f32 to vector<8x1xf32>
      %128 = arith.divf %126, %127 : vector<8x1xf32>
      %129 = vector.broadcast %121 : vector<8x1xf32> to vector<8x32xf32>
      %130 = arith.subf %115, %129 : vector<8x32xf32>
      %cst_68 = arith.constant 9.99999997E-7 : f32
      %131 = vector.broadcast %cst_68 : f32 to vector<8x1xf32>
      %132 = arith.addf %128, %131 : vector<8x1xf32>
      %133 = math.rsqrt %132 : vector<8x1xf32>
      %134 = vector.broadcast %133 : vector<8x1xf32> to vector<8x32xf32>
      %135 = arith.mulf %130, %134 : vector<8x32xf32>
      %136 = vector.broadcast %116 : vector<1x32xf32> to vector<8x32xf32>
      %137 = arith.mulf %135, %136 : vector<8x32xf32>
      %138 = vector.broadcast %117 : vector<1x32xf32> to vector<8x32xf32>
      %139 = arith.addf %137, %138 : vector<8x32xf32>
      %140 = arith.truncf %139 : vector<8x32xf32> to vector<8x32xbf16>
      %c0_69 = arith.constant 0 : index
      %c0_70 = arith.constant 0 : index
      %141 = vector.load %arg11[%c0_69, %c0_70] : memref<32x32xbf16, #tpu.memory_space<vmem>>, vector<32x32xbf16>
      %cst_71 = arith.constant dense<0.000000e+00> : vector<8x32xf32>
      %142 = tpu.matmul %140, %141, %cst_71 {dimension_numbers = #tpu.dot_dimension_numbers<[1], [0], [0], [1], [0, 0, 1, 1], [], []>} : vector<8x32xbf16>, vector<32x32xbf16>, vector<8x32xf32> -> vector<8x32xf32>
      %c0_72 = arith.constant 0 : index
      %c0_73 = arith.constant 0 : index
      %143 = vector.load %arg12[%c0_72, %c0_73] : memref<1x32xf32, #tpu.memory_space<vmem>>, vector<1x32xf32>
      %144 = vector.broadcast %143 : vector<1x32xf32> to vector<8x32xf32>
      %145 = arith.addf %142, %144 : vector<8x32xf32>
      %c0_74 = arith.constant 0 : index
      %c0_75 = arith.constant 0 : index
      %146 = vector.load %arg13[%c0_74, %c0_75] : memref<32x32xbf16, #tpu.memory_space<vmem>>, vector<32x32xbf16>
      %cst_76 = arith.constant dense<0.000000e+00> : vector<8x32xf32>
      %147 = tpu.matmul %140, %146, %cst_76 {dimension_numbers = #tpu.dot_dimension_numbers<[1], [0], [0], [1], [0, 0, 1, 1], [], []>} : vector<8x32xbf16>, vector<32x32xbf16>, vector<8x32xf32> -> vector<8x32xf32>
      %c0_77 = arith.constant 0 : index
      %c0_78 = arith.constant 0 : index
      %148 = vector.load %arg14[%c0_77, %c0_78] : memref<1x32xf32, #tpu.memory_space<vmem>>, vector<1x32xf32>
      %149 = vector.broadcast %148 : vector<1x32xf32> to vector<8x32xf32>
      %150 = arith.addf %147, %149 : vector<8x32xf32>
      %151 = tpu.transpose %145, [1, 0] : vector<8x32xf32> -> vector<32x8xf32>
      %152 = arith.truncf %151 : vector<32x8xf32> to vector<32x8xbf16>
      %153 = vector.shape_cast %152 : vector<32x8xbf16> to vector<4x8x8xbf16>
      %c0_79 = arith.constant 0 : index
      %c0_80 = arith.constant 0 : index
      %c0_81 = arith.constant 0 : index
      %154 = vector.load %arg22[%c0_79, %c0_80, %c0_81] : memref<4x8x8xbf16, #tpu.memory_space<vmem>>, vector<4x8x8xbf16>
      tpu.vector_store %arg22[%c0_79, %c0_80, %c0_81], %153 {strides = array<i32>} : memref<4x8x8xbf16, #tpu.memory_space<vmem>>, vector<4x8x8xbf16>,
      %155 = vector.shape_cast %150 : vector<8x32xf32> to vector<8x4x8xf32>
      %156 = tpu.transpose %155, [1, 0, 2] : vector<8x4x8xf32> -> vector<4x8x8xf32>
      %157 = arith.truncf %156 : vector<4x8x8xf32> to vector<4x8x8xbf16>
      %c0_82 = arith.constant 0 : index
      %c0_83 = arith.constant 0 : index
      %c0_84 = arith.constant 0 : index
      %158 = vector.load %arg23[%c0_82, %c0_83, %c0_84] : memref<4x8x8xbf16, #tpu.memory_space<vmem>>, vector<4x8x8xbf16>
      tpu.vector_store %arg23[%c0_82, %c0_83, %c0_84], %157 {strides = array<i32>} : memref<4x8x8xbf16, #tpu.memory_space<vmem>>, vector<4x8x8xbf16>,
    } else {
    }
    %c0 = arith.constant 0 : index
    %c0_1 = arith.constant 0 : index
    %c0_2 = arith.constant 0 : index
    %3 = vector.load %arg3[%c0, %c0_1, %c0_2] : memref<1x8x32xf32, #tpu.memory_space<vmem>>, vector<1x8x32xf32>
    %4 = vector.shape_cast %3 : vector<1x8x32xf32> to vector<8x32xf32>
    %c0_3 = arith.constant 0 : index
    %c0_4 = arith.constant 0 : index
    %5 = vector.load %arg5[%c0_3, %c0_4] : memref<1x32xf32, #tpu.memory_space<vmem>>, vector<1x32xf32>
    %c0_5 = arith.constant 0 : index
    %c0_6 = arith.constant 0 : index
    %6 = vector.load %arg6[%c0_5, %c0_6] : memref<1x32xf32, #tpu.memory_space<vmem>>, vector<1x32xf32>
    %cst = arith.constant dense<0.000000e+00> : vector<8xf32>
    %7 = vector.multi_reduction <add>, %4, %cst [1] : vector<8x32xf32> to vector<8xf32>
    %8 = vector.shape_cast %7 : vector<8xf32> to vector<8x1xf32>
    %cst_7 = arith.constant 3.200000e+01 : f32
    %9 = vector.broadcast %cst_7 : f32 to vector<8x1xf32>
    %10 = arith.divf %8, %9 : vector<8x1xf32>
    %11 = vector.broadcast %10 : vector<8x1xf32> to vector<8x32xf32>
    %12 = arith.subf %4, %11 : vector<8x32xf32>
    %13 = arith.mulf %12, %12 : vector<8x32xf32>
    %cst_8 = arith.constant dense<0.000000e+00> : vector<8xf32>
    %14 = vector.multi_reduction <add>, %13, %cst_8 [1] : vector<8x32xf32> to vector<8xf32>
    %15 = vector.shape_cast %14 : vector<8xf32> to vector<8x1xf32>
    %cst_9 = arith.constant 3.200000e+01 : f32
    %16 = vector.broadcast %cst_9 : f32 to vector<8x1xf32>
    %17 = arith.divf %15, %16 : vector<8x1xf32>
    %18 = vector.broadcast %10 : vector<8x1xf32> to vector<8x32xf32>
    %19 = arith.subf %4, %18 : vector<8x32xf32>
    %cst_10 = arith.constant 9.99999997E-7 : f32
    %20 = vector.broadcast %cst_10 : f32 to vector<8x1xf32>
    %21 = arith.addf %17, %20 : vector<8x1xf32>
    %22 = math.rsqrt %21 : vector<8x1xf32>
    %23 = vector.broadcast %22 : vector<8x1xf32> to vector<8x32xf32>
    %24 = arith.mulf %19, %23 : vector<8x32xf32>
    %25 = vector.broadcast %5 : vector<1x32xf32> to vector<8x32xf32>
    %26 = arith.mulf %24, %25 : vector<8x32xf32>
    %27 = vector.broadcast %6 : vector<1x32xf32> to vector<8x32xf32>
    %28 = arith.addf %26, %27 : vector<8x32xf32>
    %29 = arith.truncf %28 : vector<8x32xf32> to vector<8x32xbf16>
    %c0_11 = arith.constant 0 : index
    %c0_12 = arith.constant 0 : index
    %30 = vector.load %arg9[%c0_11, %c0_12] : memref<32x32xbf16, #tpu.memory_space<vmem>>, vector<32x32xbf16>
    %cst_13 = arith.constant dense<0.000000e+00> : vector<8x32xf32>
    %31 = tpu.matmul %29, %30, %cst_13 {dimension_numbers = #tpu.dot_dimension_numbers<[1], [0], [0], [1], [0, 0, 1, 1], [], []>} : vector<8x32xbf16>, vector<32x32xbf16>, vector<8x32xf32> -> vector<8x32xf32>
    %c0_14 = arith.constant 0 : index
    %c0_15 = arith.constant 0 : index
    %32 = vector.load %arg10[%c0_14, %c0_15] : memref<1x32xf32, #tpu.memory_space<vmem>>, vector<1x32xf32>
    %33 = vector.broadcast %32 : vector<1x32xf32> to vector<8x32xf32>
    %34 = arith.addf %31, %33 : vector<8x32xf32>
    %cst_16 = arith.constant 0.353553385 : f32
    %35 = vector.broadcast %cst_16 : f32 to vector<8x32xf32>
    %36 = arith.mulf %34, %35 : vector<8x32xf32>
    %37 = vector.shape_cast %36 : vector<8x32xf32> to vector<8x4x8xf32>
    %38 = tpu.transpose %37, [1, 0, 2] : vector<8x4x8xf32> -> vector<4x8x8xf32>
    %39 = arith.truncf %38 : vector<4x8x8xf32> to vector<4x8x8xbf16>
    %c0_17 = arith.constant 0 : index
    %c0_18 = arith.constant 0 : index
    %c0_19 = arith.constant 0 : index
    %40 = vector.load %arg22[%c0_17, %c0_18, %c0_19] : memref<4x8x8xbf16, #tpu.memory_space<vmem>>, vector<4x8x8xbf16>
    "tpu.trace_start"() <{level = 10 : i32, message = "hqd,hdk->hqk"}> : () -> ()
    %cst_20 = arith.constant dense<0.000000e+00> : vector<4x8x8xf32>
    %41 = tpu.matmul %39, %40, %cst_20 {dimension_numbers = #tpu.dot_dimension_numbers<[2], [1], [1], [2], [0, 0, 0, 1, 1, 2], [0], [0]>} : vector<4x8x8xbf16>, vector<4x8x8xbf16>, vector<4x8x8xf32> -> vector<4x8x8xf32>
    "tpu.trace_stop"() : () -> ()
    %c0_21 = arith.constant 0 : index
    %c0_22 = arith.constant 0 : index
    %42 = vector.load %arg4[%c0_21, %c0_22] : memref<8x8xbf16, #tpu.memory_space<vmem>>, vector<8x8xbf16>
    %43 = arith.extf %42 : vector<8x8xbf16> to vector<8x8xf32>
    %44 = vector.shape_cast %43 : vector<8x8xf32> to vector<1x8x8xf32>
    %45 = vector.broadcast %44 : vector<1x8x8xf32> to vector<4x8x8xf32>
    %46 = arith.addf %41, %45 : vector<4x8x8xf32>
    %cst_23 = arith.constant dense<0xFF800000> : vector<4x8xf32>
    %47 = vector.multi_reduction <maximumf>, %46, %cst_23 [2] : vector<4x8x8xf32> to vector<4x8xf32>
    %48 = vector.shape_cast %47 : vector<4x8xf32> to vector<4x8x1xf32>
    %49 = vector.broadcast %48 : vector<4x8x1xf32> to vector<4x8x8xf32>
    %50 = arith.subf %46, %49 : vector<4x8x8xf32>
    %51 = arith.truncf %50 : vector<4x8x8xf32> to vector<4x8x8xbf16>
    %52 = math.exp %51 : vector<4x8x8xbf16>
    %53 = arith.extf %52 : vector<4x8x8xbf16> to vector<4x8x8xf32>
    %cst_24 = arith.constant dense<0.000000e+00> : vector<4x8xf32>
    %54 = vector.multi_reduction <add>, %53, %cst_24 [2] : vector<4x8x8xf32> to vector<4x8xf32>
    %55 = vector.shape_cast %54 : vector<4x8xf32> to vector<4x8x1xf32>
    %56 = arith.truncf %55 : vector<4x8x1xf32> to vector<4x8x1xbf16>
    %57 = arith.extf %56 : vector<4x8x1xbf16> to vector<4x8x1xf32>
    %58 = tpu.reciprocal %57 {approx = true} : vector<4x8x1xf32> -> vector<4x8x1xf32>
    %c0_25 = arith.constant 0 : index
    %c0_26 = arith.constant 0 : index
    %c0_27 = arith.constant 0 : index
    %59 = vector.load %arg23[%c0_25, %c0_26, %c0_27] : memref<4x8x8xbf16, #tpu.memory_space<vmem>>, vector<4x8x8xbf16>
    "tpu.trace_start"() <{level = 10 : i32, message = "hqk,hkd->hqd"}> : () -> ()
    %cst_28 = arith.constant dense<0.000000e+00> : vector<4x8x8xf32>
    %60 = tpu.matmul %52, %59, %cst_28 {dimension_numbers = #tpu.dot_dimension_numbers<[2], [1], [1], [2], [0, 0, 0, 1, 1, 2], [0], [0]>} : vector<4x8x8xbf16>, vector<4x8x8xbf16>, vector<4x8x8xf32> -> vector<4x8x8xf32>
    "tpu.trace_stop"() : () -> ()
    %61 = vector.broadcast %58 : vector<4x8x1xf32> to vector<4x8x8xf32>
    %62 = arith.mulf %60, %61 : vector<4x8x8xf32>
    %63 = tpu.transpose %62, [1, 0, 2] : vector<4x8x8xf32> -> vector<8x4x8xf32>
    %64 = vector.shape_cast %63 : vector<8x4x8xf32> to vector<8x32xf32>
    %65 = arith.truncf %64 : vector<8x32xf32> to vector<8x32xbf16>
    %c0_29 = arith.constant 0 : index
    %c0_30 = arith.constant 0 : index
    %66 = vector.load %arg15[%c0_29, %c0_30] : memref<32x32xbf16, #tpu.memory_space<vmem>>, vector<32x32xbf16>
    %cst_31 = arith.constant dense<0.000000e+00> : vector<8x32xf32>
    %67 = tpu.matmul %65, %66, %cst_31 {dimension_numbers = #tpu.dot_dimension_numbers<[1], [0], [0], [1], [0, 0, 1, 1], [], []>} : vector<8x32xbf16>, vector<32x32xbf16>, vector<8x32xf32> -> vector<8x32xf32>
    %c0_32 = arith.constant 0 : index
    %c0_33 = arith.constant 0 : index
    %68 = vector.load %arg16[%c0_32, %c0_33] : memref<1x32xf32, #tpu.memory_space<vmem>>, vector<1x32xf32>
    %69 = vector.broadcast %68 : vector<1x32xf32> to vector<8x32xf32>
    %70 = arith.addf %67, %69 : vector<8x32xf32>
    %71 = arith.addf %4, %70 : vector<8x32xf32>
    %c0_34 = arith.constant 0 : index
    %c0_35 = arith.constant 0 : index
    %72 = vector.load %arg7[%c0_34, %c0_35] : memref<1x32xf32, #tpu.memory_space<vmem>>, vector<1x32xf32>
    %c0_36 = arith.constant 0 : index
    %c0_37 = arith.constant 0 : index
    %73 = vector.load %arg8[%c0_36, %c0_37] : memref<1x32xf32, #tpu.memory_space<vmem>>, vector<1x32xf32>
    %cst_38 = arith.constant dense<0.000000e+00> : vector<8xf32>
    %74 = vector.multi_reduction <add>, %71, %cst_38 [1] : vector<8x32xf32> to vector<8xf32>
    %75 = vector.shape_cast %74 : vector<8xf32> to vector<8x1xf32>
    %cst_39 = arith.constant 3.200000e+01 : f32
    %76 = vector.broadcast %cst_39 : f32 to vector<8x1xf32>
    %77 = arith.divf %75, %76 : vector<8x1xf32>
    %78 = vector.broadcast %77 : vector<8x1xf32> to vector<8x32xf32>
    %79 = arith.subf %71, %78 : vector<8x32xf32>
    %80 = arith.mulf %79, %79 : vector<8x32xf32>
    %cst_40 = arith.constant dense<0.000000e+00> : vector<8xf32>
    %81 = vector.multi_reduction <add>, %80, %cst_40 [1] : vector<8x32xf32> to vector<8xf32>
    %82 = vector.shape_cast %81 : vector<8xf32> to vector<8x1xf32>
    %cst_41 = arith.constant 3.200000e+01 : f32
    %83 = vector.broadcast %cst_41 : f32 to vector<8x1xf32>
    %84 = arith.divf %82, %83 : vector<8x1xf32>
    %85 = vector.broadcast %77 : vector<8x1xf32> to vector<8x32xf32>
    %86 = arith.subf %71, %85 : vector<8x32xf32>
    %cst_42 = arith.constant 9.99999997E-7 : f32
    %87 = vector.broadcast %cst_42 : f32 to vector<8x1xf32>
    %88 = arith.addf %84, %87 : vector<8x1xf32>
    %89 = math.rsqrt %88 : vector<8x1xf32>
    %90 = vector.broadcast %89 : vector<8x1xf32> to vector<8x32xf32>
    %91 = arith.mulf %86, %90 : vector<8x32xf32>
    %92 = vector.broadcast %72 : vector<1x32xf32> to vector<8x32xf32>
    %93 = arith.mulf %91, %92 : vector<8x32xf32>
    %94 = vector.broadcast %73 : vector<1x32xf32> to vector<8x32xf32>
    %95 = arith.addf %93, %94 : vector<8x32xf32>
    %96 = arith.truncf %95 : vector<8x32xf32> to vector<8x32xbf16>
    %c0_43 = arith.constant 0 : index
    %c0_44 = arith.constant 0 : index
    %97 = vector.load %arg17[%c0_43, %c0_44] : memref<32x64xbf16, #tpu.memory_space<vmem>>, vector<32x64xbf16>
    %cst_45 = arith.constant dense<0.000000e+00> : vector<8x64xf32>
    %98 = tpu.matmul %96, %97, %cst_45 {dimension_numbers = #tpu.dot_dimension_numbers<[1], [0], [0], [1], [0, 0, 1, 1], [], []>} : vector<8x32xbf16>, vector<32x64xbf16>, vector<8x64xf32> -> vector<8x64xf32>
    %c0_46 = arith.constant 0 : index
    %c0_47 = arith.constant 0 : index
    %99 = vector.load %arg18[%c0_46, %c0_47] : memref<1x64xf32, #tpu.memory_space<vmem>>, vector<1x64xf32>
    %100 = vector.broadcast %99 : vector<1x64xf32> to vector<8x64xf32>
    %101 = arith.addf %98, %100 : vector<8x64xf32>
    %cst_48 = arith.constant 0.000000e+00 : f32
    %102 = vector.broadcast %cst_48 : f32 to vector<8x64xf32>
    %103 = arith.maximumf %101, %102 : vector<8x64xf32>
    %104 = arith.truncf %103 : vector<8x64xf32> to vector<8x64xbf16>
    %c0_49 = arith.constant 0 : index
    %c0_50 = arith.constant 0 : index
    %105 = vector.load %arg19[%c0_49, %c0_50] : memref<64x32xbf16, #tpu.memory_space<vmem>>, vector<64x32xbf16>
    %cst_51 = arith.constant dense<0.000000e+00> : vector<8x32xf32>
    %106 = tpu.matmul %104, %105, %cst_51 {dimension_numbers = #tpu.dot_dimension_numbers<[1], [0], [0], [1], [0, 0, 1, 1], [], []>} : vector<8x64xbf16>, vector<64x32xbf16>, vector<8x32xf32> -> vector<8x32xf32>
    %c0_52 = arith.constant 0 : index
    %c0_53 = arith.constant 0 : index
    %107 = vector.load %arg20[%c0_52, %c0_53] : memref<1x32xf32, #tpu.memory_space<vmem>>, vector<1x32xf32>
    %108 = vector.broadcast %107 : vector<1x32xf32> to vector<8x32xf32>
    %109 = arith.addf %106, %108 : vector<8x32xf32>
    %110 = arith.addf %71, %109 : vector<8x32xf32>
    %c0_54 = arith.constant 0 : index
    %c0_55 = arith.constant 0 : index
    %c0_56 = arith.constant 0 : index
    %111 = vector.load %arg21[%c0_54, %c0_55, %c0_56] : memref<1x8x32xf32, #tpu.memory_space<vmem>>, vector<1x8x32xf32>
    %112 = vector.shape_cast %111 : vector<1x8x32xf32> to vector<8x32xf32>
    %113 = vector.shape_cast %110 : vector<8x32xf32> to vector<1x8x32xf32>
    tpu.vector_store %arg21[%c0_54, %c0_55, %c0_56], %113 {strides = array<i32>} : memref<1x8x32xf32, #tpu.memory_space<vmem>>, vector<1x8x32xf32>,
    return
  }
  func.func @transform_0(%arg0: i32, %arg1: i32) -> (i32, i32, i32) {
    %c0_i32 = arith.constant 0 : i32
    %c0_i32_0 = arith.constant 0 : i32
    %c0_i32_1 = arith.constant 0 : i32
    return %arg0, %c0_i32, %c0_i32_0 : i32, i32, i32
  }
  func.func @transform_1(%arg0: i32, %arg1: i32) -> (i32, i32, i32) {
    %c0_i32 = arith.constant 0 : i32
    %c0_i32_0 = arith.constant 0 : i32
    return %arg0, %arg1, %c0_i32 : i32, i32, i32
  }
  func.func @transform_2(%arg0: i32, %arg1: i32) -> (i32, i32) {
    %c0_i32 = arith.constant 0 : i32
    %c0_i32_0 = arith.constant 0 : i32
    return %arg1, %c0_i32 : i32, i32
  }
  func.func @transform_3(%arg0: i32, %arg1: i32) -> (i32, i32) {
    %c0_i32 = arith.constant 0 : i32
    %c0_i32_0 = arith.constant 0 : i32
    %c0_i32_1 = arith.constant 0 : i32
    return %c0_i32, %c0_i32_0 : i32, i32
  }
  func.func @transform_4(%arg0: i32, %arg1: i32) -> (i32, i32) {
    %c0_i32 = arith.constant 0 : i32
    %c0_i32_0 = arith.constant 0 : i32
    %c0_i32_1 = arith.constant 0 : i32
    return %c0_i32, %c0_i32_0 : i32, i32
  }
  func.func @transform_5(%arg0: i32, %arg1: i32) -> (i32, i32) {
    %c0_i32 = arith.constant 0 : i32
    %c0_i32_0 = arith.constant 0 : i32
    %c0_i32_1 = arith.constant 0 : i32
    return %c0_i32, %c0_i32_0 : i32, i32
  }
  func.func @transform_6(%arg0: i32, %arg1: i32) -> (i32, i32) {
    %c0_i32 = arith.constant 0 : i32
    %c0_i32_0 = arith.constant 0 : i32
    %c0_i32_1 = arith.constant 0 : i32
    return %c0_i32, %c0_i32_0 : i32, i32
  }
  func.func @transform_7(%arg0: i32, %arg1: i32) -> (i32, i32) {
    %c0_i32 = arith.constant 0 : i32
    %c0_i32_0 = arith.constant 0 : i32
    %c0_i32_1 = arith.constant 0 : i32
    return %c0_i32, %c0_i32_0 : i32, i32
  }
  func.func @transform_8(%arg0: i32, %arg1: i32) -> (i32, i32) {
    %c0_i32 = arith.constant 0 : i32
    %c0_i32_0 = arith.constant 0 : i32
    %c0_i32_1 = arith.constant 0 : i32
    return %c0_i32, %c0_i32_0 : i32, i32
  }
  func.func @transform_9(%arg0: i32, %arg1: i32) -> (i32, i32) {
    %c0_i32 = arith.constant 0 : i32
    %c0_i32_0 = arith.constant 0 : i32
    %c0_i32_1 = arith.constant 0 : i32
    return %c0_i32, %c0_i32_0 : i32, i32
  }
  func.func @transform_10(%arg0: i32, %arg1: i32) -> (i32, i32) {
    %c0_i32 = arith.constant 0 : i32
    %c0_i32_0 = arith.constant 0 : i32
    %c0_i32_1 = arith.constant 0 : i32
    return %c0_i32, %c0_i32_0 : i32, i32
  }
  func.func @transform_11(%arg0: i32, %arg1: i32) -> (i32, i32) {
    %c0_i32 = arith.constant 0 : i32
    %c0_i32_0 = arith.constant 0 : i32
    %c0_i32_1 = arith.constant 0 : i32
    return %c0_i32, %c0_i32_0 : i32, i32
  }
  func.func @transform_12(%arg0: i32, %arg1: i32) -> (i32, i32) {
    %c0_i32 = arith.constant 0 : i32
    %c0_i32_0 = arith.constant 0 : i32
    %c0_i32_1 = arith.constant 0 : i32
    return %c0_i32, %c0_i32_0 : i32, i32
  }
  func.func @transform_13(%arg0: i32, %arg1: i32) -> (i32, i32) {
    %c0_i32 = arith.constant 0 : i32
    %c0_i32_0 = arith.constant 0 : i32
    %c0_i32_1 = arith.constant 0 : i32
    return %c0_i32, %c0_i32_0 : i32, i32
  }
  func.func @transform_14(%arg0: i32, %arg1: i32) -> (i32, i32) {
    %c0_i32 = arith.constant 0 : i32
    %c0_i32_0 = arith.constant 0 : i32
    %c0_i32_1 = arith.constant 0 : i32
    return %c0_i32, %c0_i32_0 : i32, i32
  }
  func.func @transform_15(%arg0: i32, %arg1: i32) -> (i32, i32) {
    %c0_i32 = arith.constant 0 : i32
    %c0_i32_0 = arith.constant 0 : i32
    %c0_i32_1 = arith.constant 0 : i32
    return %c0_i32, %c0_i32_0 : i32, i32
  }
  func.func @transform_16(%arg0: i32, %arg1: i32) -> (i32, i32) {
    %c0_i32 = arith.constant 0 : i32
    %c0_i32_0 = arith.constant 0 : i32
    %c0_i32_1 = arith.constant 0 : i32
    return %c0_i32, %c0_i32_0 : i32, i32
  }
  func.func @transform_17(%arg0: i32, %arg1: i32) -> (i32, i32) {
    %c0_i32 = arith.constant 0 : i32
    %c0_i32_0 = arith.constant 0 : i32
    %c0_i32_1 = arith.constant 0 : i32
    return %c0_i32, %c0_i32_0 : i32, i32
  }
  func.func @transform_18(%arg0: i32, %arg1: i32) -> (i32, i32) {
    %c0_i32 = arith.constant 0 : i32
    %c0_i32_0 = arith.constant 0 : i32
    %c0_i32_1 = arith.constant 0 : i32
    return %c0_i32, %c0_i32_0 : i32, i32
  }
  func.func @transform_19(%arg0: i32, %arg1: i32) -> (i32, i32, i32) {
    %c0_i32 = arith.constant 0 : i32
    %c0_i32_0 = arith.constant 0 : i32
    return %arg0, %arg1, %c0_i32 : i32, i32, i32
  }
}

</mosaic_0001>

<bundles_post_ra>
// kernel: tpu_custom_call.1
= control target key start
LH: loop header
LB: loop body
LE: loop exit
PB: predicated region body
PF: predicated region fallthrough
CT: control target
= control target key end

     0   :  { %s3558_s0 = inlined_call_operand.vmem [shape: f32[2,8,32], index: 0, kind: input, shape index: {}]   ;;  %s3559_s1 = inlined_call_operand.vmem [shape: f32[2,8,32], index: 1, kind: input, shape index: {}]   ;;  %s3560_s2 = inlined_call_operand.hbm [shape: bf16[8,8], index: 2, kind: input, shape index: {}]   ;;  %s3561_s3 = inlined_call_operand.hbm [shape: f32[1,32], index: 3, kind: input, shape index: {}]   ;;  %s3562_s4 = inlined_call_operand.hbm [shape: f32[1,32], index: 4, kind: input, shape index: {}]   ;;  %s3563_s5 = inlined_call_operand.hbm [shape: f32[1,32], index: 5, kind: input, shape index: {}]   ;;  %s3564_s6 = inlined_call_operand.hbm [shape: f32[1,32], index: 6, kind: input, shape index: {}]   ;;  %s3565_s7 = inlined_call_operand.vmem [shape: bf16[32,32], index: 7, kind: input, shape index: {}]   ;;  %s3566_s8 = inlined_call_operand.hbm [shape: f32[1,32], index: 8, kind: input, shape index: {}]   ;;  %s3567_s9 = inlined_call_operand.hbm [shape: bf16[32,32], index: 9, kind: input, shape index: {}]   ;;  %s3568_s10 = inlined_call_operand.hbm [shape: f32[1,32], index: 10, kind: input, shape index: {}]   ;;  %s3569_s11 = inlined_call_operand.hbm [shape: bf16[32,32], index: 11, kind: input, shape index: {}]   ;;  %s3570_s12 = inlined_call_operand.hbm [shape: f32[1,32], index: 12, kind: input, shape index: {}]   ;;  %s3571_s13 = inlined_call_operand.hbm [shape: bf16[32,32], index: 13, kind: input, shape index: {}]   ;;  %s3572_s14 = inlined_call_operand.hbm [shape: f32[1,32], index: 14, kind: input, shape index: {}]   ;;  %s3573_s15 = inlined_call_operand.hbm [shape: bf16[32,64], index: 15, kind: input, shape index: {}]   ;;  %s3574_s16 = inlined_call_operand.hbm [shape: f32[1,64], index: 16, kind: input, shape index: {}]   ;;  %s3575_s17 = inlined_call_operand.vmem [shape: bf16[64,32], index: 17, kind: input, shape index: {}]   ;;  %s3576_s18 = inlined_call_operand.vmem [shape: f32[1,32], index: 18, kind: input, shape index: {}]   ;;  %s3577_s19 = inlined_call_operand.hbm [shape: f32[2,8,32], index: 19, kind: output, shape index: {}]  }
   0x1   :  { %3588 = sst [smem:[#allocation45_spill]] %s3558_s0 }
   0x2   :  { %3589 = sst [smem:[#allocation46_spill]] %s3559_s1 }
   0x3   :  { %3590 = sst [smem:[#allocation47_spill]] %s3560_s2 }
   0x4   :  { %3591 = sst [smem:[#allocation48_spill]] %s3561_s3 }
   0x5   :  { %3592 = sst [smem:[#allocation49_spill]] %s3562_s4 }
   0x6   :  { %3593 = sst [smem:[#allocation50_spill]] %s3563_s5 }
   0x7   :  { %3594 = sst [smem:[#allocation51_spill]] %s3566_s8 }
   0x8   :  { %3595 = sst [smem:[#allocation52_spill]] %s3576_s18 }
   0x9   :  { %3596 = sst [smem:[#allocation53_spill]] %s3577_s19 }
   0xa   :  { %24 = vsyncpa [#allocation5], 0 }
   0xb   :  { %25 = vsyncpa [#allocation8], 0 }
   0xc   :  { %26 = vsyncpa [#allocation11], 0 }
   0xd   :  { %27 = vsyncpa [#allocation14], 0 }
   0xe   :  { %28 = vsyncpa [#allocation17], 0 }
   0xf   :  { %29 = vsyncpa [#allocation20], 0 }
  0x10   :  { %30 = vsyncpa [#allocation23], 0 }
  0x11   :  { %31 = vsyncpa [#allocation26], 0 }
  0x12   :  { %32 = vsyncpa [#allocation6], 0 }
  0x13   :  { %34 = vsyncpa [#allocation6 + $0x1], 0  ;;  %s3135_s0 = smov 0   ;;  %s3137_s30 = smov 0  }
  0x14   :  { %s3139_s20 = smov 0   ;;  %s3141_s21 = smov 0  }
  0x15   :  { %s3143_s1 = smov 0   ;;  %s3145_s22 = smov 0  }
  0x16 LB: > { %3597 = sst [smem:[#allocation37_spill]] %s2988_s0  ;;  %s2110_s2 = sadd.s32 4294967295, %s3008_s22   ;;  %s3008_s22 = sphi %s3145_s22, %s40_s22   ;;  %s3004_s1 = sphi %s3143_s1, %s3626_s1   ;;  %s3000_s21 = sphi %s3141_s21, %s3625_s21   ;;  %s2996_s20 = sphi %s3139_s20, %s3624_s20   ;;  %s2992_s30 = sphi %s3137_s30, %s3628_s30   ;;  %s2988_s0 = sphi %s3135_s0, %s3627_s0  }
  0x17   : > { %3598 = sst [smem:[#allocation38_spill]] %s2996_s20  ;;  %s2111_s23 = sadd.s32 4294967294, %s3008_s22  }
  0x18   : > { %3599 = sst [smem:[#allocation39_spill]] %s3004_s1  ;;  %s52_s24 = sadd.s32 1, %s3004_s1 }
  0x19   : > { %3600 = sst [smem:[#allocation40_spill]] %s3008_s22  ;;  %s477_s25 = sadd.s32 1, %s2996_s20 }
  0x1a   : > { %p54_p0 = scmp.ge.s32.totalorder %s52_s24, 2  ;;  %p487_p1 = scmp.ne.s32.totalorder %s2996_s20, %s2992_s30 }
  0x1b   : > { %p488_p2 = scmp.eq.s32.totalorder %s2110_s2, 1  ;;  %p493_p3 = scmp.ne.s32.totalorder %s2992_s30, %s2988_s0 }
  0x1c   : > { %s3630_s24 = smov (%p54_p0, %s52_s24), 0  ;;  %p494_p5 = scmp.eq.s32.totalorder %s2111_s23, 1 }
  0x1d   : > { %3601 = sst [smem:[#allocation41_spill]] %s3630_s24  ;;  %p3175_p4 = por %p488_p2, %p487_p1 }
  0x1e   : > { %s472_s26 = ssub.s32 %s3004_s1, %s3630_s24  ;;  %p2112_p6 = scmp.ge.s32.totalorder %s3008_s22, 1 }
  0x1f   : > { %s3602_s3 = scalar_select %p3175_p4, 1, 0 }
  0x20   : > { %p475_p7 = scmp.eq.s32.totalorder %s472_s26, 0  ;;  %p3182_p8 = por %p494_p5, %p493_p3 }
  0x21   : > { %3603 = sst [smem:[#allocation42_spill]] %s3602_s3  ;;  %p501_p9 = scmp.lt.s32.totalorder %s3008_s22, 3 }
  0x22   : > { %s3604_s27 = scalar_select %p3182_p8, 1, 0 }
  0x23   : > { %s3188_s28 = scalar_select %p475_p7, %s2996_s20, %s477_s25  }
  0x24   : > { %3605 = sst [smem:[#allocation43_spill]] %s3604_s27  ;;  %p3190_p10 = pnand %p2112_p6, %p501_p9 }
  0x25   : > { %3606 = sst [smem:[#allocation44_spill]] %s3188_s28  ;;  %p3194_p11 = scmp.eq.s32.totalorder %s2110_s2, 0 }
  0x26   : > { %s3609_s1 = sld [smem:[#allocation48_spill]]  ;;  %p2292_p12 = pneg %p3190_p10 }
  0x27   : > { %s3010_s27 = smov [#allocation7]   ;;  %s3610_s5 = sld [smem:[#allocation50_spill]] }
  0x28   : > { %s529_s25 = sshll.u32 %s3010_s27, 4  ;;  %p3208_p13 = pnand %p3194_p11, %p2292_p12  ;;  %s530_s25 = int_to_ptr.vmem [resolvable:$true] %s529_s25 }
  0x29   : > { %s3612_s8 = sld [smem:[#allocation51_spill]]  ;;  %s3012_s28 = smov [#allocation13]  }
  0x2a   : > { %s604_s18 = sshll.u32 %s3568_s10, 4  ;;  %s3013_s27 = smov [#allocation16]   ;;  %s605_s18 = int_to_ptr.hbm [resolvable:$true] %s604_s18 }
  0x2b   : > { %s606_s23 = sshll.u32 %s3013_s27, 4  ;;  %s3613_s27 = sld [smem:[#allocation47_spill]]  ;;  %s607_s23 = int_to_ptr.vmem [resolvable:$true] %s606_s23 }
  0x2c   : > { %s527_s26 = sshll.u32 %s3609_s1, 4  ;;  %s3011_s1 = smov [#allocation10]   ;;  %s528_s26 = int_to_ptr.hbm [resolvable:$true] %s527_s26 }
  0x2d   : > { %s551_s22 = sshll.u32 %s3610_s5, 4  ;;  %s553_s24 = sshll.u32 %s3011_s1, 4  ;;  %s552_s22 = int_to_ptr.hbm [resolvable:$true] %s551_s22  ;;  %s554_s24 = int_to_ptr.vmem [resolvable:$true] %s553_s24 }
  0x2e   : > { %2298 = dma.hbm_to_vmem [thread:$0]  (!%p3208_p13), %s528_s26, 16, %s530_s25, [#allocation8]  }
  0x2f   : > { %s578_s20 = sshll.u32 %s3612_s8, 4  ;;  %s580_s5 = sshll.u32 %s3012_s28, 4  ;;  %s579_s20 = int_to_ptr.hbm [resolvable:$true] %s578_s20  ;;  %s581_s5 = int_to_ptr.vmem [resolvable:$true] %s580_s5 }
  0x30   : > { %2304 = dma.hbm_to_vmem [thread:$0]  (!%p3208_p13), %s552_s22, 16, %s554_s24, [#allocation11]  }
  0x31   : > { %2310 = dma.hbm_to_vmem [thread:$0]  (!%p3208_p13), %s579_s20, 16, %s581_s5, [#allocation14]  }
  0x32   : > { %s630_s1 = sshll.u32 %s3570_s12, 4  ;;  %s3014_s22 = smov [#allocation19]   ;;  %s631_s1 = int_to_ptr.hbm [resolvable:$true] %s630_s1 }
  0x33   : > { %2316 = dma.hbm_to_vmem [thread:$0]  (!%p3208_p13), %s605_s18, 16, %s607_s23, [#allocation17]  }
  0x34   : > { %s632_s24 = sshll.u32 %s3014_s22, 4  ;;  %s656_s28 = sshll.u32 %s3572_s14, 4  ;;  %s633_s24 = int_to_ptr.vmem [resolvable:$true] %s632_s24  ;;  %s657_s28 = int_to_ptr.hbm [resolvable:$true] %s656_s28 }
  0x35   : > { %2322 = dma.hbm_to_vmem [thread:$0]  (!%p3208_p13), %s631_s1, 16, %s633_s24, [#allocation20]  }
  0x36   : > { %s3015_s5 = smov [#allocation22]   ;;  %s515_s8 = sshll.u32 %s3613_s27, 4  ;;  %s516_s8 = int_to_ptr.hbm [resolvable:$true] %s515_s8 }
  0x37   : > { %s658_s20 = sshll.u32 %s3015_s5, 4  ;;  %s3016_s18 = smov [#allocation4]   ;;  %s659_s20 = int_to_ptr.vmem [resolvable:$true] %s658_s20 }
  0x38   : > { %2328 = dma.hbm_to_vmem [thread:$0]  (!%p3208_p13), %s657_s28, 16, %s659_s20, [#allocation23]  }
  0x39   : > { %s517_s23 = sshll.u32 %s3016_s18, 4  ;;  %s3614_s4 = sld [smem:[#allocation49_spill]]  ;;  %s518_s23 = int_to_ptr.vmem [resolvable:$true] %s517_s23 }
  0x3a   : > { %2295 = dma.hbm_to_vmem [thread:$0]  (!%p3208_p13), %s516_s8, 64, %s518_s23, [#allocation5]  }
  0x3b   : > { %s563_s5 = sshll.u32 %s3564_s6, 4  ;;  %s3017_s26 = smov [#allocation9]   ;;  %s564_s5 = int_to_ptr.hbm [resolvable:$true] %s563_s5 }
  0x3c   : > { %s541_s25 = sshll.u32 %s3017_s26, 4  ;;  %s3018_s28 = smov [#allocation12]   ;;  %s542_s25 = int_to_ptr.vmem [resolvable:$true] %s541_s25 }
  0x3d   : > { %s565_s20 = sshll.u32 %s3018_s28, 4  ;;  %s589_s22 = sshll.u32 %s3567_s9, 4  ;;  %s566_s20 = int_to_ptr.vmem [resolvable:$true] %s565_s20  ;;  %s590_s22 = int_to_ptr.hbm [resolvable:$true] %s589_s22 }
  0x3e   : > { %2307 = dma.hbm_to_vmem [thread:$0]  (!%p3208_p13), %s564_s5, 16, %s566_s20, [#allocation11]  }
  0x3f   : > { %s539_s3 = sshll.u32 %s3614_s4, 4  ;;  %s3019_s8 = smov [#allocation15]   ;;  %s540_s3 = int_to_ptr.hbm [resolvable:$true] %s539_s3 }
  0x40   : > { %2301 = dma.hbm_to_vmem [thread:$0]  (!%p3208_p13), %s540_s3, 16, %s542_s25, [#allocation8]  }
  0x41   : > { %s591_s23 = sshll.u32 %s3019_s8, 4  ;;  %s615_s24 = sshll.u32 %s3569_s11, 4  ;;  %s592_s23 = int_to_ptr.vmem [resolvable:$true] %s591_s23  ;;  %s616_s24 = int_to_ptr.hbm [resolvable:$true] %s615_s24 }
  0x42   : > { %s3020_s3 = smov 64   ;;  %s3021_s26 = smov 4  }
  0x43   : > { %2313 = dma.hbm_to_vmem [thread:$0]  (!%p3208_p13), %s590_s22, 256, %s592_s23, [#allocation14], %s3020_s3, %s3020_s3, %s3021_s26  }
  0x44   : > { %s3022_s25 = smov [#allocation18]   ;;  %s641_s5 = sshll.u32 %s3571_s13, 4  ;;  %s642_s5 = int_to_ptr.hbm [resolvable:$true] %s641_s5 }
  0x45   : > { %s617_s28 = sshll.u32 %s3022_s25, 4  ;;  %s667_s19 = sshll.u32 %s3573_s15, 4  ;;  %s618_s28 = int_to_ptr.vmem [resolvable:$true] %s617_s28  ;;  %s668_s19 = int_to_ptr.hbm [resolvable:$true] %s667_s19 }
  0x46   : > { %2319 = dma.hbm_to_vmem [thread:$0]  (!%p3208_p13), %s616_s24, 256, %s618_s28, [#allocation17], %s3020_s3, %s3020_s3, %s3021_s26  }
  0x47   : > { %s3023_s1 = smov [#allocation21]   ;;  %s3024_s22 = smov [#allocation24]  }
  0x48   : > { %s643_s4 = sshll.u32 %s3023_s1, 4  ;;  %s669_s23 = sshll.u32 %s3024_s22, 4  ;;  %s644_s4 = int_to_ptr.vmem [resolvable:$true] %s643_s4  ;;  %s670_s23 = int_to_ptr.vmem [resolvable:$true] %s669_s23 }
  0x49   : > { %2325 = dma.hbm_to_vmem [thread:$0]  (!%p3208_p13), %s642_s5, 256, %s644_s4, [#allocation20], %s3020_s3, %s3020_s3, %s3021_s26  }
  0x4a   : > { %s682_s18 = sshll.u32 %s3574_s16, 4  ;;  %s3025_s24 = smov [#allocation25]   ;;  %s683_s18 = int_to_ptr.hbm [resolvable:$true] %s682_s18 }
  0x4b   : > { %2331 = dma.hbm_to_vmem [thread:$0]  (!%p3208_p13), %s668_s19, 256, %s670_s23, [#allocation23], %s3020_s3, %s3020_s3, %s3021_s26  }
  0x4c   : > { %s684_s28 = sshll.u32 %s3025_s24, 4  ;;  %720 = sbr.rel (%p3190_p10) target bundleno = 1927 (0x787), region = 96  ;;  %s685_s28 = int_to_ptr.vmem [resolvable:$true] %s684_s28 }
  0x4d   : > { %2334 = dma.hbm_to_vmem [thread:$0]  (!%p3208_p13), %s683_s18, 16, %s685_s28, [#allocation26]  }
  0x51   : > { %2951 = dma.done.wait (%p3194_p11), [#allocation5], 64  }
  0x52   : > { %2953 = vsyncadd (%p3194_p11), [#allocation5], 4294967232 }
  0x53   : > { %2955 = dma.done.wait (%p3194_p11), [#allocation8], 32  }
  0x54   : > { %2957 = vsyncadd (%p3194_p11), [#allocation8], 4294967264 }
  0x55   : > { %2959 = dma.done.wait (%p3194_p11), [#allocation11], 32  }
  0x56   : > { %2961 = vsyncadd (%p3194_p11), [#allocation11], 4294967264 }
  0x57   : > { %2963 = dma.done.wait (%p3194_p11), [#allocation14], 272  }
  0x58   : > { %2965 = vsyncadd (%p3194_p11), [#allocation14], 4294967024 }
  0x59   : > { %2967 = dma.done.wait (%p3194_p11), [#allocation17], 272  }
  0x5a   : > { %2969 = vsyncadd (%p3194_p11), [#allocation17], 4294967024 }
  0x5b   : > { %2971 = dma.done.wait (%p3194_p11), [#allocation20], 272  }
  0x5c   : > { %2973 = vsyncadd (%p3194_p11), [#allocation20], 4294967024 }
  0x5d   : > { %2975 = dma.done.wait (%p3194_p11), [#allocation23], 272  }
  0x5e   : > { %2977 = vsyncadd (%p3194_p11), [#allocation23], 4294967024 }
  0x5f   : > { %2979 = dma.done.wait (%p3194_p11), [#allocation26], 16  }
  0x60   : > { %2981 = vsyncadd (%p3194_p11), [#allocation26], 4294967280  ;;  %p848_p0 = scmp.lt.s32.totalorder %s3000_s21, 1  ;;  %s3615_s26 = sld [smem:[#allocation46_spill]]  ;;  %vm867_vm0 = vcmask 261120   ;;  %v3026_v4 = vmov 32.0  }
  0x61   : > { %s3616_s19 = sld [smem:[#allocation45_spill]]  ;;  %2454 = vrcp.f32 %v3026_v4  ;;  %v2225_v21 = vld [vmem:[%s3565_s7 + $0x8] sm:$0xff]  ;;  %v2224_v22 = vld [vmem:[%s3565_s7] sm:$0xff]  ;;  %v2221_v23 = vld [vmem:[#allocation15 + $0x8] sm:$0xff]  ;;  %s3027_s27 = smov 120   ;;  %vm1027_vm8 = vcmask 1047556  }
  0x62   : > { %s849_s4 = scalar_select %p848_p0, %s3000_s21, 1  ;;  %1216 = vmatpush.bf16.msra.mxu2 %v2225_v21  ;;  %v2223_v24 = vld [vmem:[#allocation18 + $0x8] sm:$0xff]  ;;  %935 = vmatpush.bf16.msra.mxu0 %v2221_v23  ;;  %v2222_v27 = vld [vmem:[#allocation18] sm:$0xff]  ;;  %v2447_v60 = vld [vmem:[#allocation16] ss:$0 sm:$0xff]  ;;  %vm1011_vm9 = vcmask 60416  }
  0x63   : > { %968 = vmatpush.bf16.msra.mxu1 %v2223_v24  ;;  %v2220_v26 = vld [vmem:[#allocation15] sm:$0xff]  ;;  %v2442_v41 = vld [vmem:[#allocation7] ss:$0 sm:$0xff]  ;;  %v2443_v45 = vld [vmem:[#allocation9] ss:$0 sm:$0xff]  ;;  %s3028_s18 = smov 104  }
  0x64   : > { %s2144_s29 = sshll.u32 %s849_s4, 3  ;;  %v2444_v52 = vld [vmem:[#allocation7] ss:$0 sm:$0xff]  ;;  %v2445_v55 = vld [vmem:[#allocation9] ss:$0 sm:$0xff]  ;;  %s3029_s24 = smov 112  }
  0x65   : > { %v2446_v59 = vld [vmem:[#allocation13] ss:$0 sm:$0xff]  ;;  %vm1359_vm10 = vcmask 1043456   ;;  %vm1355_vm11 = vcmask 64512   ;;  %s3032_s28 = smov 16   ;;  %s3033_s4 = smov 8  }
  0x66   : > { %s858_s5 = scalar_lea.vmem %s3615_s26, %s2144_s29  ;;  %1217 = vmatpush.bf16.msra.mxu2 %v2224_v22  ;;  %936 = vmatpush.bf16.msra.mxu0 %v2220_v26  ;;  %vm1704_vm12 = vcmask 130048   ;;  %vm1706_vm13 = vcmask 195584   ;;  %s845_s0 = sand.u32 1, %s2992_s30  }
  0x67   : > { %v3315_v0 = vld [vmem:[%s858_s5] sm:$0xff]  ;;  %s851_s1 = scalar_lea.vmem %s3616_s19, %s2144_s29  ;;  %v2455_v5 = vpop.eup %2454  ;;  %969 = vmatpush.bf16.msra.mxu1 %v2222_v27  ;;  %s3034_s29 = smov 24  }
  0x68   : > { %v1149_v1 = vsel %vm867_vm0, %v3315_v0, 0.0  ;;  %v864_v2 = vld [vmem:[%s851_s1] sm:$0xff]  ;;  %v872_v6 = vmul.f32 32.0, %v2455_v5  ;;  %vm876_vm1 = vweird.f32 %v2455_v5  ;;  %s2143_s22 = sshll.u32 %s845_s0, 3  ;;  %s2217_s23 = sshll.u32 %s3000_s21, 3 }
  0x69   : > { %1150 = vadd.xlane.f32.xlu0 %v1149_v1  ;;  %v868_v3 = vsel %vm867_vm0, %v864_v2, 0.0  ;;  %s847_s3 = scalar_lea.vmem [#allocation27], %s2143_s22  ;;  %s1873_s21 = scalar_lea.sflag [#allocation6], %s845_s0 }
  0x6a   : > { %v873_v7 = vsub.f32 1.0, %v872_v6  ;;  %s1886_s26 = sshll.u32 %s847_s3, 4  ;;  %s1887_s26 = int_to_ptr.vmem [resolvable:$true] %s1886_s26 }
  0x6c   : > { %v874_v8 = vmul.f32 %v2455_v5, %v873_v7  ;;  %v2448_v7 = vld [vmem:[#allocation19] ss:$0 sm:$0xff] }
  0x6e   : > { %v875_v9 = vadd.f32 %v2455_v5, %v874_v8 }
  0x70   : > { %v3323_v10 = vsel %vm876_vm1, %v2455_v5, %v875_v9 }
  0x71   : > { %869 = vadd.xlane.f32.xlu0 %v868_v3 }
  0xdc   : > { %v1151_v11 = vpop.xlane.xlu0 %1150 }
  0xdd   : > { %v1159_v12 = vmul.f32 %v1151_v11, %v3323_v10 }
  0xdf   : > { %v1160_v13 = vsub.f32 %v3315_v0, %v1159_v12 }
  0xe1   : > { %v1161_v14 = vmul.f32 %v1160_v13, %v1160_v13 }
  0xe3   : > { %v1162_v15 = vsel %vm867_vm0, %v1161_v14, 0.0 }
  0xe4   : > { %1163 = vadd.xlane.f32.xlu1 %v1162_v15  ;;  %v870_v16 = vpop.xlane.xlu0 %869  ;;  %v3030_v15 = vmov 1983009808  }
  0xe5   : > { %v878_v17 = vmul.f32 %v3323_v10, %v870_v16  ;;  %v1032_v16 = vunpack.c.l.s4 %v3030_v15 }
  0xe7   : > { %v879_v18 = vsub.f32 %v864_v2, %v878_v17  ;;  %v3342_v21 = vunpack.c.0.s8 %v1032_v16 }
  0xe9   : > { %v880_v19 = vmul.f32 %v879_v18, %v879_v18 }
  0xeb   : > { %v881_v20 = vsel %vm867_vm0, %v880_v19, 0.0 }
  0xec   : > { %882 = vadd.xlane.f32.xlu1 %v881_v20 }
 0x157   : > { %v1164_v25 = vpop.xlane.xlu1 %1163 }
 0x158   : > { %v1165_v28 = vmul.f32 %v1164_v25, %v3323_v10 }
 0x15a   : > { %v1166_v29 = vadd.f32 1e-06, %v1165_v28 }
 0x15c   : > { %2456 = vrsqrt.f32 %v1166_v29  ;;  %vm1173_vm3 = vweird.f32 %v1166_v29 }
 0x15f   : > { %v883_v30 = vpop.xlane.xlu1 %882 }
 0x160   : > { %v884_v31 = vmul.f32 %v883_v30, %v3323_v10  ;;  %v3031_v30 = vmov 1934713408  }
 0x162   : > { %v2457_v32 = vpop.eup %2456  ;;  %v885_v33 = vadd.f32 1e-06, %v884_v31  ;;  %v1056_v31 = vunpack.c.l.s4 %v3031_v30 }
 0x163   : > { %v1168_v34 = vmul.f32 %v2457_v32, %v1166_v29  ;;  %vm1174_vm2 = vweird.f32 %v2457_v32 }
 0x164   : > { %2458 = vrsqrt.f32 %v885_v33  ;;  %vm1175_vm4 = vmor %vm1173_vm3, %vm1174_vm2  ;;  %vm892_vm6 = vweird.f32 %v885_v33  ;;  %vm1853_vm2 = vcmask 523264  }
 0x165   : > { %v1169_v35 = vmul.f32 %v2457_v32, %v1168_v34 }
 0x167   : > { %v1170_v36 = vmul.f32 0.5, %v1169_v35 }
 0x169   : > { %v1171_v37 = vsub.f32 1.5, %v1170_v36 }
 0x16a   : > { %v2459_v38 = vpop.eup %2458 }
 0x16b   : > { %v1172_v39 = vmul.f32 %v2457_v32, %v1171_v37  ;;  %v887_v40 = vmul.f32 %v2459_v38, %v885_v33  ;;  %vm893_vm5 = vweird.f32 %v2459_v38 }
 0x16c   : > { %vm894_vm7 = vmor %vm892_vm6, %vm893_vm5 }
 0x16d   : > { %v1176_v42 = vsel %vm1175_vm4, %v2457_v32, %v1172_v39  ;;  %v888_v43 = vmul.f32 %v2459_v38, %v887_v40 }
 0x16e   : > { %v1177_v44 = vmul.f32 %v1176_v42, %v1160_v13 }
 0x16f   : > { %v889_v46 = vmul.f32 0.5, %v888_v43 }
 0x170   : > { %v1181_v47 = vmul.f32 %v2442_v41, %v1177_v44 }
 0x171   : > { %v890_v48 = vsub.f32 1.5, %v889_v46 }
 0x172   : > { %v1185_v49 = vadd.f32 %v2443_v45, %v1181_v47  ;;  %v3357_v45 = vunpack.c.0.s8 %v1056_v31 }
 0x173   : > { %v891_v50 = vmul.f32 %v2459_v38, %v890_v48 }
 0x174   : > { %v1186_v51 = vpack.c.bf16 %v1185_v49, %v1185_v49 }
 0x175   : > { %v895_v53 = vsel %vm894_vm7, %v2459_v38, %v891_v50 }
 0x176   : > { %2172 = vmatmul.msk.bf16.vlgmr.msra.gmra.mxu2 %vm867_vm0, %v1186_v51  ;;  %v896_v54 = vmul.f32 %v895_v53, %v879_v18 }
 0x178   : > { %v900_v56 = vmul.f32 %v2444_v52, %v896_v54 }
 0x17a   : > { %v904_v57 = vadd.f32 %v2445_v55, %v900_v56 }
 0x17c   : > { %v905_v58 = vpack.c.bf16 %v904_v57, %v904_v57 }
 0x17e   : > { %2154 = vmatmul.msk.bf16.vlgmr.msra.gmra.mxu0 %vm867_vm0, %v905_v58  ;;  %2163 = vmatmul.msk.bf16.vlgmr.msra.gmra.mxu1 %vm867_vm0, %v905_v58 }
 0x1f9   : > { %v1219_v61 = vpop.f32.mrf.mxu2 }
 0x1fa   : > { %v1220_v62 = vadd.f32 %v2446_v59, %v1219_v61 }
 0x1fb   : > { %v938_v63 = vpop.f32.mrf.mxu0  ;;  %v971_v1 = vpop.f32.mrf.mxu1 }
 0x1fc   : > { %v1223_v2 = vmul.f32 0.35355338, %v1220_v62  ;;  %v939_v3 = vadd.f32 %v2447_v60, %v938_v63  ;;  %v972_v8 = vadd.f32 %v2448_v7, %v971_v1 }
 0x1fe   : > { %1225 = vrot.lane.b32.xlu2 %v1223_v2, %s3027_s27  ;;  %1231 = vrot.lane.b32.xlu0 %v1223_v2, %s3028_s18  ;;  %v1029_v17 = vrot.slane %v972_v8, 4  ;;  %v1237_v22 = vrot.slane %v1223_v2, 4 }
 0x1ff   : > { %975 = vxpose.xlu1.b32.start.end [1/1] (short) (narrow) %v939_v3, 32 }
 0x201   : > { %v1221_v4 = vpop.f32.mrf.mxu2 }
 0x203   : > { %v940_v5 = vpop.f32.mrf.mxu0  ;;  %v973_v6 = vpop.f32.mrf.mxu1 }
 0x206   : > { %1228 = vrot.lane.b32.xlu2 %v1223_v2, %s3029_s24 }
 0x20e   : > { %1017 = vrot.lane.b32.xlu2 %v972_v8, %s3027_s27 }
 0x216   : > { %1020 = vrot.lane.b32.xlu2 %v972_v8, %s3029_s24 }
 0x21e   : > { %1023 = vrot.lane.b32.xlu2 %v972_v8, %s3028_s18  ;;  %s3617_s18 = sld [smem:[#allocation52_spill]] }
 0x258   : > { %v1226_v9 = vpop.permute.xlu2 %1225 }
 0x259   : > { %v1249_v27 = vrot.slane %v1226_v9, 4 }
 0x260   : > { %v1229_v11 = vpop.permute.xlu2 %1228 }
 0x261   : > { %v1234_v19 = vrot.slane %v1229_v11, 4  ;;  %v1238_v28 = vsel %vm1027_vm8, %v1229_v11, %v1237_v22 }
 0x262   : > { %v1246_v37 = vperm.slane %v1238_v28, %v3342_v21 }
 0x263   : > { %v1236_v32 = vsel %vm1027_vm8, %v1234_v19, %v1223_v2 }
 0x264   : > { %v1242_v40 = vperm.slane %v1236_v32, %v3342_v21  ;;  %v1273_v54 = vrot.slane %v1246_v37, 4 }
 0x266   : > { %v1261_v53 = vrot.slane %v1242_v40, 4 }
 0x268   : > { %v1018_v12 = vpop.permute.xlu2 %1017 }
 0x269   : > { %v1041_v24 = vrot.slane %v1018_v12, 4 }
 0x270   : > { %v1021_v13 = vpop.permute.xlu2 %1020  ;;  %v1232_v18 = vpop.permute.xlu0 %1231 }
 0x271   : > { %v1026_v14 = vrot.slane %v1021_v13, 4  ;;  %v1030_v23 = vsel %vm1027_vm8, %v1021_v13, %v1029_v17  ;;  %v1247_v25 = vrot.slane %v1232_v18, 4  ;;  %v1250_v36 = vsel %vm1027_vm8, %v1232_v18, %v1249_v27 }
 0x272   : > { %v1038_v33 = vperm.slane %v1030_v23, %v3342_v21  ;;  %v1258_v46 = vperm.slane %v1250_v36, %v3342_v21 }
 0x273   : > { %v1028_v20 = vsel %vm1027_vm8, %v1026_v14, %v972_v8  ;;  %v1248_v38 = vsel %vm1027_vm8, %v1247_v25, %v1226_v9 }
 0x274   : > { %v1034_v29 = vperm.slane %v1028_v20, %v3342_v21  ;;  %v1065_v44 = vrot.slane %v1038_v33, 4  ;;  %v1254_v47 = vperm.slane %v1248_v38, %v3342_v21  ;;  %v1271_v57 = vrot.slane %v1258_v46, 4 }
 0x275   : > { %v1274_v62 = vsel %vm1027_vm8, %v1258_v46, %v1273_v54 }
 0x276   : > { %v1053_v41 = vrot.slane %v1034_v29, 4  ;;  %v1259_v61 = vrot.slane %v1254_v47, 4  ;;  %v1262_v2 = vsel %vm1027_vm8, %v1254_v47, %v1261_v53  ;;  %v1272_v11 = vsel %vm1027_vm8, %v1271_v57, %v1246_v37 }
 0x277   : > { %v1282_v19 = vperm.slane %v1274_v62, %v3357_v45  ;;  %v1270_v25 = vperm.slane %v1262_v2, %v3357_v45 }
 0x278   : > { %v1024_v26 = vpop.permute.xlu2 %1023 }
 0x279   : > { %v1039_v34 = vrot.slane %v1024_v26, 4  ;;  %v1042_v35 = vsel %vm1027_vm8, %v1024_v26, %v1041_v24  ;;  %v1278_v26 = vperm.slane %v1272_v11, %v3357_v45 }
 0x27a   : > { %v1050_v43 = vperm.slane %v1042_v35, %v3342_v21 }
 0x27b   : > { %v1040_v39 = vsel %vm1027_vm8, %v1039_v34, %v1018_v12 }
 0x27c   : > { %v1046_v42 = vperm.slane %v1040_v39, %v3342_v21  ;;  %v1063_v51 = vrot.slane %v1050_v43, 4  ;;  %v1066_v52 = vsel %vm1027_vm8, %v1050_v43, %v1065_v44  ;;  %v1287_v43 = vrot.slane %v1278_v26, 4 }
 0x27d   : > { %v1074_v56 = vperm.slane %v1066_v52, %v3357_v45 }
 0x27e   : > { %v1051_v48 = vrot.slane %v1046_v42, 4  ;;  %v1054_v49 = vsel %vm1027_vm8, %v1046_v42, %v1053_v41  ;;  %v1064_v59 = vsel %vm1027_vm8, %v1063_v51, %v1038_v33  ;;  %v1289_v33 = vrot.slane %v1282_v19, 4 }
 0x27f   : > { %v1062_v50 = vperm.slane %v1054_v49, %v3357_v45  ;;  %v1070_v63 = vperm.slane %v1064_v59, %v3357_v45  ;;  %v1081_v1 = vrot.slane %v1074_v56, 4  ;;  %v1285_v42 = vrot.slane %v1270_v25, 4 }
 0x280   : > { %v1052_v55 = vsel %vm1027_vm8, %v1051_v48, %v1034_v29  ;;  %v1260_v29 = vsel %vm1027_vm8, %v1259_v61, %v1242_v40  ;;  %v1290_v47 = vsel %vm1027_vm8, 0.0, %v1289_v33  ;;  %v1288_v59 = vsel %vm1027_vm8, 0.0, %v1287_v43 }
 0x281   : > { %v1058_v58 = vperm.slane %v1052_v55, %v3357_v45  ;;  %v1077_v60 = vrot.slane %v1062_v50, 4  ;;  %v1079_v6 = vrot.slane %v1070_v63, 4  ;;  %v1082_v7 = vsel %vm1027_vm8, 0.0, %v1081_v1 }
 0x282   : > { %v1094_v13 = vsel %vm1027_vm8, %v1081_v1, %v1070_v63  ;;  %v1099_v14 = vrot.slane %v1082_v7, 4  ;;  %v1266_v39 = vperm.slane %v1260_v29, %v3357_v45  ;;  %v1307_v55 = vrot.slane %v1290_v47, 4 }
 0x283   : > { %v1075_v3 = vrot.slane %v1058_v58, 4  ;;  %v1078_v4 = vsel %vm1027_vm8, 0.0, %v1077_v60  ;;  %v1083_v5 = vsel %vm1027_vm8, %v1077_v60, %v1058_v58  ;;  %v1080_v15 = vsel %vm1027_vm8, 0.0, %v1079_v6 }
 0x284   : > { %v1087_v8 = vperm.slane %v1083_v5, %v3342_v21  ;;  %v1088_v9 = vrot.slane %v1078_v4, 4  ;;  %v1098_v17 = vperm.slane %v1094_v13, %v3342_v21  ;;  %v1100_v22 = vsel %vm1027_vm8, %v1099_v14, %v1080_v15 }
 0x285   : > { %v1076_v12 = vsel %vm1027_vm8, 0.0, %v1075_v3  ;;  %v1104_v23 = vperm.slane %v1100_v22, %v3342_v21  ;;  %v1283_v57 = vrot.slane %v1266_v39, 4  ;;  %v1286_v58 = vsel %vm1027_vm8, 0.0, %v1285_v42 }
 0x286   : > { %v1089_v16 = vsel %vm1027_vm8, %v1088_v9, %v1076_v12  ;;  %v1107_v18 = vrot.slane %v1087_v8, 4  ;;  %v1119_v24 = vrot.slane %v1098_v17, 4  ;;  %v1296_v60 = vrot.slane %v1286_v58, 4  ;;  %v1353_v58 = vld [vmem:[#allocation4] sm:$0xf] }
 0x287   : > { %v1093_v20 = vperm.slane %v1089_v16, %v3342_v21  ;;  %v1117_v31 = vrot.slane %v1104_v23, 4  ;;  %v1308_v61 = vsel %vm1027_vm8, %v1307_v55, %v1288_v59  ;;  %v1284_v62 = vsel %vm1027_vm8, 0.0, %v1283_v57 }
 0x288   : > { %v1120_v32 = vsel %vm1027_vm8, %v1104_v23, %v1119_v24  ;;  %v1312_v63 = vperm.slane %v1308_v61, %v3342_v21  ;;  %v1297_v1 = vsel %vm1027_vm8, %v1296_v60, %v1284_v62  ;;  %v1302_v3 = vsel %vm1027_vm8, %v1289_v33, %v1278_v26 }
 0x289   : > { %v1105_v27 = vrot.slane %v1093_v20, 4  ;;  %v1108_v28 = vsel %vm1027_vm8, %v1093_v20, %v1107_v18  ;;  %v1128_v35 = vperm.slane %v1120_v32, %v3357_v45  ;;  %v1118_v37 = vsel %vm1027_vm8, %v1117_v31, %v1098_v17 }
 0x28a   : > { %v1116_v30 = vperm.slane %v1108_v28, %v3357_v45  ;;  %v1124_v40 = vperm.slane %v1118_v37, %v3357_v45  ;;  %v1301_v5 = vperm.slane %v1297_v1, %v3342_v21  ;;  %v1325_v6 = vrot.slane %v1312_v63, 4 }
 0x28b   : > { %v1106_v34 = vsel %vm1027_vm8, %v1105_v27, %v1087_v8  ;;  %v1133_v41 = vrot.slane %v1128_v35, 4  ;;  %v1306_v7 = vperm.slane %v1302_v3, %v3342_v21  ;;  %v1291_v8 = vsel %vm1027_vm8, %v1285_v42, %v1266_v39 }
 0x28c   : > { %v1112_v36 = vperm.slane %v1106_v34, %v3357_v45  ;;  %v1135_v38 = vrot.slane %v1116_v30, 4  ;;  %v1129_v48 = vrot.slane %v1124_v40, 4  ;;  %v1313_v9 = vrot.slane %v1301_v5, 4 }
 0x28d   : > { %v1134_v49 = vsel %vm1027_vm8, %v1133_v41, %v1116_v30  ;;  %v1326_v11 = vsel %vm1027_vm8, %v1325_v6, %v1306_v7  ;;  %v1295_v14 = vperm.slane %v1291_v8, %v3342_v21  ;;  %v1327_v24 = vrot.slane %v1306_v7, 4 }
 0x28e   : > { %v1131_v44 = vrot.slane %v1112_v36, 4  ;;  %v1136_v46 = vsel %vm1027_vm8, %v1128_v35, %v1135_v38  ;;  %v1139_v52 = vpack.c.bf16 %v1134_v49, %v1134_v49  ;;  %v1130_v53 = vsel %vm1027_vm8, %v1129_v48, %v1112_v36 }
 0x28f   : > { %v1140_v50 = vpack.c.bf16 %v1136_v46, %v1136_v46  ;;  %v1137_v56 = vpack.c.bf16 %v1130_v53, %v1130_v53  ;;  %v1332_v15 = vperm.slane %v1326_v11, %v3357_v45  ;;  %v1314_v16 = vsel %vm1027_vm8, %v1313_v9, %v1295_v14 }
 0x290   : > { %v1132_v51 = vsel %vm1027_vm8, %v1124_v40, %v1131_v44  ;;  %1143 = vst.msk [vmem:[#allocation3 + $0x8] sm:$0xf] %vm1011_vm9, %v1139_v52  ;;  %v1320_v17 = vperm.slane %v1314_v16, %v3357_v45  ;;  %v1315_v27 = vrot.slane %v1295_v14, 4  ;;  %v1328_v28 = vsel %vm1027_vm8, %v1312_v63, %v1327_v24 }
 0x291   : > { %v1138_v54 = vpack.c.bf16 %v1132_v51, %v1132_v51  ;;  %1144 = vst.msk [vmem:[#allocation3 + $0xc] sm:$0xf] %vm1011_vm9, %v1140_v50  ;;  %v1337_v18 = vrot.slane %v1332_v15, 4  ;;  %v1336_v33 = vperm.slane %v1328_v28, %v3357_v45  ;;  %v1354_v59 = vunpack.c.l.bf16 %v1353_v58 }
 0x292   : > { %1141 = vst.msk [vmem:[#allocation3] sm:$0xf] %vm1011_vm9, %v1137_v56  ;;  %v1316_v35 = vsel %vm1027_vm8, %v1301_v5, %v1315_v27  ;;  %v1339_v37 = vrot.slane %v1320_v17, 4 }
 0x293   : > { %1142 = vst.msk [vmem:[#allocation3 + $0x4] sm:$0xf] %vm1011_vm9, %v1138_v54  ;;  %v1338_v23 = vsel %vm1027_vm8, %v1337_v18, %v1320_v17  ;;  %v1324_v38 = vperm.slane %v1316_v35, %v3357_v45  ;;  %v1341_v39 = vrot.slane %v1336_v33, 4 }
 0x294   : > { %v1345_v26 = vpack.c.bf16 %v1338_v23, %v1338_v23  ;;  %v1340_v44 = vsel %vm1027_vm8, %v1332_v15, %v1339_v37 }
 0x295   : > { %v1342_v46 = vsel %vm1027_vm8, %v1341_v39, %v1324_v38  ;;  %v1346_v49 = vpack.c.bf16 %v1340_v44, %v1340_v44  ;;  %v1343_v51 = vrot.slane %v1324_v38, 4 }
 0x296   : > { %v1347_v50 = vpack.c.bf16 %v1342_v46, %v1342_v46 }
 0x297   : > { %v1499_v42 = vld [vmem:[#allocation3 + $0x8] sm:$0xf]  ;;  %v1344_v54 = vsel %vm1027_vm8, %v1336_v33, %v1343_v51 }
 0x298   : > { %v1543_v48 = vsel %vm1359_vm10, %v1499_v42, 0  ;;  %v1500_v52 = vld [vmem:[#allocation3 + $0xc] sm:$0xf]  ;;  %v1348_v57 = vpack.c.bf16 %v1344_v54, %v1344_v54 }
 0x299   : > { %v1497_v2 = vld [vmem:[#allocation3] sm:$0xf]  ;;  %v1562_v56 = vsel %vm1359_vm10, %v1500_v52, 0 }
 0x29a   : > { %v1505_v4 = vsel %vm1359_vm10, %v1497_v2, 0  ;;  %v1498_v31 = vld [vmem:[#allocation3 + $0x4] sm:$0xf] }
 0x29b   : > { %1514 = vmatpush.bf16.msrb.mxu2 %v1505_v4  ;;  %v1524_v36 = vsel %vm1359_vm10, %v1498_v31, 0 }
 0x2a3   : > { %v991_v12 = vpop.trf.xlu1 }
 0x2a4   : > { %v1007_v13 = vpack.c.bf16 %v991_v12, %v991_v12 }
 0x2a6   : > { %1012 = vst.msk [vmem:[#allocation2] sm:$0xf] %vm1011_vm9, %v1007_v13 }
 0x2ab   : > { %v992_v19 = vpop.trf.xlu1 }
 0x2ac   : > { %v1008_v20 = vpack.c.bf16 %v992_v19, %v992_v19 }
 0x2ad   : > { %v1349_v22 = vld [vmem:[#allocation2] sm:$0xf] }
 0x2ae   : > { %1013 = vst.msk [vmem:[#allocation2 + $0x4] sm:$0xf] %vm1011_vm9, %v1008_v20  ;;  %v1361_v25 = vsel %vm1359_vm10, %v1349_v22, 0 }
 0x2af   : > { %1370 = vmatpush.bf16.msra.mxu3 %v1361_v25 }
 0x2b2   : > { %2173 = vmatmul.msk.bf16.vlgmr.msra.gmra.mxu3 %vm1355_vm11, %v1345_v26 }
 0x2b3   : > { %v993_v29 = vpop.trf.xlu1 }
 0x2b4   : > { %v1009_v30 = vpack.c.bf16 %v993_v29, %v993_v29 }
 0x2b5   : > { %v1350_v32 = vld [vmem:[#allocation2 + $0x4] sm:$0xf] }
 0x2b6   : > { %1014 = vst.msk [vmem:[#allocation2 + $0x8] sm:$0xf] %vm1011_vm9, %v1009_v30  ;;  %v1380_v34 = vsel %vm1359_vm10, %v1350_v32, 0 }
 0x2b7   : > { %1389 = vmatpush.bf16.msrb.mxu3 %v1380_v34 }
 0x2bb   : > { %1533 = vmatpush.bf16.msra.mxu3 %v1524_v36  ;;  %v994_v40 = vpop.trf.xlu1 }
 0x2bc   : > { %v1010_v41 = vpack.c.bf16 %v994_v40, %v994_v40 }
 0x2bd   : > { %v1351_v43 = vld [vmem:[#allocation2 + $0x8] sm:$0xf] }
 0x2be   : > { %1015 = vst.msk [vmem:[#allocation2 + $0xc] sm:$0xf] %vm1011_vm9, %v1010_v41  ;;  %v1399_v47 = vsel %vm1359_vm10, %v1351_v43, 0 }
 0x2bf   : > { %1408 = vmatpush.bf16.msrb.mxu0 %v1399_v47 }
 0x2c2   : > { %2174 = vmatmul.msk.bf16.vlgmr.msrb.gmra.mxu3 %vm1355_vm11, %v1346_v49  ;;  %2175 = vmatmul.msk.bf16.vlgmr.msrb.gmra.mxu0 %vm1355_vm11, %v1347_v50 }
 0x2c3   : > { %1552 = vmatpush.bf16.msra.mxu0 %v1543_v48 }
 0x2c5   : > { %v1352_v53 = vld [vmem:[#allocation2 + $0xc] sm:$0xf] }
 0x2c6   : > { %v1418_v55 = vsel %vm1359_vm10, %v1352_v53, 0 }
 0x2c7   : > { %1427 = vmatpush.bf16.msrb.mxu1 %v1418_v55 }
 0x2ca   : > { %2176 = vmatmul.msk.bf16.vlgmr.msrb.gmra.mxu1 %vm1355_vm11, %v1348_v57 }
 0x2cb   : > { %1571 = vmatpush.bf16.msra.mxu1 %v1562_v56 }
 0x335   : > { %v1372_v60 = vpop.f32.mrf.mxu3 }
 0x336   : > { %v1373_v61 = vadd.f32 %v1372_v60, %v1354_v59 }
 0x338   : > { %v1433_v62 = vsel %vm1355_vm11, %v1373_v61, -inf }
 0x339   : > { %1434 = vmax.xlane.f32.xlu0 %v1433_v62 }
 0x33d   : > { %v1374_v63 = vpop.f32.mrf.mxu3 }
 0x33f   : > { %v1410_v1 = vpop.f32.mrf.mxu0 }
 0x340   : > { %v1411_v2 = vadd.f32 %v1410_v1, %v1354_v59 }
 0x342   : > { %v1439_v3 = vsel %vm1355_vm11, %v1411_v2, -inf }
 0x343   : > { %1440 = vmax.xlane.f32.xlu1 %v1439_v3 }
 0x345   : > { %v1391_v4 = vpop.f32.mrf.mxu3 }
 0x346   : > { %v1392_v5 = vadd.f32 %v1391_v4, %v1354_v59 }
 0x347   : > { %v1412_v6 = vpop.f32.mrf.mxu0  ;;  %v1429_v7 = vpop.f32.mrf.mxu1 }
 0x348   : > { %v1430_v8 = vadd.f32 %v1429_v7, %v1354_v59  ;;  %v1436_v9 = vsel %vm1355_vm11, %v1392_v5, -inf }
 0x349   : > { %1437 = vmax.xlane.f32.xlu2 %v1436_v9 }
 0x34a   : > { %v1442_v11 = vsel %vm1355_vm11, %v1430_v8, -inf }
 0x34b   : > { %1443 = vmax.xlane.f32.xlu0 %v1442_v11 }
 0x34d   : > { %v1393_v12 = vpop.f32.mrf.mxu3 }
 0x34f   : > { %v1431_v13 = vpop.f32.mrf.mxu1 }
 0x3ac   : > { %v1435_v14 = vpop.xlane.xlu0 %1434 }
 0x3ad   : > { %v1445_v15 = vsub.f32 %v1373_v61, %v1435_v14 }
 0x3af   : > { %v1449_v16 = vpack.c.bf16 %v1445_v15, %v1445_v15 }
 0x3b1   : > { %v1453_v17 = vunpack.c.l.bf16 %v1449_v16 }
 0x3b3   : > { %v1457_v18 = vmul.f32 1.442695, %v1453_v17 }
 0x3b5   : > { %2460 = vpow2.f32 %v1457_v18 }
 0x3b6   : > { %v1441_v19 = vpop.xlane.xlu1 %1440 }
 0x3b7   : > { %v1447_v20 = vsub.f32 %v1411_v2, %v1441_v19 }
 0x3b9   : > { %v1451_v22 = vpack.c.bf16 %v1447_v20, %v1447_v20 }
 0x3bb   : > { %v2461_v23 = vpop.eup %2460  ;;  %v1455_v24 = vunpack.c.l.bf16 %v1451_v22 }
 0x3bc   : > { %v1465_v25 = vpack.c.bf16 %v2461_v23, %v2461_v23  ;;  %v1438_v26 = vpop.xlane.xlu2 %1437 }
 0x3bd   : > { %v1461_v27 = vmul.f32 1.442695, %v1455_v24  ;;  %v1446_v28 = vsub.f32 %v1392_v5, %v1438_v26 }
 0x3be   : > { %2177 = vmatmul.msk.bf16.vlgmr.msrb.gmra.mxu2 %vm1355_vm11, %v1465_v25  ;;  %v1444_v29 = vpop.xlane.xlu0 %1443  ;;  %v1469_v30 = vunpack.c.l.bf16 %v1465_v25 }
 0x3bf   : > { %2462 = vpow2.f32 %v1461_v27  ;;  %v1450_v31 = vpack.c.bf16 %v1446_v28, %v1446_v28  ;;  %v1448_v32 = vsub.f32 %v1430_v8, %v1444_v29 }
 0x3c0   : > { %v1473_v33 = vsel %vm1355_vm11, %v1469_v30, 0.0 }
 0x3c1   : > { %v1454_v34 = vunpack.c.l.bf16 %v1450_v31  ;;  %v1452_v35 = vpack.c.bf16 %v1448_v32, %v1448_v32  ;;  %1474 = vadd.xlane.f32.xlu0 %v1473_v33 }
 0x3c3   : > { %v1459_v36 = vmul.f32 1.442695, %v1454_v34  ;;  %v1456_v37 = vunpack.c.l.bf16 %v1452_v35 }
 0x3c5   : > { %v2463_v38 = vpop.eup %2462  ;;  %2464 = vpow2.f32 %v1459_v36  ;;  %v1463_v39 = vmul.f32 1.442695, %v1456_v37 }
 0x3c6   : > { %v1467_v40 = vpack.c.bf16 %v2463_v38, %v2463_v38 }
 0x3c7   : > { %2466 = vpow2.f32 %v1463_v39 }
 0x3c8   : > { %2179 = vmatmul.msk.bf16.vlgmr.msra.gmra.mxu0 %vm1355_vm11, %v1467_v40  ;;  %v1471_v41 = vunpack.c.l.bf16 %v1467_v40 }
 0x3ca   : > { %v1479_v42 = vsel %vm1355_vm11, %v1471_v41, 0.0 }
 0x3cb   : > { %v2465_v43 = vpop.eup %2464  ;;  %1480 = vadd.xlane.f32.xlu2 %v1479_v42 }
 0x3cc   : > { %v1466_v44 = vpack.c.bf16 %v2465_v43, %v2465_v43 }
 0x3cd   : > { %v2467_v46 = vpop.eup %2466 }
 0x3ce   : > { %v1468_v47 = vpack.c.bf16 %v2467_v46, %v2467_v46  ;;  %2178 = vmatmul.msk.bf16.vlgmr.msra.gmra.mxu3 %vm1355_vm11, %v1466_v44  ;;  %v1470_v48 = vunpack.c.l.bf16 %v1466_v44 }
 0x3d0   : > { %2180 = vmatmul.msk.bf16.vlgmr.msra.gmra.mxu1 %vm1355_vm11, %v1468_v47  ;;  %v1476_v49 = vsel %vm1355_vm11, %v1470_v48, 0.0  ;;  %v1472_v50 = vunpack.c.l.bf16 %v1468_v47 }
 0x3d1   : > { %1477 = vadd.xlane.f32.xlu0 %v1476_v49 }
 0x3d2   : > { %v1482_v51 = vsel %vm1355_vm11, %v1472_v50, 0.0 }
 0x3d3   : > { %1483 = vadd.xlane.f32.xlu2 %v1482_v51 }
 0x434   : > { %v1475_v52 = vpop.xlane.xlu0 %1474 }
 0x435   : > { %v1485_v53 = vpack.c.bf16 %v1475_v52, %v1475_v52 }
 0x437   : > { %v1489_v54 = vunpack.c.l.bf16 %v1485_v53 }
 0x439   : > { %2468 = vrcp.f32 %v1489_v54 }
 0x43e   : > { %v1481_v55 = vpop.xlane.xlu2 %1480 }
 0x43f   : > { %v1487_v56 = vpack.c.bf16 %v1481_v55, %v1481_v55  ;;  %v2469_v2 = vpop.eup %2468 }
 0x441   : > { %v1491_v57 = vunpack.c.l.bf16 %v1487_v56  ;;  %v1516_v58 = vpop.f32.mrf.mxu2 }
 0x442   : > { %v1577_v6 = vmul.f32 %v2469_v2, %v1516_v58 }
 0x443   : > { %2470 = vrcp.f32 %v1491_v57 }
 0x444   : > { %v1478_v59 = vpop.xlane.xlu0 %1477  ;;  %v1583_v12 = vrot.slane %v1577_v6, 4 }
 0x445   : > { %v1486_v60 = vpack.c.bf16 %v1478_v59, %v1478_v59  ;;  %v1554_v61 = vpop.f32.mrf.mxu0 }
 0x446   : > { %v1484_v62 = vpop.xlane.xlu2 %1483 }
 0x447   : > { %v1490_v63 = vunpack.c.l.bf16 %v1486_v60  ;;  %v1488_v1 = vpack.c.bf16 %v1484_v62, %v1484_v62 }
 0x449   : > { %v2471_v3 = vpop.eup %2470  ;;  %v1492_v4 = vunpack.c.l.bf16 %v1488_v1  ;;  %v1518_v5 = vpop.f32.mrf.mxu2  ;;  %2472 = vrcp.f32 %v1490_v63 }
 0x44a   : > { %v1579_v7 = vmul.f32 %v2471_v3, %v1554_v61 }
 0x44b   : > { %2474 = vrcp.f32 %v1492_v4 }
 0x44c   : > { %v1581_v8 = vrot.slane %v1579_v7, 4  ;;  %v1584_v15 = vsel %vm1027_vm8, %v1579_v7, %v1583_v12 }
 0x44d   : > { %v1556_v9 = vpop.f32.mrf.mxu0  ;;  %v1573_v11 = vpop.f32.mrf.mxu1  ;;  %v1592_v22 = vperm.slane %v1584_v15, %v3342_v21 }
 0x44e   : > { %v1582_v14 = vsel %vm1027_vm8, %v1581_v8, %v1577_v6 }
 0x44f   : > { %v2473_v13 = vpop.eup %2472  ;;  %v1588_v20 = vperm.slane %v1582_v14, %v3342_v21  ;;  %v1619_v29 = vrot.slane %v1592_v22, 4 }
 0x451   : > { %v2475_v16 = vpop.eup %2474  ;;  %v1535_v17 = vpop.f32.mrf.mxu3  ;;  %v1607_v28 = vrot.slane %v1588_v20, 4 }
 0x452   : > { %v1580_v18 = vmul.f32 %v2475_v16, %v1573_v11  ;;  %v1578_v19 = vmul.f32 %v2473_v13, %v1535_v17 }
 0x454   : > { %v1593_v23 = vrot.slane %v1580_v18, 4  ;;  %v1595_v24 = vrot.slane %v1578_v19, 4 }
 0x455   : > { %v1575_v25 = vpop.f32.mrf.mxu1 }
 0x456   : > { %v1594_v26 = vsel %vm1027_vm8, %v1593_v23, %v1578_v19  ;;  %v1596_v27 = vsel %vm1027_vm8, %v1580_v18, %v1595_v24  ;;  %v2227_v19 = vld [vmem:[#allocation21 + $0x8] sm:$0xff] }
 0x457   : > { %v1600_v30 = vperm.slane %v1594_v26, %v3342_v21  ;;  %v1604_v31 = vperm.slane %v1596_v27, %v3342_v21  ;;  %1738 = vmatpush.bf16.msra.mxu2 %v2227_v19 }
 0x459   : > { %v1605_v32 = vrot.slane %v1600_v30, 4  ;;  %v1608_v33 = vsel %vm1027_vm8, %v1600_v30, %v1607_v28  ;;  %v1617_v34 = vrot.slane %v1604_v31, 4  ;;  %v1620_v35 = vsel %vm1027_vm8, %v1604_v31, %v1619_v29  ;;  %v1537_v36 = vpop.f32.mrf.mxu3  ;;  %v2449_v28 = vld [vmem:[#allocation22] ss:$0 sm:$0xff] }
 0x45a   : > { %v1616_v37 = vperm.slane %v1608_v33, %v3357_v45  ;;  %v1628_v38 = vperm.slane %v1620_v35, %v3357_v45 }
 0x45b   : > { %v1606_v39 = vsel %vm1027_vm8, %v1605_v32, %v1588_v20  ;;  %v1618_v40 = vsel %vm1027_vm8, %v1617_v34, %v1592_v22 }
 0x45c   : > { %v1612_v41 = vperm.slane %v1606_v39, %v3357_v45  ;;  %v1624_v42 = vperm.slane %v1618_v40, %v3357_v45  ;;  %v1631_v43 = vrot.slane %v1616_v37, 4  ;;  %v1635_v44 = vrot.slane %v1628_v38, 4  ;;  %v2229_v39 = vld [vmem:[#allocation24 + $0x8] sm:$0xff]  ;;  %v2228_v40 = vld [vmem:[#allocation24] sm:$0xff] }
 0x45d   : > { %1808 = vmatpush.bf16.msrb.mxu3 %v2229_v39 }
 0x45e   : > { %v1629_v46 = vrot.slane %v1612_v41, 4  ;;  %v1632_v47 = vsel %vm1027_vm8, 0.0, %v1631_v43  ;;  %v1633_v48 = vrot.slane %v1624_v42, 4  ;;  %v1636_v49 = vsel %vm1027_vm8, 0.0, %v1635_v44 }
 0x45f   : > { %v1642_v50 = vrot.slane %v1632_v47, 4  ;;  %v1653_v51 = vrot.slane %v1636_v49, 4  ;;  %v1637_v52 = vsel %vm1027_vm8, %v1631_v43, %v1612_v41  ;;  %v1648_v53 = vsel %vm1027_vm8, %v1635_v44, %v1624_v42  ;;  %v2232_v43 = vld [vmem:[%s3575_s17 + $0x10] sm:$0xff] }
 0x460   : > { %v1630_v54 = vsel %vm1027_vm8, 0.0, %v1629_v46  ;;  %v1634_v55 = vsel %vm1027_vm8, 0.0, %v1633_v48  ;;  %v1641_v56 = vperm.slane %v1637_v52, %v3342_v21  ;;  %v1652_v57 = vperm.slane %v1648_v53, %v3342_v21  ;;  %v2450_v52 = vld [vmem:[#allocation10] ss:$0 sm:$0xff] }
 0x461   : > { %v1643_v58 = vsel %vm1027_vm8, %v1642_v50, %v1630_v54  ;;  %v1654_v59 = vsel %vm1027_vm8, %v1653_v51, %v1634_v55  ;;  %1809 = vmatpush.bf16.msrb.mxu3 %v2228_v40  ;;  %v2451_v54 = vld [vmem:[#allocation12] ss:$0 sm:$0xff] }
 0x462   : > { %v1647_v60 = vperm.slane %v1643_v58, %v3342_v21  ;;  %v1658_v61 = vperm.slane %v1654_v59, %v3342_v21  ;;  %v1661_v62 = vrot.slane %v1641_v56, 4  ;;  %v1673_v63 = vrot.slane %v1652_v57, 4  ;;  %v2231_v58 = vld [vmem:[%s3575_s17 + $0x8] sm:$0xff]  ;;  %v2230_v59 = vld [vmem:[%s3575_s17] sm:$0xff] }
 0x464   : > { %v1662_v1 = vsel %vm1027_vm8, %v1647_v60, %v1661_v62  ;;  %v1674_v2 = vsel %vm1027_vm8, %v1658_v61, %v1673_v63  ;;  %v1659_v3 = vrot.slane %v1647_v60, 4  ;;  %v1671_v4 = vrot.slane %v1658_v61, 4  ;;  %v2452_v60 = vld [vmem:[#allocation25] ss:$0 sm:$0xff] }
 0x465   : > { %v1682_v5 = vperm.slane %v1674_v2, %v3357_v45  ;;  %v1670_v8 = vperm.slane %v1662_v1, %v3357_v45 }
 0x466   : > { %v1660_v6 = vsel %vm1027_vm8, %v1659_v3, %v1641_v56  ;;  %v1672_v7 = vsel %vm1027_vm8, %v1671_v4, %v1652_v57  ;;  %v2453_v3 = vld [vmem:[%s3617_s18] ss:$0 sm:$0xff] }
 0x467   : > { %v1687_v9 = vrot.slane %v1682_v5, 4  ;;  %v1666_v11 = vperm.slane %v1660_v6, %v3357_v45  ;;  %v1678_v21 = vperm.slane %v1672_v7, %v3357_v45  ;;  %v1689_v17 = vrot.slane %v1670_v8, 4  ;;  %v2226_v45 = vld [vmem:[#allocation21] sm:$0xff] }
 0x468   : > { %1739 = vmatpush.bf16.msra.mxu2 %v2226_v45 }
 0x469   : > { %v1688_v12 = vsel %vm1027_vm8, %v1687_v9, %v1670_v8  ;;  %v1683_v13 = vrot.slane %v1678_v21, 4  ;;  %v1685_v14 = vrot.slane %v1666_v11, 4  ;;  %v1690_v18 = vsel %vm1027_vm8, %v1682_v5, %v1689_v17 }
 0x46a   : > { %1696 = vrot.lane.b32.xlu0 %v1688_v12, %s3032_s28 }
 0x46b   : > { %v1686_v15 = vsel %vm1027_vm8, %v1678_v21, %v1685_v14  ;;  %v1684_v16 = vsel %vm1027_vm8, %v1683_v13, %v1666_v11 }
 0x46c   : > { %1692 = vrot.lane.b32.xlu2 %v1686_v15, %s3033_s4  ;;  %s3618_s4 = sld [smem:[#allocation53_spill]] }
 0x472   : > { %s1884_s2 = scalar_lea.hbm %s3618_s4, %s2217_s23  ;;  %s2918_s22 = scalar_lea.hbm %s3618_s4, 16 }
 0x473   : > { %s1888_s5 = sshll.u32 %s1884_s2, 4  ;;  %s1889_s5 = int_to_ptr.hbm [resolvable:$true] %s1888_s5 }
 0x474   : > { %1700 = vrot.lane.b32.xlu2 %v1690_v18, %s3034_s29  ;;  %s2912_s20 = sshra.s32 %s1889_s5, 4  ;;  %s2913_s20 = int_to_ptr.hbm [resolvable:$true] %s2912_s20 }
 0x475   : > { %s2914_s8 = scalar_lea.hbm %s2913_s20, 8  ;;  %p2919_p5 = scmp.lt.s32.totalorder %s2913_s20, %s3618_s4 }
 0x476   : > { %p2915_p1 = scmp.ne.s32.totalorder %s2913_s20, %s2914_s8  ;;  %p2920_p6 = scmp.lt.s32.totalorder %s2918_s22, %s2914_s8 }
 0x478   : > { %p2916_p2 = pnand %p2915_p1, %p3175_p4  ;;  %p2921_p7 = por %p2920_p6, %p2919_p5 }
 0x47a   : > { %p2917_p3 = pneg %p2916_p2 }
 0x47c   : > { %p2922_p9 = pnand %p2921_p7, %p2917_p3 }
 0x4c6   : > { %v1693_v20 = vpop.permute.xlu2 %1692 }
 0x4c7   : > { %v1703_v22 = vsel %vm1355_vm11, %v1684_v16, %v1693_v20 }
 0x4ce   : > { %v1701_v24 = vpop.permute.xlu2 %1700 }
 0x4dc   : > { %v1697_v23 = vpop.permute.xlu0 %1696 }
 0x4dd   : > { %v1705_v25 = vsel %vm1704_vm12, %v1703_v22, %v1697_v23 }
 0x4de   : > { %v1707_v26 = vsel %vm1706_vm13, %v1705_v25, %v1701_v24 }
 0x4df   : > { %v1708_v27 = vpack.c.bf16 %v1707_v26, %v1707_v26 }
 0x4e1   : > { %2189 = vmatmul.msk.bf16.vlgmr.msra.gmra.mxu2 %vm867_vm0, %v1708_v27 }
 0x564   : > { %v1741_v29 = vpop.f32.mrf.mxu2 }
 0x565   : > { %v1742_v30 = vadd.f32 %v2449_v28, %v1741_v29 }
 0x567   : > { %v1745_v31 = vadd.f32 %v1742_v30, %v3315_v0  ;;  %v2233_v0 = vld [vmem:[%s3575_s17 + $0x18] sm:$0xff] }
 0x568   : > { %1861 = vmatpush.bf16.msrb.mxu0 %v2233_v0 }
 0x569   : > { %v1748_v32 = vsel %vm867_vm0, %v1745_v31, 0.0 }
 0x56a   : > { %1749 = vadd.xlane.f32.xlu0 %v1748_v32 }
 0x56c   : > { %v1743_v33 = vpop.f32.mrf.mxu2  ;;  %1862 = vmatpush.bf16.msrb.mxu0 %v2232_v43 }
 0x570   : > { %1863 = vmatpush.bf16.msrb.mxu0 %v2231_v58 }
 0x574   : > { %1864 = vmatpush.bf16.msrb.mxu0 %v2230_v59 }
 0x5dd   : > { %v1750_v34 = vpop.xlane.xlu0 %1749 }
 0x5de   : > { %v1751_v35 = vmul.f32 %v1750_v34, %v3323_v10 }
 0x5e0   : > { %v1752_v36 = vsub.f32 %v1745_v31, %v1751_v35 }
 0x5e2   : > { %v1753_v37 = vmul.f32 %v1752_v36, %v1752_v36 }
 0x5e4   : > { %v1754_v38 = vsel %vm867_vm0, %v1753_v37, 0.0 }
 0x5e5   : > { %1755 = vadd.xlane.f32.xlu2 %v1754_v38 }
 0x658   : > { %v1756_v41 = vpop.xlane.xlu2 %1755 }
 0x659   : > { %v1757_v42 = vmul.f32 %v1756_v41, %v3323_v10 }
 0x65b   : > { %v1758_v44 = vadd.f32 1e-06, %v1757_v42 }
 0x65d   : > { %2476 = vrsqrt.f32 %v1758_v44  ;;  %vm1765_vm15 = vweird.f32 %v1758_v44 }
 0x663   : > { %v2477_v46 = vpop.eup %2476 }
 0x664   : > { %v1760_v47 = vmul.f32 %v2477_v46, %v1758_v44  ;;  %vm1766_vm14 = vweird.f32 %v2477_v46 }
 0x665   : > { %vm1767_vm1 = vmor %vm1765_vm15, %vm1766_vm14 }
 0x666   : > { %v1761_v48 = vmul.f32 %v2477_v46, %v1760_v47 }
 0x668   : > { %v1762_v49 = vmul.f32 0.5, %v1761_v48 }
 0x66a   : > { %v1763_v50 = vsub.f32 1.5, %v1762_v49 }
 0x66c   : > { %v1764_v51 = vmul.f32 %v2477_v46, %v1763_v50 }
 0x66e   : > { %v1768_v53 = vsel %vm1767_vm1, %v2477_v46, %v1764_v51 }
 0x66f   : > { %v1769_v10 = vmul.f32 %v1768_v53, %v1752_v36 }
 0x671   : > { %v1773_v55 = vmul.f32 %v2450_v52, %v1769_v10 }
 0x673   : > { %v1777_v56 = vadd.f32 %v2451_v54, %v1773_v55 }
 0x675   : > { %v1778_v57 = vpack.c.bf16 %v1777_v56, %v1777_v56 }
 0x677   : > { %2198 = vmatmul.msk.bf16.vlgmr.msrb.gmra.mxu3 %vm867_vm0, %v1778_v57 }
 0x6fa   : > { %v1811_v61 = vpop.f32.mrf.mxu3 }
 0x6fb   : > { %v1812_v62 = vadd.f32 %v2452_v60, %v1811_v61 }
 0x6fd   : > { %v1815_v63 = vmax.f32 %v1812_v62, 0.0 }
 0x6ff   : > { %v1816_v1 = vpack.c.bf16 %v1815_v63, %v1815_v63 }
 0x701   : > { %2215 = vmatmul.msk.bf16.vlgmr.msrb.gmra.mxu0 %vm1853_vm2, %v1816_v1 }
 0x702   : > { %v1813_v2 = vpop.f32.mrf.mxu3 }
 0x77e   : > { %v1866_v4 = vpop.f32.mrf.mxu0 }
 0x77f   : > { %v1867_v5 = vadd.f32 %v2453_v3, %v1866_v4 }
 0x781   : > { %v1870_v6 = vadd.f32 %v1867_v5, %v1745_v31 }
 0x783   : > { %1871 = vst.msk [vmem:[%s847_s3] sm:$0xff] %vm867_vm0, %v1870_v6 }
 0x784   : > { %2925 = shalt.err (!%p2922_p9)
}
 0x785   : > { %2290 = dma.vmem_to_hbm [thread:$0]  (%p3175_p4), %s1887_s26, 128, %s1889_s5, %s1873_s21  }
 0x786   : > { %v1868_v7 = vpop.f32.mrf.mxu0 }
 0x787 PF: > { %s3620_s0 = sld [smem:[#allocation40_spill]] }
 0x788   : > { %s3621_s27 = sld [smem:[#allocation37_spill]] }
 0x78d   : > { %p2367_p10 = scmp.ge.s32.totalorder %s3620_s0, 2 }
 0x78e   : > { %s1900_s24 = sand.u32 1, %s3621_s27  }
 0x78f   : > { %p2336_p11 = pnand %p2367_p10, %p3182_p8  ;;  %s1901_s28 = scalar_lea.sflag [#allocation6], %s1900_s24 }
 0x791   : > { %p2337_p12 = pneg %p2336_p11 }
 0x793   : > { %2983 = dma.done.wait (%p2337_p12), %s1901_s28, 128  }
 0x794   : > { %2985 = vsyncadd (%p2337_p12), %s1901_s28, 4294967168  ;;  %s40_s22 = sadd.s32 1, %s3620_s0   ;;  %s3623_s2 = sld [smem:[#allocation38_spill]] }
 0x795   : > { %p37_p13 = scmp.ge.s32.totalorder %s40_s22, 4   ;;  %s3624_s20 = sld [smem:[#allocation44_spill]] }
 0x796   : > { %s3625_s21 = sld [smem:[#allocation39_spill]]  ;;  %s3627_s0 = smov %s2992_s30 }
 0x797   : > { %s3626_s1 = sld [smem:[#allocation41_spill]]  ;;  %39 = sbr.rel (!%p37_p13) target bundleno = 22 (0x16), region = 196 }
 0x79a   : > { %s3628_s30 = smov %s3623_s2 }
 0x79c   :  { %1907 = vsyncpa [#allocation5], 1 }
 0x79d   :  { %1909 = vsyncpa [#allocation5 + $0x1], 1 }
 0x79e   :  { %1910 = vsyncpa [#allocation8], 1 }
 0x79f   :  { %1911 = vsyncpa [#allocation11], 1 }
 0x7a0   :  { %1912 = vsyncpa [#allocation14], 1 }
 0x7a1   :  { %1913 = vsyncpa [#allocation17], 1 }
 0x7a2   :  { %1914 = vsyncpa [#allocation20], 1 }
 0x7a3   :  { %1915 = vsyncpa [#allocation23], 1 }
 0x7a4   :  { %1916 = vsyncpa [#allocation26], 1 }
 0x7a5   :  { %1917 = vsyncpa [#allocation6], 1 }
 0x7a6   :  { %1919 = vsyncpa [#allocation6 + $0x1], 1 }

// kernel: tpu_custom_call.1
= control target key start
LH: loop header
LB: loop body
LE: loop exit
PB: predicated region body
PF: predicated region fallthrough
CT: control target
= control target key end

     0   :  { %s3558_s0 = inlined_call_operand.vmem [shape: f32[2,8,32], index: 0, kind: input, shape index: {}]   ;;  %s3559_s1 = inlined_call_operand.vmem [shape: f32[2,8,32], index: 1, kind: input, shape index: {}]   ;;  %s3560_s2 = inlined_call_operand.hbm [shape: bf16[8,8], index: 2, kind: input, shape index: {}]   ;;  %s3561_s3 = inlined_call_operand.hbm [shape: f32[1,32], index: 3, kind: input, shape index: {}]   ;;  %s3562_s4 = inlined_call_operand.hbm [shape: f32[1,32], index: 4, kind: input, shape index: {}]   ;;  %s3563_s5 = inlined_call_operand.hbm [shape: f32[1,32], index: 5, kind: input, shape index: {}]   ;;  %s3564_s6 = inlined_call_operand.hbm [shape: f32[1,32], index: 6, kind: input, shape index: {}]   ;;  %s3565_s7 = inlined_call_operand.vmem [shape: bf16[32,32], index: 7, kind: input, shape index: {}]   ;;  %s3566_s8 = inlined_call_operand.hbm [shape: f32[1,32], index: 8, kind: input, shape index: {}]   ;;  %s3567_s9 = inlined_call_operand.hbm [shape: bf16[32,32], index: 9, kind: input, shape index: {}]   ;;  %s3568_s10 = inlined_call_operand.hbm [shape: f32[1,32], index: 10, kind: input, shape index: {}]   ;;  %s3569_s11 = inlined_call_operand.hbm [shape: bf16[32,32], index: 11, kind: input, shape index: {}]   ;;  %s3570_s12 = inlined_call_operand.hbm [shape: f32[1,32], index: 12, kind: input, shape index: {}]   ;;  %s3571_s13 = inlined_call_operand.hbm [shape: bf16[32,32], index: 13, kind: input, shape index: {}]   ;;  %s3572_s14 = inlined_call_operand.hbm [shape: f32[1,32], index: 14, kind: input, shape index: {}]   ;;  %s3573_s15 = inlined_call_operand.hbm [shape: bf16[32,64], index: 15, kind: input, shape index: {}]   ;;  %s3574_s16 = inlined_call_operand.hbm [shape: f32[1,64], index: 16, kind: input, shape index: {}]   ;;  %s3575_s17 = inlined_call_operand.vmem [shape: bf16[64,32], index: 17, kind: input, shape index: {}]   ;;  %s3576_s18 = inlined_call_operand.vmem [shape: f32[1,32], index: 18, kind: input, shape index: {}]   ;;  %s3577_s19 = inlined_call_operand.hbm [shape: f32[2,8,32], index: 19, kind: output, shape index: {}]  }
   0x1   :  { %3588 = sst [smem:[#allocation45_spill]] %s3558_s0 }
   0x2   :  { %3589 = sst [smem:[#allocation46_spill]] %s3559_s1 }
   0x3   :  { %3590 = sst [smem:[#allocation47_spill]] %s3560_s2 }
   0x4   :  { %3591 = sst [smem:[#allocation48_spill]] %s3561_s3 }
   0x5   :  { %3592 = sst [smem:[#allocation49_spill]] %s3562_s4 }
   0x6   :  { %3593 = sst [smem:[#allocation50_spill]] %s3563_s5 }
   0x7   :  { %3594 = sst [smem:[#allocation51_spill]] %s3566_s8 }
   0x8   :  { %3595 = sst [smem:[#allocation52_spill]] %s3576_s18 }
   0x9   :  { %3596 = sst [smem:[#allocation53_spill]] %s3577_s19 }
   0xa   :  { %24 = vsyncpa [#allocation5], 0 }
   0xb   :  { %25 = vsyncpa [#allocation8], 0 }
   0xc   :  { %26 = vsyncpa [#allocation11], 0 }
   0xd   :  { %27 = vsyncpa [#allocation14], 0 }
   0xe   :  { %28 = vsyncpa [#allocation17], 0 }
   0xf   :  { %29 = vsyncpa [#allocation20], 0 }
  0x10   :  { %30 = vsyncpa [#allocation23], 0 }
  0x11   :  { %31 = vsyncpa [#allocation26], 0 }
  0x12   :  { %32 = vsyncpa [#allocation6], 0 }
  0x13   :  { %34 = vsyncpa [#allocation6 + $0x1], 0  ;;  %s3135_s0 = smov 0   ;;  %s3137_s30 = smov 0  }
  0x14   :  { %s3139_s20 = smov 0   ;;  %s3141_s21 = smov 0  }
  0x15   :  { %s3143_s1 = smov 0   ;;  %s3145_s22 = smov 0  }
  0x16 LB: > { %3597 = sst [smem:[#allocation37_spill]] %s2988_s0  ;;  %s2110_s2 = sadd.s32 4294967295, %s3008_s22   ;;  %s3008_s22 = sphi %s3145_s22, %s40_s22   ;;  %s3004_s1 = sphi %s3143_s1, %s3626_s1   ;;  %s3000_s21 = sphi %s3141_s21, %s3625_s21   ;;  %s2996_s20 = sphi %s3139_s20, %s3624_s20   ;;  %s2992_s30 = sphi %s3137_s30, %s3628_s30   ;;  %s2988_s0 = sphi %s3135_s0, %s3627_s0  }
  0x17   : > { %3598 = sst [smem:[#allocation38_spill]] %s2996_s20  ;;  %s2111_s23 = sadd.s32 4294967294, %s3008_s22  }
  0x18   : > { %3599 = sst [smem:[#allocation39_spill]] %s3004_s1  ;;  %s52_s24 = sadd.s32 1, %s3004_s1 }
  0x19   : > { %3600 = sst [smem:[#allocation40_spill]] %s3008_s22  ;;  %s477_s25 = sadd.s32 1, %s2996_s20 }
  0x1a   : > { %p54_p0 = scmp.ge.s32.totalorder %s52_s24, 2  ;;  %p487_p1 = scmp.ne.s32.totalorder %s2996_s20, %s2992_s30 }
  0x1b   : > { %p488_p2 = scmp.eq.s32.totalorder %s2110_s2, 1  ;;  %p493_p3 = scmp.ne.s32.totalorder %s2992_s30, %s2988_s0 }
  0x1c   : > { %s3630_s24 = smov (%p54_p0, %s52_s24), 0  ;;  %p494_p5 = scmp.eq.s32.totalorder %s2111_s23, 1 }
  0x1d   : > { %3601 = sst [smem:[#allocation41_spill]] %s3630_s24  ;;  %p3175_p4 = por %p488_p2, %p487_p1 }
  0x1e   : > { %s472_s26 = ssub.s32 %s3004_s1, %s3630_s24  ;;  %p2112_p6 = scmp.ge.s32.totalorder %s3008_s22, 1 }
  0x1f   : > { %s3602_s3 = scalar_select %p3175_p4, 1, 0 }
  0x20   : > { %p475_p7 = scmp.eq.s32.totalorder %s472_s26, 0  ;;  %p3182_p8 = por %p494_p5, %p493_p3 }
  0x21   : > { %3603 = sst [smem:[#allocation42_spill]] %s3602_s3  ;;  %p501_p9 = scmp.lt.s32.totalorder %s3008_s22, 3 }
  0x22   : > { %s3604_s27 = scalar_select %p3182_p8, 1, 0 }
  0x23   : > { %s3188_s28 = scalar_select %p475_p7, %s2996_s20, %s477_s25  }
  0x24   : > { %3605 = sst [smem:[#allocation43_spill]] %s3604_s27  ;;  %p3190_p10 = pnand %p2112_p6, %p501_p9 }
  0x25   : > { %3606 = sst [smem:[#allocation44_spill]] %s3188_s28  ;;  %p3194_p11 = scmp.eq.s32.totalorder %s2110_s2, 0 }
  0x26   : > { %s3609_s1 = sld [smem:[#allocation48_spill]]  ;;  %p2292_p12 = pneg %p3190_p10 }
  0x27   : > { %s3010_s27 = smov [#allocation7]   ;;  %s3610_s5 = sld [smem:[#allocation50_spill]] }
  0x28   : > { %s529_s25 = sshll.u32 %s3010_s27, 4  ;;  %p3208_p13 = pnand %p3194_p11, %p2292_p12  ;;  %s530_s25 = int_to_ptr.vmem [resolvable:$true] %s529_s25 }
  0x29   : > { %s3612_s8 = sld [smem:[#allocation51_spill]]  ;;  %s3012_s28 = smov [#allocation13]  }
  0x2a   : > { %s604_s18 = sshll.u32 %s3568_s10, 4  ;;  %s3013_s27 = smov [#allocation16]   ;;  %s605_s18 = int_to_ptr.hbm [resolvable:$true] %s604_s18 }
  0x2b   : > { %s606_s23 = sshll.u32 %s3013_s27, 4  ;;  %s3613_s27 = sld [smem:[#allocation47_spill]]  ;;  %s607_s23 = int_to_ptr.vmem [resolvable:$true] %s606_s23 }
  0x2c   : > { %s527_s26 = sshll.u32 %s3609_s1, 4  ;;  %s3011_s1 = smov [#allocation10]   ;;  %s528_s26 = int_to_ptr.hbm [resolvable:$true] %s527_s26 }
  0x2d   : > { %s551_s22 = sshll.u32 %s3610_s5, 4  ;;  %s553_s24 = sshll.u32 %s3011_s1, 4  ;;  %s552_s22 = int_to_ptr.hbm [resolvable:$true] %s551_s22  ;;  %s554_s24 = int_to_ptr.vmem [resolvable:$true] %s553_s24 }
  0x2e   : > { %2298 = dma.hbm_to_vmem [thread:$0]  (!%p3208_p13), %s528_s26, 16, %s530_s25, [#allocation8]  }
  0x2f   : > { %s578_s20 = sshll.u32 %s3612_s8, 4  ;;  %s580_s5 = sshll.u32 %s3012_s28, 4  ;;  %s579_s20 = int_to_ptr.hbm [resolvable:$true] %s578_s20  ;;  %s581_s5 = int_to_ptr.vmem [resolvable:$true] %s580_s5 }
  0x30   : > { %2304 = dma.hbm_to_vmem [thread:$0]  (!%p3208_p13), %s552_s22, 16, %s554_s24, [#allocation11]  }
  0x31   : > { %2310 = dma.hbm_to_vmem [thread:$0]  (!%p3208_p13), %s579_s20, 16, %s581_s5, [#allocation14]  }
  0x32   : > { %s630_s1 = sshll.u32 %s3570_s12, 4  ;;  %s3014_s22 = smov [#allocation19]   ;;  %s631_s1 = int_to_ptr.hbm [resolvable:$true] %s630_s1 }
  0x33   : > { %2316 = dma.hbm_to_vmem [thread:$0]  (!%p3208_p13), %s605_s18, 16, %s607_s23, [#allocation17]  }
  0x34   : > { %s632_s24 = sshll.u32 %s3014_s22, 4  ;;  %s656_s28 = sshll.u32 %s3572_s14, 4  ;;  %s633_s24 = int_to_ptr.vmem [resolvable:$true] %s632_s24  ;;  %s657_s28 = int_to_ptr.hbm [resolvable:$true] %s656_s28 }
  0x35   : > { %2322 = dma.hbm_to_vmem [thread:$0]  (!%p3208_p13), %s631_s1, 16, %s633_s24, [#allocation20]  }
  0x36   : > { %s3015_s5 = smov [#allocation22]   ;;  %s515_s8 = sshll.u32 %s3613_s27, 4  ;;  %s516_s8 = int_to_ptr.hbm [resolvable:$true] %s515_s8 }
  0x37   : > { %s658_s20 = sshll.u32 %s3015_s5, 4  ;;  %s3016_s18 = smov [#allocation4]   ;;  %s659_s20 = int_to_ptr.vmem [resolvable:$true] %s658_s20 }
  0x38   : > { %2328 = dma.hbm_to_vmem [thread:$0]  (!%p3208_p13), %s657_s28, 16, %s659_s20, [#allocation23]  }
  0x39   : > { %s517_s23 = sshll.u32 %s3016_s18, 4  ;;  %s3614_s4 = sld [smem:[#allocation49_spill]]  ;;  %s518_s23 = int_to_ptr.vmem [resolvable:$true] %s517_s23 }
  0x3a   : > { %2295 = dma.hbm_to_vmem [thread:$0]  (!%p3208_p13), %s516_s8, 64, %s518_s23, [#allocation5]  }
  0x3b   : > { %s563_s5 = sshll.u32 %s3564_s6, 4  ;;  %s3017_s26 = smov [#allocation9]   ;;  %s564_s5 = int_to_ptr.hbm [resolvable:$true] %s563_s5 }
  0x3c   : > { %s541_s25 = sshll.u32 %s3017_s26, 4  ;;  %s3018_s28 = smov [#allocation12]   ;;  %s542_s25 = int_to_ptr.vmem [resolvable:$true] %s541_s25 }
  0x3d   : > { %s565_s20 = sshll.u32 %s3018_s28, 4  ;;  %s589_s22 = sshll.u32 %s3567_s9, 4  ;;  %s566_s20 = int_to_ptr.vmem [resolvable:$true] %s565_s20  ;;  %s590_s22 = int_to_ptr.hbm [resolvable:$true] %s589_s22 }
  0x3e   : > { %2307 = dma.hbm_to_vmem [thread:$0]  (!%p3208_p13), %s564_s5, 16, %s566_s20, [#allocation11]  }
  0x3f   : > { %s539_s3 = sshll.u32 %s3614_s4, 4  ;;  %s3019_s8 = smov [#allocation15]   ;;  %s540_s3 = int_to_ptr.hbm [resolvable:$true] %s539_s3 }
  0x40   : > { %2301 = dma.hbm_to_vmem [thread:$0]  (!%p3208_p13), %s540_s3, 16, %s542_s25, [#allocation8]  }
  0x41   : > { %s591_s23 = sshll.u32 %s3019_s8, 4  ;;  %s615_s24 = sshll.u32 %s3569_s11, 4  ;;  %s592_s23 = int_to_ptr.vmem [resolvable:$true] %s591_s23  ;;  %s616_s24 = int_to_ptr.hbm [resolvable:$true] %s615_s24 }
  0x42   : > { %s3020_s3 = smov 64   ;;  %s3021_s26 = smov 4  }
  0x43   : > { %2313 = dma.hbm_to_vmem [thread:$0]  (!%p3208_p13), %s590_s22, 256, %s592_s23, [#allocation14], %s3020_s3, %s3020_s3, %s3021_s26  }
  0x44   : > { %s3022_s25 = smov [#allocation18]   ;;  %s641_s5 = sshll.u32 %s3571_s13, 4  ;;  %s642_s5 = int_to_ptr.hbm [resolvable:$true] %s641_s5 }
  0x45   : > { %s617_s28 = sshll.u32 %s3022_s25, 4  ;;  %s667_s19 = sshll.u32 %s3573_s15, 4  ;;  %s618_s28 = int_to_ptr.vmem [resolvable:$true] %s617_s28  ;;  %s668_s19 = int_to_ptr.hbm [resolvable:$true] %s667_s19 }
  0x46   : > { %2319 = dma.hbm_to_vmem [thread:$0]  (!%p3208_p13), %s616_s24, 256, %s618_s28, [#allocation17], %s3020_s3, %s3020_s3, %s3021_s26  }
  0x47   : > { %s3023_s1 = smov [#allocation21]   ;;  %s3024_s22 = smov [#allocation24]  }
  0x48   : > { %s643_s4 = sshll.u32 %s3023_s1, 4  ;;  %s669_s23 = sshll.u32 %s3024_s22, 4  ;;  %s644_s4 = int_to_ptr.vmem [resolvable:$true] %s643_s4  ;;  %s670_s23 = int_to_ptr.vmem [resolvable:$true] %s669_s23 }
  0x49   : > { %2325 = dma.hbm_to_vmem [thread:$0]  (!%p3208_p13), %s642_s5, 256, %s644_s4, [#allocation20], %s3020_s3, %s3020_s3, %s3021_s26  }
  0x4a   : > { %s682_s18 = sshll.u32 %s3574_s16, 4  ;;  %s3025_s24 = smov [#allocation25]   ;;  %s683_s18 = int_to_ptr.hbm [resolvable:$true] %s682_s18 }
  0x4b   : > { %2331 = dma.hbm_to_vmem [thread:$0]  (!%p3208_p13), %s668_s19, 256, %s670_s23, [#allocation23], %s3020_s3, %s3020_s3, %s3021_s26  }
  0x4c   : > { %s684_s28 = sshll.u32 %s3025_s24, 4  ;;  %720 = sbr.rel (%p3190_p10) target bundleno = 1927 (0x787), region = 96  ;;  %s685_s28 = int_to_ptr.vmem [resolvable:$true] %s684_s28 }
  0x4d   : > { %2334 = dma.hbm_to_vmem [thread:$0]  (!%p3208_p13), %s683_s18, 16, %s685_s28, [#allocation26]  }
  0x51   : > { %2951 = dma.done.wait (%p3194_p11), [#allocation5], 64  }
  0x52   : > { %2953 = vsyncadd (%p3194_p11), [#allocation5], 4294967232 }
  0x53   : > { %2955 = dma.done.wait (%p3194_p11), [#allocation8], 32  }
  0x54   : > { %2957 = vsyncadd (%p3194_p11), [#allocation8], 4294967264 }
  0x55   : > { %2959 = dma.done.wait (%p3194_p11), [#allocation11], 32  }
  0x56   : > { %2961 = vsyncadd (%p3194_p11), [#allocation11], 4294967264 }
  0x57   : > { %2963 = dma.done.wait (%p3194_p11), [#allocation14], 272  }
  0x58   : > { %2965 = vsyncadd (%p3194_p11), [#allocation14], 4294967024 }
  0x59   : > { %2967 = dma.done.wait (%p3194_p11), [#allocation17], 272  }
  0x5a   : > { %2969 = vsyncadd (%p3194_p11), [#allocation17], 4294967024 }
  0x5b   : > { %2971 = dma.done.wait (%p3194_p11), [#allocation20], 272  }
  0x5c   : > { %2973 = vsyncadd (%p3194_p11), [#allocation20], 4294967024 }
  0x5d   : > { %2975 = dma.done.wait (%p3194_p11), [#allocation23], 272  }
  0x5e   : > { %2977 = vsyncadd (%p3194_p11), [#allocation23], 4294967024 }
  0x5f   : > { %2979 = dma.done.wait (%p3194_p11), [#allocation26], 16  }
  0x60   : > { %2981 = vsyncadd (%p3194_p11), [#allocation26], 4294967280  ;;  %p848_p0 = scmp.lt.s32.totalorder %s3000_s21, 1  ;;  %s3615_s26 = sld [smem:[#allocation46_spill]]  ;;  %vm867_vm0 = vcmask 261120   ;;  %v3026_v4 = vmov 32.0  }
  0x61   : > { %s3616_s19 = sld [smem:[#allocation45_spill]]  ;;  %2454 = vrcp.f32 %v3026_v4  ;;  %v2225_v21 = vld [vmem:[%s3565_s7 + $0x8] sm:$0xff]  ;;  %v2224_v22 = vld [vmem:[%s3565_s7] sm:$0xff]  ;;  %v2221_v23 = vld [vmem:[#allocation15 + $0x8] sm:$0xff]  ;;  %s3027_s27 = smov 120   ;;  %vm1027_vm8 = vcmask 1047556  }
  0x62   : > { %s849_s4 = scalar_select %p848_p0, %s3000_s21, 1  ;;  %1216 = vmatpush.bf16.msra.mxu2 %v2225_v21  ;;  %v2223_v24 = vld [vmem:[#allocation18 + $0x8] sm:$0xff]  ;;  %935 = vmatpush.bf16.msra.mxu0 %v2221_v23  ;;  %v2222_v27 = vld [vmem:[#allocation18] sm:$0xff]  ;;  %v2447_v60 = vld [vmem:[#allocation16] ss:$0 sm:$0xff]  ;;  %vm1011_vm9 = vcmask 60416  }
  0x63   : > { %968 = vmatpush.bf16.msra.mxu1 %v2223_v24  ;;  %v2220_v26 = vld [vmem:[#allocation15] sm:$0xff]  ;;  %v2442_v41 = vld [vmem:[#allocation7] ss:$0 sm:$0xff]  ;;  %v2443_v45 = vld [vmem:[#allocation9] ss:$0 sm:$0xff]  ;;  %s3028_s18 = smov 104  }
  0x64   : > { %s2144_s29 = sshll.u32 %s849_s4, 3  ;;  %v2444_v52 = vld [vmem:[#allocation7] ss:$0 sm:$0xff]  ;;  %v2445_v55 = vld [vmem:[#allocation9] ss:$0 sm:$0xff]  ;;  %s3029_s24 = smov 112  }
  0x65   : > { %v2446_v59 = vld [vmem:[#allocation13] ss:$0 sm:$0xff]  ;;  %vm1359_vm10 = vcmask 1043456   ;;  %vm1355_vm11 = vcmask 64512   ;;  %s3032_s28 = smov 16   ;;  %s3033_s4 = smov 8  }
  0x66   : > { %s858_s5 = scalar_lea.vmem %s3615_s26, %s2144_s29  ;;  %1217 = vmatpush.bf16.msra.mxu2 %v2224_v22  ;;  %936 = vmatpush.bf16.msra.mxu0 %v2220_v26  ;;  %vm1704_vm12 = vcmask 130048   ;;  %vm1706_vm13 = vcmask 195584   ;;  %s845_s0 = sand.u32 1, %s2992_s30  }
  0x67   : > { %v3315_v0 = vld [vmem:[%s858_s5] sm:$0xff]  ;;  %s851_s1 = scalar_lea.vmem %s3616_s19, %s2144_s29  ;;  %v2455_v5 = vpop.eup %2454  ;;  %969 = vmatpush.bf16.msra.mxu1 %v2222_v27  ;;  %s3034_s29 = smov 24  }
  0x68   : > { %v1149_v1 = vsel %vm867_vm0, %v3315_v0, 0.0  ;;  %v864_v2 = vld [vmem:[%s851_s1] sm:$0xff]  ;;  %v872_v6 = vmul.f32 32.0, %v2455_v5  ;;  %vm876_vm1 = vweird.f32 %v2455_v5  ;;  %s2143_s22 = sshll.u32 %s845_s0, 3  ;;  %s2217_s23 = sshll.u32 %s3000_s21, 3 }
  0x69   : > { %1150 = vadd.xlane.f32.xlu0 %v1149_v1  ;;  %v868_v3 = vsel %vm867_vm0, %v864_v2, 0.0  ;;  %s847_s3 = scalar_lea.vmem [#allocation27], %s2143_s22  ;;  %s1873_s21 = scalar_lea.sflag [#allocation6], %s845_s0 }
  0x6a   : > { %v873_v7 = vsub.f32 1.0, %v872_v6  ;;  %s1886_s26 = sshll.u32 %s847_s3, 4  ;;  %s1887_s26 = int_to_ptr.vmem [resolvable:$true] %s1886_s26 }
  0x6c   : > { %v874_v8 = vmul.f32 %v2455_v5, %v873_v7  ;;  %v2448_v7 = vld [vmem:[#allocation19] ss:$0 sm:$0xff] }
  0x6e   : > { %v875_v9 = vadd.f32 %v2455_v5, %v874_v8 }
  0x70   : > { %v3323_v10 = vsel %vm876_vm1, %v2455_v5, %v875_v9 }
  0x71   : > { %869 = vadd.xlane.f32.xlu0 %v868_v3 }
  0xdc   : > { %v1151_v11 = vpop.xlane.xlu0 %1150 }
  0xdd   : > { %v1159_v12 = vmul.f32 %v1151_v11, %v3323_v10 }
  0xdf   : > { %v1160_v13 = vsub.f32 %v3315_v0, %v1159_v12 }
  0xe1   : > { %v1161_v14 = vmul.f32 %v1160_v13, %v1160_v13 }
  0xe3   : > { %v1162_v15 = vsel %vm867_vm0, %v1161_v14, 0.0 }
  0xe4   : > { %1163 = vadd.xlane.f32.xlu1 %v1162_v15  ;;  %v870_v16 = vpop.xlane.xlu0 %869  ;;  %v3030_v15 = vmov 1983009808  }
  0xe5   : > { %v878_v17 = vmul.f32 %v3323_v10, %v870_v16  ;;  %v1032_v16 = vunpack.c.l.s4 %v3030_v15 }
  0xe7   : > { %v879_v18 = vsub.f32 %v864_v2, %v878_v17  ;;  %v3342_v21 = vunpack.c.0.s8 %v1032_v16 }
  0xe9   : > { %v880_v19 = vmul.f32 %v879_v18, %v879_v18 }
  0xeb   : > { %v881_v20 = vsel %vm867_vm0, %v880_v19, 0.0 }
  0xec   : > { %882 = vadd.xlane.f32.xlu1 %v881_v20 }
 0x157   : > { %v1164_v25 = vpop.xlane.xlu1 %1163 }
 0x158   : > { %v1165_v28 = vmul.f32 %v1164_v25, %v3323_v10 }
 0x15a   : > { %v1166_v29 = vadd.f32 1e-06, %v1165_v28 }
 0x15c   : > { %2456 = vrsqrt.f32 %v1166_v29  ;;  %vm1173_vm3 = vweird.f32 %v1166_v29 }
 0x15f   : > { %v883_v30 = vpop.xlane.xlu1 %882 }
 0x160   : > { %v884_v31 = vmul.f32 %v883_v30, %v3323_v10  ;;  %v3031_v30 = vmov 1934713408  }
 0x162   : > { %v2457_v32 = vpop.eup %2456  ;;  %v885_v33 = vadd.f32 1e-06, %v884_v31  ;;  %v1056_v31 = vunpack.c.l.s4 %v3031_v30 }
 0x163   : > { %v1168_v34 = vmul.f32 %v2457_v32, %v1166_v29  ;;  %vm1174_vm2 = vweird.f32 %v2457_v32 }
 0x164   : > { %2458 = vrsqrt.f32 %v885_v33  ;;  %vm1175_vm4 = vmor %vm1173_vm3, %vm1174_vm2  ;;  %vm892_vm6 = vweird.f32 %v885_v33  ;;  %vm1853_vm2 = vcmask 523264  }
 0x165   : > { %v1169_v35 = vmul.f32 %v2457_v32, %v1168_v34 }
 0x167   : > { %v1170_v36 = vmul.f32 0.5, %v1169_v35 }
 0x169   : > { %v1171_v37 = vsub.f32 1.5, %v1170_v36 }
 0x16a   : > { %v2459_v38 = vpop.eup %2458 }
 0x16b   : > { %v1172_v39 = vmul.f32 %v2457_v32, %v1171_v37  ;;  %v887_v40 = vmul.f32 %v2459_v38, %v885_v33  ;;  %vm893_vm5 = vweird.f32 %v2459_v38 }
 0x16c   : > { %vm894_vm7 = vmor %vm892_vm6, %vm893_vm5 }
 0x16d   : > { %v1176_v42 = vsel %vm1175_vm4, %v2457_v32, %v1172_v39  ;;  %v888_v43 = vmul.f32 %v2459_v38, %v887_v40 }
 0x16e   : > { %v1177_v44 = vmul.f32 %v1176_v42, %v1160_v13 }
 0x16f   : > { %v889_v46 = vmul.f32 0.5, %v888_v43 }
 0x170   : > { %v1181_v47 = vmul.f32 %v2442_v41, %v1177_v44 }
 0x171   : > { %v890_v48 = vsub.f32 1.5, %v889_v46 }
 0x172   : > { %v1185_v49 = vadd.f32 %v2443_v45, %v1181_v47  ;;  %v3357_v45 = vunpack.c.0.s8 %v1056_v31 }
 0x173   : > { %v891_v50 = vmul.f32 %v2459_v38, %v890_v48 }
 0x174   : > { %v1186_v51 = vpack.c.bf16 %v1185_v49, %v1185_v49 }
 0x175   : > { %v895_v53 = vsel %vm894_vm7, %v2459_v38, %v891_v50 }
 0x176   : > { %2172 = vmatmul.msk.bf16.vlgmr.msra.gmra.mxu2 %vm867_vm0, %v1186_v51  ;;  %v896_v54 = vmul.f32 %v895_v53, %v879_v18 }
 0x178   : > { %v900_v56 = vmul.f32 %v2444_v52, %v896_v54 }
 0x17a   : > { %v904_v57 = vadd.f32 %v2445_v55, %v900_v56 }
 0x17c   : > { %v905_v58 = vpack.c.bf16 %v904_v57, %v904_v57 }
 0x17e   : > { %2154 = vmatmul.msk.bf16.vlgmr.msra.gmra.mxu0 %vm867_vm0, %v905_v58  ;;  %2163 = vmatmul.msk.bf16.vlgmr.msra.gmra.mxu1 %vm867_vm0, %v905_v58 }
 0x1f9   : > { %v1219_v61 = vpop.f32.mrf.mxu2 }
 0x1fa   : > { %v1220_v62 = vadd.f32 %v2446_v59, %v1219_v61 }
 0x1fb   : > { %v938_v63 = vpop.f32.mrf.mxu0  ;;  %v971_v1 = vpop.f32.mrf.mxu1 }
 0x1fc   : > { %v1223_v2 = vmul.f32 0.35355338, %v1220_v62  ;;  %v939_v3 = vadd.f32 %v2447_v60, %v938_v63  ;;  %v972_v8 = vadd.f32 %v2448_v7, %v971_v1 }
 0x1fe   : > { %1225 = vrot.lane.b32.xlu2 %v1223_v2, %s3027_s27  ;;  %1231 = vrot.lane.b32.xlu0 %v1223_v2, %s3028_s18  ;;  %v1029_v17 = vrot.slane %v972_v8, 4  ;;  %v1237_v22 = vrot.slane %v1223_v2, 4 }
 0x1ff   : > { %975 = vxpose.xlu1.b32.start.end [1/1] (short) (narrow) %v939_v3, 32 }
 0x201   : > { %v1221_v4 = vpop.f32.mrf.mxu2 }
 0x203   : > { %v940_v5 = vpop.f32.mrf.mxu0  ;;  %v973_v6 = vpop.f32.mrf.mxu1 }
 0x206   : > { %1228 = vrot.lane.b32.xlu2 %v1223_v2, %s3029_s24 }
 0x20e   : > { %1017 = vrot.lane.b32.xlu2 %v972_v8, %s3027_s27 }
 0x216   : > { %1020 = vrot.lane.b32.xlu2 %v972_v8, %s3029_s24 }
 0x21e   : > { %1023 = vrot.lane.b32.xlu2 %v972_v8, %s3028_s18  ;;  %s3617_s18 = sld [smem:[#allocation52_spill]] }
 0x258   : > { %v1226_v9 = vpop.permute.xlu2 %1225 }
 0x259   : > { %v1249_v27 = vrot.slane %v1226_v9, 4 }
 0x260   : > { %v1229_v11 = vpop.permute.xlu2 %1228 }
 0x261   : > { %v1234_v19 = vrot.slane %v1229_v11, 4  ;;  %v1238_v28 = vsel %vm1027_vm8, %v1229_v11, %v1237_v22 }
 0x262   : > { %v1246_v37 = vperm.slane %v1238_v28, %v3342_v21 }
 0x263   : > { %v1236_v32 = vsel %vm1027_vm8, %v1234_v19, %v1223_v2 }
 0x264   : > { %v1242_v40 = vperm.slane %v1236_v32, %v3342_v21  ;;  %v1273_v54 = vrot.slane %v1246_v37, 4 }
 0x266   : > { %v1261_v53 = vrot.slane %v1242_v40, 4 }
 0x268   : > { %v1018_v12 = vpop.permute.xlu2 %1017 }
 0x269   : > { %v1041_v24 = vrot.slane %v1018_v12, 4 }
 0x270   : > { %v1021_v13 = vpop.permute.xlu2 %1020  ;;  %v1232_v18 = vpop.permute.xlu0 %1231 }
 0x271   : > { %v1026_v14 = vrot.slane %v1021_v13, 4  ;;  %v1030_v23 = vsel %vm1027_vm8, %v1021_v13, %v1029_v17  ;;  %v1247_v25 = vrot.slane %v1232_v18, 4  ;;  %v1250_v36 = vsel %vm1027_vm8, %v1232_v18, %v1249_v27 }
 0x272   : > { %v1038_v33 = vperm.slane %v1030_v23, %v3342_v21  ;;  %v1258_v46 = vperm.slane %v1250_v36, %v3342_v21 }
 0x273   : > { %v1028_v20 = vsel %vm1027_vm8, %v1026_v14, %v972_v8  ;;  %v1248_v38 = vsel %vm1027_vm8, %v1247_v25, %v1226_v9 }
 0x274   : > { %v1034_v29 = vperm.slane %v1028_v20, %v3342_v21  ;;  %v1065_v44 = vrot.slane %v1038_v33, 4  ;;  %v1254_v47 = vperm.slane %v1248_v38, %v3342_v21  ;;  %v1271_v57 = vrot.slane %v1258_v46, 4 }
 0x275   : > { %v1274_v62 = vsel %vm1027_vm8, %v1258_v46, %v1273_v54 }
 0x276   : > { %v1053_v41 = vrot.slane %v1034_v29, 4  ;;  %v1259_v61 = vrot.slane %v1254_v47, 4  ;;  %v1262_v2 = vsel %vm1027_vm8, %v1254_v47, %v1261_v53  ;;  %v1272_v11 = vsel %vm1027_vm8, %v1271_v57, %v1246_v37 }
 0x277   : > { %v1282_v19 = vperm.slane %v1274_v62, %v3357_v45  ;;  %v1270_v25 = vperm.slane %v1262_v2, %v3357_v45 }
 0x278   : > { %v1024_v26 = vpop.permute.xlu2 %1023 }
 0x279   : > { %v1039_v34 = vrot.slane %v1024_v26, 4  ;;  %v1042_v35 = vsel %vm1027_vm8, %v1024_v26, %v1041_v24  ;;  %v1278_v26 = vperm.slane %v1272_v11, %v3357_v45 }
 0x27a   : > { %v1050_v43 = vperm.slane %v1042_v35, %v3342_v21 }
 0x27b   : > { %v1040_v39 = vsel %vm1027_vm8, %v1039_v34, %v1018_v12 }
 0x27c   : > { %v1046_v42 = vperm.slane %v1040_v39, %v3342_v21  ;;  %v1063_v51 = vrot.slane %v1050_v43, 4  ;;  %v1066_v52 = vsel %vm1027_vm8, %v1050_v43, %v1065_v44  ;;  %v1287_v43 = vrot.slane %v1278_v26, 4 }
 0x27d   : > { %v1074_v56 = vperm.slane %v1066_v52, %v3357_v45 }
 0x27e   : > { %v1051_v48 = vrot.slane %v1046_v42, 4  ;;  %v1054_v49 = vsel %vm1027_vm8, %v1046_v42, %v1053_v41  ;;  %v1064_v59 = vsel %vm1027_vm8, %v1063_v51, %v1038_v33  ;;  %v1289_v33 = vrot.slane %v1282_v19, 4 }
 0x27f   : > { %v1062_v50 = vperm.slane %v1054_v49, %v3357_v45  ;;  %v1070_v63 = vperm.slane %v1064_v59, %v3357_v45  ;;  %v1081_v1 = vrot.slane %v1074_v56, 4  ;;  %v1285_v42 = vrot.slane %v1270_v25, 4 }
 0x280   : > { %v1052_v55 = vsel %vm1027_vm8, %v1051_v48, %v1034_v29  ;;  %v1260_v29 = vsel %vm1027_vm8, %v1259_v61, %v1242_v40  ;;  %v1290_v47 = vsel %vm1027_vm8, 0.0, %v1289_v33  ;;  %v1288_v59 = vsel %vm1027_vm8, 0.0, %v1287_v43 }
 0x281   : > { %v1058_v58 = vperm.slane %v1052_v55, %v3357_v45  ;;  %v1077_v60 = vrot.slane %v1062_v50, 4  ;;  %v1079_v6 = vrot.slane %v1070_v63, 4  ;;  %v1082_v7 = vsel %vm1027_vm8, 0.0, %v1081_v1 }
 0x282   : > { %v1094_v13 = vsel %vm1027_vm8, %v1081_v1, %v1070_v63  ;;  %v1099_v14 = vrot.slane %v1082_v7, 4  ;;  %v1266_v39 = vperm.slane %v1260_v29, %v3357_v45  ;;  %v1307_v55 = vrot.slane %v1290_v47, 4 }
 0x283   : > { %v1075_v3 = vrot.slane %v1058_v58, 4  ;;  %v1078_v4 = vsel %vm1027_vm8, 0.0, %v1077_v60  ;;  %v1083_v5 = vsel %vm1027_vm8, %v1077_v60, %v1058_v58  ;;  %v1080_v15 = vsel %vm1027_vm8, 0.0, %v1079_v6 }
 0x284   : > { %v1087_v8 = vperm.slane %v1083_v5, %v3342_v21  ;;  %v1088_v9 = vrot.slane %v1078_v4, 4  ;;  %v1098_v17 = vperm.slane %v1094_v13, %v3342_v21  ;;  %v1100_v22 = vsel %vm1027_vm8, %v1099_v14, %v1080_v15 }
 0x285   : > { %v1076_v12 = vsel %vm1027_vm8, 0.0, %v1075_v3  ;;  %v1104_v23 = vperm.slane %v1100_v22, %v3342_v21  ;;  %v1283_v57 = vrot.slane %v1266_v39, 4  ;;  %v1286_v58 = vsel %vm1027_vm8, 0.0, %v1285_v42 }
 0x286   : > { %v1089_v16 = vsel %vm1027_vm8, %v1088_v9, %v1076_v12  ;;  %v1107_v18 = vrot.slane %v1087_v8, 4  ;;  %v1119_v24 = vrot.slane %v1098_v17, 4  ;;  %v1296_v60 = vrot.slane %v1286_v58, 4  ;;  %v1353_v58 = vld [vmem:[#allocation4] sm:$0xf] }
 0x287   : > { %v1093_v20 = vperm.slane %v1089_v16, %v3342_v21  ;;  %v1117_v31 = vrot.slane %v1104_v23, 4  ;;  %v1308_v61 = vsel %vm1027_vm8, %v1307_v55, %v1288_v59  ;;  %v1284_v62 = vsel %vm1027_vm8, 0.0, %v1283_v57 }
 0x288   : > { %v1120_v32 = vsel %vm1027_vm8, %v1104_v23, %v1119_v24  ;;  %v1312_v63 = vperm.slane %v1308_v61, %v3342_v21  ;;  %v1297_v1 = vsel %vm1027_vm8, %v1296_v60, %v1284_v62  ;;  %v1302_v3 = vsel %vm1027_vm8, %v1289_v33, %v1278_v26 }
 0x289   : > { %v1105_v27 = vrot.slane %v1093_v20, 4  ;;  %v1108_v28 = vsel %vm1027_vm8, %v1093_v20, %v1107_v18  ;;  %v1128_v35 = vperm.slane %v1120_v32, %v3357_v45  ;;  %v1118_v37 = vsel %vm1027_vm8, %v1117_v31, %v1098_v17 }
 0x28a   : > { %v1116_v30 = vperm.slane %v1108_v28, %v3357_v45  ;;  %v1124_v40 = vperm.slane %v1118_v37, %v3357_v45  ;;  %v1301_v5 = vperm.slane %v1297_v1, %v3342_v21  ;;  %v1325_v6 = vrot.slane %v1312_v63, 4 }
 0x28b   : > { %v1106_v34 = vsel %vm1027_vm8, %v1105_v27, %v1087_v8  ;;  %v1133_v41 = vrot.slane %v1128_v35, 4  ;;  %v1306_v7 = vperm.slane %v1302_v3, %v3342_v21  ;;  %v1291_v8 = vsel %vm1027_vm8, %v1285_v42, %v1266_v39 }
 0x28c   : > { %v1112_v36 = vperm.slane %v1106_v34, %v3357_v45  ;;  %v1135_v38 = vrot.slane %v1116_v30, 4  ;;  %v1129_v48 = vrot.slane %v1124_v40, 4  ;;  %v1313_v9 = vrot.slane %v1301_v5, 4 }
 0x28d   : > { %v1134_v49 = vsel %vm1027_vm8, %v1133_v41, %v1116_v30  ;;  %v1326_v11 = vsel %vm1027_vm8, %v1325_v6, %v1306_v7  ;;  %v1295_v14 = vperm.slane %v1291_v8, %v3342_v21  ;;  %v1327_v24 = vrot.slane %v1306_v7, 4 }
 0x28e   : > { %v1131_v44 = vrot.slane %v1112_v36, 4  ;;  %v1136_v46 = vsel %vm1027_vm8, %v1128_v35, %v1135_v38  ;;  %v1139_v52 = vpack.c.bf16 %v1134_v49, %v1134_v49  ;;  %v1130_v53 = vsel %vm1027_vm8, %v1129_v48, %v1112_v36 }
 0x28f   : > { %v1140_v50 = vpack.c.bf16 %v1136_v46, %v1136_v46  ;;  %v1137_v56 = vpack.c.bf16 %v1130_v53, %v1130_v53  ;;  %v1332_v15 = vperm.slane %v1326_v11, %v3357_v45  ;;  %v1314_v16 = vsel %vm1027_vm8, %v1313_v9, %v1295_v14 }
 0x290   : > { %v1132_v51 = vsel %vm1027_vm8, %v1124_v40, %v1131_v44  ;;  %1143 = vst.msk [vmem:[#allocation3 + $0x8] sm:$0xf] %vm1011_vm9, %v1139_v52  ;;  %v1320_v17 = vperm.slane %v1314_v16, %v3357_v45  ;;  %v1315_v27 = vrot.slane %v1295_v14, 4  ;;  %v1328_v28 = vsel %vm1027_vm8, %v1312_v63, %v1327_v24 }
 0x291   : > { %v1138_v54 = vpack.c.bf16 %v1132_v51, %v1132_v51  ;;  %1144 = vst.msk [vmem:[#allocation3 + $0xc] sm:$0xf] %vm1011_vm9, %v1140_v50  ;;  %v1337_v18 = vrot.slane %v1332_v15, 4  ;;  %v1336_v33 = vperm.slane %v1328_v28, %v3357_v45  ;;  %v1354_v59 = vunpack.c.l.bf16 %v1353_v58 }
 0x292   : > { %1141 = vst.msk [vmem:[#allocation3] sm:$0xf] %vm1011_vm9, %v1137_v56  ;;  %v1316_v35 = vsel %vm1027_vm8, %v1301_v5, %v1315_v27  ;;  %v1339_v37 = vrot.slane %v1320_v17, 4 }
 0x293   : > { %1142 = vst.msk [vmem:[#allocation3 + $0x4] sm:$0xf] %vm1011_vm9, %v1138_v54  ;;  %v1338_v23 = vsel %vm1027_vm8, %v1337_v18, %v1320_v17  ;;  %v1324_v38 = vperm.slane %v1316_v35, %v3357_v45  ;;  %v1341_v39 = vrot.slane %v1336_v33, 4 }
 0x294   : > { %v1345_v26 = vpack.c.bf16 %v1338_v23, %v1338_v23  ;;  %v1340_v44 = vsel %vm1027_vm8, %v1332_v15, %v1339_v37 }
 0x295   : > { %v1342_v46 = vsel %vm1027_vm8, %v1341_v39, %v1324_v38  ;;  %v1346_v49 = vpack.c.bf16 %v1340_v44, %v1340_v44  ;;  %v1343_v51 = vrot.slane %v1324_v38, 4 }
 0x296   : > { %v1347_v50 = vpack.c.bf16 %v1342_v46, %v1342_v46 }
 0x297   : > { %v1499_v42 = vld [vmem:[#allocation3 + $0x8] sm:$0xf]  ;;  %v1344_v54 = vsel %vm1027_vm8, %v1336_v33, %v1343_v51 }
 0x298   : > { %v1543_v48 = vsel %vm1359_vm10, %v1499_v42, 0  ;;  %v1500_v52 = vld [vmem:[#allocation3 + $0xc] sm:$0xf]  ;;  %v1348_v57 = vpack.c.bf16 %v1344_v54, %v1344_v54 }
 0x299   : > { %v1497_v2 = vld [vmem:[#allocation3] sm:$0xf]  ;;  %v1562_v56 = vsel %vm1359_vm10, %v1500_v52, 0 }
 0x29a   : > { %v1505_v4 = vsel %vm1359_vm10, %v1497_v2, 0  ;;  %v1498_v31 = vld [vmem:[#allocation3 + $0x4] sm:$0xf] }
 0x29b   : > { %1514 = vmatpush.bf16.msrb.mxu2 %v1505_v4  ;;  %v1524_v36 = vsel %vm1359_vm10, %v1498_v31, 0 }
 0x2a3   : > { %v991_v12 = vpop.trf.xlu1 }
 0x2a4   : > { %v1007_v13 = vpack.c.bf16 %v991_v12, %v991_v12 }
 0x2a6   : > { %1012 = vst.msk [vmem:[#allocation2] sm:$0xf] %vm1011_vm9, %v1007_v13 }
 0x2ab   : > { %v992_v19 = vpop.trf.xlu1 }
 0x2ac   : > { %v1008_v20 = vpack.c.bf16 %v992_v19, %v992_v19 }
 0x2ad   : > { %v1349_v22 = vld [vmem:[#allocation2] sm:$0xf] }
 0x2ae   : > { %1013 = vst.msk [vmem:[#allocation2 + $0x4] sm:$0xf] %vm1011_vm9, %v1008_v20  ;;  %v1361_v25 = vsel %vm1359_vm10, %v1349_v22, 0 }
 0x2af   : > { %1370 = vmatpush.bf16.msra.mxu3 %v1361_v25 }
 0x2b2   : > { %2173 = vmatmul.msk.bf16.vlgmr.msra.gmra.mxu3 %vm1355_vm11, %v1345_v26 }
 0x2b3   : > { %v993_v29 = vpop.trf.xlu1 }
 0x2b4   : > { %v1009_v30 = vpack.c.bf16 %v993_v29, %v993_v29 }
 0x2b5   : > { %v1350_v32 = vld [vmem:[#allocation2 + $0x4] sm:$0xf] }
 0x2b6   : > { %1014 = vst.msk [vmem:[#allocation2 + $0x8] sm:$0xf] %vm1011_vm9, %v1009_v30  ;;  %v1380_v34 = vsel %vm1359_vm10, %v1350_v32, 0 }
 0x2b7   : > { %1389 = vmatpush.bf16.msrb.mxu3 %v1380_v34 }
 0x2bb   : > { %1533 = vmatpush.bf16.msra.mxu3 %v1524_v36  ;;  %v994_v40 = vpop.trf.xlu1 }
 0x2bc   : > { %v1010_v41 = vpack.c.bf16 %v994_v40, %v994_v40 }
 0x2bd   : > { %v1351_v43 = vld [vmem:[#allocation2 + $0x8] sm:$0xf] }
 0x2be   : > { %1015 = vst.msk [vmem:[#allocation2 + $0xc] sm:$0xf] %vm1011_vm9, %v1010_v41  ;;  %v1399_v47 = vsel %vm1359_vm10, %v1351_v43, 0 }
 0x2bf   : > { %1408 = vmatpush.bf16.msrb.mxu0 %v1399_v47 }
 0x2c2   : > { %2174 = vmatmul.msk.bf16.vlgmr.msrb.gmra.mxu3 %vm1355_vm11, %v1346_v49  ;;  %2175 = vmatmul.msk.bf16.vlgmr.msrb.gmra.mxu0 %vm1355_vm11, %v1347_v50 }
 0x2c3   : > { %1552 = vmatpush.bf16.msra.mxu0 %v1543_v48 }
 0x2c5   : > { %v1352_v53 = vld [vmem:[#allocation2 + $0xc] sm:$0xf] }
 0x2c6   : > { %v1418_v55 = vsel %vm1359_vm10, %v1352_v53, 0 }
 0x2c7   : > { %1427 = vmatpush.bf16.msrb.mxu1 %v1418_v55 }
 0x2ca   : > { %2176 = vmatmul.msk.bf16.vlgmr.msrb.gmra.mxu1 %vm1355_vm11, %v1348_v57 }
 0x2cb   : > { %1571 = vmatpush.bf16.msra.mxu1 %v1562_v56 }
 0x335   : > { %v1372_v60 = vpop.f32.mrf.mxu3 }
 0x336   : > { %v1373_v61 = vadd.f32 %v1372_v60, %v1354_v59 }
 0x338   : > { %v1433_v62 = vsel %vm1355_vm11, %v1373_v61, -inf }
 0x339   : > { %1434 = vmax.xlane.f32.xlu0 %v1433_v62 }
 0x33d   : > { %v1374_v63 = vpop.f32.mrf.mxu3 }
 0x33f   : > { %v1410_v1 = vpop.f32.mrf.mxu0 }
 0x340   : > { %v1411_v2 = vadd.f32 %v1410_v1, %v1354_v59 }
 0x342   : > { %v1439_v3 = vsel %vm1355_vm11, %v1411_v2, -inf }
 0x343   : > { %1440 = vmax.xlane.f32.xlu1 %v1439_v3 }
 0x345   : > { %v1391_v4 = vpop.f32.mrf.mxu3 }
 0x346   : > { %v1392_v5 = vadd.f32 %v1391_v4, %v1354_v59 }
 0x347   : > { %v1412_v6 = vpop.f32.mrf.mxu0  ;;  %v1429_v7 = vpop.f32.mrf.mxu1 }
 0x348   : > { %v1430_v8 = vadd.f32 %v1429_v7, %v1354_v59  ;;  %v1436_v9 = vsel %vm1355_vm11, %v1392_v5, -inf }
 0x349   : > { %1437 = vmax.xlane.f32.xlu2 %v1436_v9 }
 0x34a   : > { %v1442_v11 = vsel %vm1355_vm11, %v1430_v8, -inf }
 0x34b   : > { %1443 = vmax.xlane.f32.xlu0 %v1442_v11 }
 0x34d   : > { %v1393_v12 = vpop.f32.mrf.mxu3 }
 0x34f   : > { %v1431_v13 = vpop.f32.mrf.mxu1 }
 0x3ac   : > { %v1435_v14 = vpop.xlane.xlu0 %1434 }
 0x3ad   : > { %v1445_v15 = vsub.f32 %v1373_v61, %v1435_v14 }
 0x3af   : > { %v1449_v16 = vpack.c.bf16 %v1445_v15, %v1445_v15 }
 0x3b1   : > { %v1453_v17 = vunpack.c.l.bf16 %v1449_v16 }
 0x3b3   : > { %v1457_v18 = vmul.f32 1.442695, %v1453_v17 }
 0x3b5   : > { %2460 = vpow2.f32 %v1457_v18 }
 0x3b6   : > { %v1441_v19 = vpop.xlane.xlu1 %1440 }
 0x3b7   : > { %v1447_v20 = vsub.f32 %v1411_v2, %v1441_v19 }
 0x3b9   : > { %v1451_v22 = vpack.c.bf16 %v1447_v20, %v1447_v20 }
 0x3bb   : > { %v2461_v23 = vpop.eup %2460  ;;  %v1455_v24 = vunpack.c.l.bf16 %v1451_v22 }
 0x3bc   : > { %v1465_v25 = vpack.c.bf16 %v2461_v23, %v2461_v23  ;;  %v1438_v26 = vpop.xlane.xlu2 %1437 }
 0x3bd   : > { %v1461_v27 = vmul.f32 1.442695, %v1455_v24  ;;  %v1446_v28 = vsub.f32 %v1392_v5, %v1438_v26 }
 0x3be   : > { %2177 = vmatmul.msk.bf16.vlgmr.msrb.gmra.mxu2 %vm1355_vm11, %v1465_v25  ;;  %v1444_v29 = vpop.xlane.xlu0 %1443  ;;  %v1469_v30 = vunpack.c.l.bf16 %v1465_v25 }
 0x3bf   : > { %2462 = vpow2.f32 %v1461_v27  ;;  %v1450_v31 = vpack.c.bf16 %v1446_v28, %v1446_v28  ;;  %v1448_v32 = vsub.f32 %v1430_v8, %v1444_v29 }
 0x3c0   : > { %v1473_v33 = vsel %vm1355_vm11, %v1469_v30, 0.0 }
 0x3c1   : > { %v1454_v34 = vunpack.c.l.bf16 %v1450_v31  ;;  %v1452_v35 = vpack.c.bf16 %v1448_v32, %v1448_v32  ;;  %1474 = vadd.xlane.f32.xlu0 %v1473_v33 }
 0x3c3   : > { %v1459_v36 = vmul.f32 1.442695, %v1454_v34  ;;  %v1456_v37 = vunpack.c.l.bf16 %v1452_v35 }
 0x3c5   : > { %v2463_v38 = vpop.eup %2462  ;;  %2464 = vpow2.f32 %v1459_v36  ;;  %v1463_v39 = vmul.f32 1.442695, %v1456_v37 }
 0x3c6   : > { %v1467_v40 = vpack.c.bf16 %v2463_v38, %v2463_v38 }
 0x3c7   : > { %2466 = vpow2.f32 %v1463_v39 }
 0x3c8   : > { %2179 = vmatmul.msk.bf16.vlgmr.msra.gmra.mxu0 %vm1355_vm11, %v1467_v40  ;;  %v1471_v41 = vunpack.c.l.bf16 %v1467_v40 }
 0x3ca   : > { %v1479_v42 = vsel %vm1355_vm11, %v1471_v41, 0.0 }
 0x3cb   : > { %v2465_v43 = vpop.eup %2464  ;;  %1480 = vadd.xlane.f32.xlu2 %v1479_v42 }
 0x3cc   : > { %v1466_v44 = vpack.c.bf16 %v2465_v43, %v2465_v43 }
 0x3cd   : > { %v2467_v46 = vpop.eup %2466 }
 0x3ce   : > { %v1468_v47 = vpack.c.bf16 %v2467_v46, %v2467_v46  ;;  %2178 = vmatmul.msk.bf16.vlgmr.msra.gmra.mxu3 %vm1355_vm11, %v1466_v44  ;;  %v1470_v48 = vunpack.c.l.bf16 %v1466_v44 }
 0x3d0   : > { %2180 = vmatmul.msk.bf16.vlgmr.msra.gmra.mxu1 %vm1355_vm11, %v1468_v47  ;;  %v1476_v49 = vsel %vm1355_vm11, %v1470_v48, 0.0  ;;  %v1472_v50 = vunpack.c.l.bf16 %v1468_v47 }
 0x3d1   : > { %1477 = vadd.xlane.f32.xlu0 %v1476_v49 }
 0x3d2   : > { %v1482_v51 = vsel %vm1355_vm11, %v1472_v50, 0.0 }
 0x3d3   : > { %1483 = vadd.xlane.f32.xlu2 %v1482_v51 }
 0x434   : > { %v1475_v52 = vpop.xlane.xlu0 %1474 }
 0x435   : > { %v1485_v53 = vpack.c.bf16 %v1475_v52, %v1475_v52 }
 0x437   : > { %v1489_v54 = vunpack.c.l.bf16 %v1485_v53 }
 0x439   : > { %2468 = vrcp.f32 %v1489_v54 }
 0x43e   : > { %v1481_v55 = vpop.xlane.xlu2 %1480 }
 0x43f   : > { %v1487_v56 = vpack.c.bf16 %v1481_v55, %v1481_v55  ;;  %v2469_v2 = vpop.eup %2468 }
 0x441   : > { %v1491_v57 = vunpack.c.l.bf16 %v1487_v56  ;;  %v1516_v58 = vpop.f32.mrf.mxu2 }
 0x442   : > { %v1577_v6 = vmul.f32 %v2469_v2, %v1516_v58 }
 0x443   : > { %2470 = vrcp.f32 %v1491_v57 }
 0x444   : > { %v1478_v59 = vpop.xlane.xlu0 %1477  ;;  %v1583_v12 = vrot.slane %v1577_v6, 4 }
 0x445   : > { %v1486_v60 = vpack.c.bf16 %v1478_v59, %v1478_v59  ;;  %v1554_v61 = vpop.f32.mrf.mxu0 }
 0x446   : > { %v1484_v62 = vpop.xlane.xlu2 %1483 }
 0x447   : > { %v1490_v63 = vunpack.c.l.bf16 %v1486_v60  ;;  %v1488_v1 = vpack.c.bf16 %v1484_v62, %v1484_v62 }
 0x449   : > { %v2471_v3 = vpop.eup %2470  ;;  %v1492_v4 = vunpack.c.l.bf16 %v1488_v1  ;;  %v1518_v5 = vpop.f32.mrf.mxu2  ;;  %2472 = vrcp.f32 %v1490_v63 }
 0x44a   : > { %v1579_v7 = vmul.f32 %v2471_v3, %v1554_v61 }
 0x44b   : > { %2474 = vrcp.f32 %v1492_v4 }
 0x44c   : > { %v1581_v8 = vrot.slane %v1579_v7, 4  ;;  %v1584_v15 = vsel %vm1027_vm8, %v1579_v7, %v1583_v12 }
 0x44d   : > { %v1556_v9 = vpop.f32.mrf.mxu0  ;;  %v1573_v11 = vpop.f32.mrf.mxu1  ;;  %v1592_v22 = vperm.slane %v1584_v15, %v3342_v21 }
 0x44e   : > { %v1582_v14 = vsel %vm1027_vm8, %v1581_v8, %v1577_v6 }
 0x44f   : > { %v2473_v13 = vpop.eup %2472  ;;  %v1588_v20 = vperm.slane %v1582_v14, %v3342_v21  ;;  %v1619_v29 = vrot.slane %v1592_v22, 4 }
 0x451   : > { %v2475_v16 = vpop.eup %2474  ;;  %v1535_v17 = vpop.f32.mrf.mxu3  ;;  %v1607_v28 = vrot.slane %v1588_v20, 4 }
 0x452   : > { %v1580_v18 = vmul.f32 %v2475_v16, %v1573_v11  ;;  %v1578_v19 = vmul.f32 %v2473_v13, %v1535_v17 }
 0x454   : > { %v1593_v23 = vrot.slane %v1580_v18, 4  ;;  %v1595_v24 = vrot.slane %v1578_v19, 4 }
 0x455   : > { %v1575_v25 = vpop.f32.mrf.mxu1 }
 0x456   : > { %v1594_v26 = vsel %vm1027_vm8, %v1593_v23, %v1578_v19  ;;  %v1596_v27 = vsel %vm1027_vm8, %v1580_v18, %v1595_v24  ;;  %v2227_v19 = vld [vmem:[#allocation21 + $0x8] sm:$0xff] }
 0x457   : > { %v1600_v30 = vperm.slane %v1594_v26, %v3342_v21  ;;  %v1604_v31 = vperm.slane %v1596_v27, %v3342_v21  ;;  %1738 = vmatpush.bf16.msra.mxu2 %v2227_v19 }
 0x459   : > { %v1605_v32 = vrot.slane %v1600_v30, 4  ;;  %v1608_v33 = vsel %vm1027_vm8, %v1600_v30, %v1607_v28  ;;  %v1617_v34 = vrot.slane %v1604_v31, 4  ;;  %v1620_v35 = vsel %vm1027_vm8, %v1604_v31, %v1619_v29  ;;  %v1537_v36 = vpop.f32.mrf.mxu3  ;;  %v2449_v28 = vld [vmem:[#allocation22] ss:$0 sm:$0xff] }
 0x45a   : > { %v1616_v37 = vperm.slane %v1608_v33, %v3357_v45  ;;  %v1628_v38 = vperm.slane %v1620_v35, %v3357_v45 }
 0x45b   : > { %v1606_v39 = vsel %vm1027_vm8, %v1605_v32, %v1588_v20  ;;  %v1618_v40 = vsel %vm1027_vm8, %v1617_v34, %v1592_v22 }
 0x45c   : > { %v1612_v41 = vperm.slane %v1606_v39, %v3357_v45  ;;  %v1624_v42 = vperm.slane %v1618_v40, %v3357_v45  ;;  %v1631_v43 = vrot.slane %v1616_v37, 4  ;;  %v1635_v44 = vrot.slane %v1628_v38, 4  ;;  %v2229_v39 = vld [vmem:[#allocation24 + $0x8] sm:$0xff]  ;;  %v2228_v40 = vld [vmem:[#allocation24] sm:$0xff] }
 0x45d   : > { %1808 = vmatpush.bf16.msrb.mxu3 %v2229_v39 }
 0x45e   : > { %v1629_v46 = vrot.slane %v1612_v41, 4  ;;  %v1632_v47 = vsel %vm1027_vm8, 0.0, %v1631_v43  ;;  %v1633_v48 = vrot.slane %v1624_v42, 4  ;;  %v1636_v49 = vsel %vm1027_vm8, 0.0, %v1635_v44 }
 0x45f   : > { %v1642_v50 = vrot.slane %v1632_v47, 4  ;;  %v1653_v51 = vrot.slane %v1636_v49, 4  ;;  %v1637_v52 = vsel %vm1027_vm8, %v1631_v43, %v1612_v41  ;;  %v1648_v53 = vsel %vm1027_vm8, %v1635_v44, %v1624_v42  ;;  %v2232_v43 = vld [vmem:[%s3575_s17 + $0x10] sm:$0xff] }
 0x460   : > { %v1630_v54 = vsel %vm1027_vm8, 0.0, %v1629_v46  ;;  %v1634_v55 = vsel %vm1027_vm8, 0.0, %v1633_v48  ;;  %v1641_v56 = vperm.slane %v1637_v52, %v3342_v21  ;;  %v1652_v57 = vperm.slane %v1648_v53, %v3342_v21  ;;  %v2450_v52 = vld [vmem:[#allocation10] ss:$0 sm:$0xff] }
 0x461   : > { %v1643_v58 = vsel %vm1027_vm8, %v1642_v50, %v1630_v54  ;;  %v1654_v59 = vsel %vm1027_vm8, %v1653_v51, %v1634_v55  ;;  %1809 = vmatpush.bf16.msrb.mxu3 %v2228_v40  ;;  %v2451_v54 = vld [vmem:[#allocation12] ss:$0 sm:$0xff] }
 0x462   : > { %v1647_v60 = vperm.slane %v1643_v58, %v3342_v21  ;;  %v1658_v61 = vperm.slane %v1654_v59, %v3342_v21  ;;  %v1661_v62 = vrot.slane %v1641_v56, 4  ;;  %v1673_v63 = vrot.slane %v1652_v57, 4  ;;  %v2231_v58 = vld [vmem:[%s3575_s17 + $0x8] sm:$0xff]  ;;  %v2230_v59 = vld [vmem:[%s3575_s17] sm:$0xff] }
 0x464   : > { %v1662_v1 = vsel %vm1027_vm8, %v1647_v60, %v1661_v62  ;;  %v1674_v2 = vsel %vm1027_vm8, %v1658_v61, %v1673_v63  ;;  %v1659_v3 = vrot.slane %v1647_v60, 4  ;;  %v1671_v4 = vrot.slane %v1658_v61, 4  ;;  %v2452_v60 = vld [vmem:[#allocation25] ss:$0 sm:$0xff] }
 0x465   : > { %v1682_v5 = vperm.slane %v1674_v2, %v3357_v45  ;;  %v1670_v8 = vperm.slane %v1662_v1, %v3357_v45 }
 0x466   : > { %v1660_v6 = vsel %vm1027_vm8, %v1659_v3, %v1641_v56  ;;  %v1672_v7 = vsel %vm1027_vm8, %v1671_v4, %v1652_v57  ;;  %v2453_v3 = vld [vmem:[%s3617_s18] ss:$0 sm:$0xff] }
 0x467   : > { %v1687_v9 = vrot.slane %v1682_v5, 4  ;;  %v1666_v11 = vperm.slane %v1660_v6, %v3357_v45  ;;  %v1678_v21 = vperm.slane %v1672_v7, %v3357_v45  ;;  %v1689_v17 = vrot.slane %v1670_v8, 4  ;;  %v2226_v45 = vld [vmem:[#allocation21] sm:$0xff] }
 0x468   : > { %1739 = vmatpush.bf16.msra.mxu2 %v2226_v45 }
 0x469   : > { %v1688_v12 = vsel %vm1027_vm8, %v1687_v9, %v1670_v8  ;;  %v1683_v13 = vrot.slane %v1678_v21, 4  ;;  %v1685_v14 = vrot.slane %v1666_v11, 4  ;;  %v1690_v18 = vsel %vm1027_vm8, %v1682_v5, %v1689_v17 }
 0x46a   : > { %1696 = vrot.lane.b32.xlu0 %v1688_v12, %s3032_s28 }
 0x46b   : > { %v1686_v15 = vsel %vm1027_vm8, %v1678_v21, %v1685_v14  ;;  %v1684_v16 = vsel %vm1027_vm8, %v1683_v13, %v1666_v11 }
 0x46c   : > { %1692 = vrot.lane.b32.xlu2 %v1686_v15, %s3033_s4  ;;  %s3618_s4 = sld [smem:[#allocation53_spill]] }
 0x472   : > { %s1884_s2 = scalar_lea.hbm %s3618_s4, %s2217_s23  ;;  %s2918_s22 = scalar_lea.hbm %s3618_s4, 16 }
 0x473   : > { %s1888_s5 = sshll.u32 %s1884_s2, 4  ;;  %s1889_s5 = int_to_ptr.hbm [resolvable:$true] %s1888_s5 }
 0x474   : > { %1700 = vrot.lane.b32.xlu2 %v1690_v18, %s3034_s29  ;;  %s2912_s20 = sshra.s32 %s1889_s5, 4  ;;  %s2913_s20 = int_to_ptr.hbm [resolvable:$true] %s2912_s20 }
 0x475   : > { %s2914_s8 = scalar_lea.hbm %s2913_s20, 8  ;;  %p2919_p5 = scmp.lt.s32.totalorder %s2913_s20, %s3618_s4 }
 0x476   : > { %p2915_p1 = scmp.ne.s32.totalorder %s2913_s20, %s2914_s8  ;;  %p2920_p6 = scmp.lt.s32.totalorder %s2918_s22, %s2914_s8 }
 0x478   : > { %p2916_p2 = pnand %p2915_p1, %p3175_p4  ;;  %p2921_p7 = por %p2920_p6, %p2919_p5 }
 0x47a   : > { %p2917_p3 = pneg %p2916_p2 }
 0x47c   : > { %p2922_p9 = pnand %p2921_p7, %p2917_p3 }
 0x4c6   : > { %v1693_v20 = vpop.permute.xlu2 %1692 }
 0x4c7   : > { %v1703_v22 = vsel %vm1355_vm11, %v1684_v16, %v1693_v20 }
 0x4ce   : > { %v1701_v24 = vpop.permute.xlu2 %1700 }
 0x4dc   : > { %v1697_v23 = vpop.permute.xlu0 %1696 }
 0x4dd   : > { %v1705_v25 = vsel %vm1704_vm12, %v1703_v22, %v1697_v23 }
 0x4de   : > { %v1707_v26 = vsel %vm1706_vm13, %v1705_v25, %v1701_v24 }
 0x4df   : > { %v1708_v27 = vpack.c.bf16 %v1707_v26, %v1707_v26 }
 0x4e1   : > { %2189 = vmatmul.msk.bf16.vlgmr.msra.gmra.mxu2 %vm867_vm0, %v1708_v27 }
 0x564   : > { %v1741_v29 = vpop.f32.mrf.mxu2 }
 0x565   : > { %v1742_v30 = vadd.f32 %v2449_v28, %v1741_v29 }
 0x567   : > { %v1745_v31 = vadd.f32 %v1742_v30, %v3315_v0  ;;  %v2233_v0 = vld [vmem:[%s3575_s17 + $0x18] sm:$0xff] }
 0x568   : > { %1861 = vmatpush.bf16.msrb.mxu0 %v2233_v0 }
 0x569   : > { %v1748_v32 = vsel %vm867_vm0, %v1745_v31, 0.0 }
 0x56a   : > { %1749 = vadd.xlane.f32.xlu0 %v1748_v32 }
 0x56c   : > { %v1743_v33 = vpop.f32.mrf.mxu2  ;;  %1862 = vmatpush.bf16.msrb.mxu0 %v2232_v43 }
 0x570   : > { %1863 = vmatpush.bf16.msrb.mxu0 %v2231_v58 }
 0x574   : > { %1864 = vmatpush.bf16.msrb.mxu0 %v2230_v59 }
 0x5dd   : > { %v1750_v34 = vpop.xlane.xlu0 %1749 }
 0x5de   : > { %v1751_v35 = vmul.f32 %v1750_v34, %v3323_v10 }
 0x5e0   : > { %v1752_v36 = vsub.f32 %v1745_v31, %v1751_v35 }
 0x5e2   : > { %v1753_v37 = vmul.f32 %v1752_v36, %v1752_v36 }
 0x5e4   : > { %v1754_v38 = vsel %vm867_vm0, %v1753_v37, 0.0 }
 0x5e5   : > { %1755 = vadd.xlane.f32.xlu2 %v1754_v38 }
 0x658   : > { %v1756_v41 = vpop.xlane.xlu2 %1755 }
 0x659   : > { %v1757_v42 = vmul.f32 %v1756_v41, %v3323_v10 }
 0x65b   : > { %v1758_v44 = vadd.f32 1e-06, %v1757_v42 }
 0x65d   : > { %2476 = vrsqrt.f32 %v1758_v44  ;;  %vm1765_vm15 = vweird.f32 %v1758_v44 }
 0x663   : > { %v2477_v46 = vpop.eup %2476 }
 0x664   : > { %v1760_v47 = vmul.f32 %v2477_v46, %v1758_v44  ;;  %vm1766_vm14 = vweird.f32 %v2477_v46 }
 0x665   : > { %vm1767_vm1 = vmor %vm1765_vm15, %vm1766_vm14 }
 0x666   : > { %v1761_v48 = vmul.f32 %v2477_v46, %v1760_v47 }
 0x668   : > { %v1762_v49 = vmul.f32 0.5, %v1761_v48 }
 0x66a   : > { %v1763_v50 = vsub.f32 1.5, %v1762_v49 }
 0x66c   : > { %v1764_v51 = vmul.f32 %v2477_v46, %v1763_v50 }
 0x66e   : > { %v1768_v53 = vsel %vm1767_vm1, %v2477_v46, %v1764_v51 }
 0x66f   : > { %v1769_v10 = vmul.f32 %v1768_v53, %v1752_v36 }
 0x671   : > { %v1773_v55 = vmul.f32 %v2450_v52, %v1769_v10 }
 0x673   : > { %v1777_v56 = vadd.f32 %v2451_v54, %v1773_v55 }
 0x675   : > { %v1778_v57 = vpack.c.bf16 %v1777_v56, %v1777_v56 }
 0x677   : > { %2198 = vmatmul.msk.bf16.vlgmr.msrb.gmra.mxu3 %vm867_vm0, %v1778_v57 }
 0x6fa   : > { %v1811_v61 = vpop.f32.mrf.mxu3 }
 0x6fb   : > { %v1812_v62 = vadd.f32 %v2452_v60, %v1811_v61 }
 0x6fd   : > { %v1815_v63 = vmax.f32 %v1812_v62, 0.0 }
 0x6ff   : > { %v1816_v1 = vpack.c.bf16 %v1815_v63, %v1815_v63 }
 0x701   : > { %2215 = vmatmul.msk.bf16.vlgmr.msrb.gmra.mxu0 %vm1853_vm2, %v1816_v1 }
 0x702   : > { %v1813_v2 = vpop.f32.mrf.mxu3 }
 0x77e   : > { %v1866_v4 = vpop.f32.mrf.mxu0 }
 0x77f   : > { %v1867_v5 = vadd.f32 %v2453_v3, %v1866_v4 }
 0x781   : > { %v1870_v6 = vadd.f32 %v1867_v5, %v1745_v31 }
 0x783   : > { %1871 = vst.msk [vmem:[%s847_s3] sm:$0xff] %vm867_vm0, %v1870_v6 }
 0x784   : > { %2925 = shalt.err (!%p2922_p9)
}
 0x785   : > { %2290 = dma.vmem_to_hbm [thread:$0]  (%p3175_p4), %s1887_s26, 128, %s1889_s5, %s1873_s21  }
 0x786   : > { %v1868_v7 = vpop.f32.mrf.mxu0 }
 0x787 PF: > { %s3620_s0 = sld [smem:[#allocation40_spill]] }
 0x788   : > { %s3621_s27 = sld [smem:[#allocation37_spill]] }
 0x78d   : > { %p2367_p10 = scmp.ge.s32.totalorder %s3620_s0, 2 }
 0x78e   : > { %s1900_s24 = sand.u32 1, %s3621_s27  }
 0x78f   : > { %p2336_p11 = pnand %p2367_p10, %p3182_p8  ;;  %s1901_s28 = scalar_lea.sflag [#allocation6], %s1900_s24 }
 0x791   : > { %p2337_p12 = pneg %p2336_p11 }
 0x793   : > { %2983 = dma.done.wait (%p2337_p12), %s1901_s28, 128  }
 0x794   : > { %2985 = vsyncadd (%p2337_p12), %s1901_s28, 4294967168  ;;  %s40_s22 = sadd.s32 1, %s3620_s0   ;;  %s3623_s2 = sld [smem:[#allocation38_spill]] }
 0x795   : > { %p37_p13 = scmp.ge.s32.totalorder %s40_s22, 4   ;;  %s3624_s20 = sld [smem:[#allocation44_spill]] }
 0x796   : > { %s3625_s21 = sld [smem:[#allocation39_spill]]  ;;  %s3627_s0 = smov %s2992_s30 }
 0x797   : > { %s3626_s1 = sld [smem:[#allocation41_spill]]  ;;  %39 = sbr.rel (!%p37_p13) target bundleno = 22 (0x16), region = 196 }
 0x79a   : > { %s3628_s30 = smov %s3623_s2 }
 0x79c   :  { %1907 = vsyncpa [#allocation5], 1 }
 0x79d   :  { %1909 = vsyncpa [#allocation5 + $0x1], 1 }
 0x79e   :  { %1910 = vsyncpa [#allocation8], 1 }
 0x79f   :  { %1911 = vsyncpa [#allocation11], 1 }
 0x7a0   :  { %1912 = vsyncpa [#allocation14], 1 }
 0x7a1   :  { %1913 = vsyncpa [#allocation17], 1 }
 0x7a2   :  { %1914 = vsyncpa [#allocation20], 1 }
 0x7a3   :  { %1915 = vsyncpa [#allocation23], 1 }
 0x7a4   :  { %1916 = vsyncpa [#allocation26], 1 }
 0x7a5   :  { %1917 = vsyncpa [#allocation6], 1 }
 0x7a6   :  { %1919 = vsyncpa [#allocation6 + $0x1], 1 }

</bundles_post_ra>
